<compile_context>
chip_gen: v6e
topology: v6e:2x2x1
jax: 0.10.0
libtpu: 0.0.40
codegen_flags: <defaults>
</compile_context>

<pallas_src>
import jax
import jax.numpy as jnp
import numpy as np
from jax import lax
from jax.experimental import pallas as pl
from jax.experimental.pallas import tpu as pltpu


# ----------------------------- Pallas kernel -------------------------------- #
def intra_review_gru_kernel(
    emb_ref, mask_ref, query_ref,
    w_in_ref, b_in_ref, whh_ref, bhn_ref,
    w1_ref, b1_ref, w2_ref, b2_ref, wa_ref, ba_ref, sel_ref,
    intra_out_ref, hidden_out_ref, attn_out_ref,
    gxf_ref, gxb_ref, outf_ref, outb_ref,
):
    SB, H3 = gxf_ref.shape
    H = H3 // 3
    S = mask_ref.shape[0]
    B = SB // S

    # ---- fused input projection: one (S*B,H) x (H,6H) matmul for BOTH directions.
    #      b_in already holds b_ih for all gates plus b_hh for the r/z gates.
    gx_all = (jnp.dot(emb_ref[...], w_in_ref[...],
                      preferred_element_type=jnp.float32) + b_in_ref[...])      # (S*B, 6H)
    # One-time lane split (outside the serial loop) into flat per-direction scratches.
    gxf_ref[...] = gx_all[:, :3 * H]
    gxb_ref[...] = gx_all[:, 3 * H:]

    # ---- hoist recurrent weights / n-gate hidden biases (2 tiles, ~8 vregs) ----
    wf = whh_ref[0]                                      # (H, 3H) fused [r|z|n], fwd
    wb = whh_ref[1]                                      # (H, 3H) fused [r|z|n], bwd
    bnf = jnp.broadcast_to(bhn_ref[0], (B, H))           # n-gate hidden bias, fwd
    bnb = jnp.broadcast_to(bhn_ref[1], (B, H))           # n-gate hidden bias, bwd

    def gru_cell(h, gx, whh, bn):
        # ONE fused (B,H)x(H,3H) recurrent matmul per direction per step.
        gh = jnp.dot(h, whh, preferred_element_type=jnp.float32)                # (B, 3H)
        r = jax.nn.sigmoid(gx[:, :H] + gh[:, :H])
        z = jax.nn.sigmoid(gx[:, H:2 * H] + gh[:, H:2 * H])
        n = jnp.tanh(gx[:, 2 * H:] + r * (gh[:, 2 * H:] + bn))
        return n + z * (h - n)                           # == (1-z)*n + z*h

    # ---- interleaved, fully unrolled bidirectional recurrence (S static).
    #      Hidden states live in vregs; fwd/bwd cells per step are independent so their
    #      MXU pushes overlap; per-step gate slabs come from VMEM vlds (free slots).
    h_f = jnp.zeros((B, H), jnp.float32)
    h_b = jnp.zeros((B, H), jnp.float32)
    for t in range(S):
        tb = S - 1 - t
        m_f = mask_ref[t]                                # (B, 1) 0/1 mask
        m_b = mask_ref[tb]
        gx_f = gxf_ref[pl.ds(t * B, B), :]               # (B, 3H)
        gx_b = gxb_ref[pl.ds(tb * B, B), :]
        hf_new = gru_cell(h_f, gx_f, wf, bnf)
        hb_new = gru_cell(h_b, gx_b, wb, bnb)
        h_f = h_f + m_f * (hf_new - h_f)                 # packed-seq: keep h on padded steps
        h_b = h_b + m_b * (hb_new - h_b)
        outf_ref[pl.ds(t * B, B), :] = m_f * h_f         # pad_packed_sequence -> zeros on pads
        outb_ref[pl.ds(tb * B, B), :] = m_b * h_b

    hidden_out_ref[0] = h_f                              # (num_dirs, B, H): fwd then bwd
    hidden_out_ref[1] = h_b

    # ---- batched dualFC attention epilogue (flat t-major layout, no per-t loops) ----
    outs = outf_ref[...] + outb_ref[...]                                        # (S*B, H)
    q_proj = (jnp.dot(query_ref[...], w2_ref[...],
                      preferred_element_type=jnp.float32) + b2_ref[...])        # (B, H)
    b1q = jnp.tile(b1_ref[...] + q_proj, (S, 1))         # hoisted, (S*B, H), row t*B+b -> b

    x = jnp.maximum(jnp.dot(outs, w1_ref[...],
                            preferred_element_type=jnp.float32) + b1q, 0.0)     # one MXU push
    # score via VPU multiply + single lane reduction (no width-1 MXU outputs in a loop)
    s = jnp.sum(x * wa_ref[...], axis=-1, keepdims=True) + ba_ref[...]          # (S*B, 1)

    # softmax over the sequence dim per batch element (padded steps included, like the
    # PyTorch module).  Global max shift is mathematically identical to per-column shift.
    e = jnp.exp(s - jnp.max(s, axis=0, keepdims=True))                          # (S*B, 1)
    denom = jnp.dot(sel_ref[...], e, preferred_element_type=jnp.float32)        # (B, 1)
    inv = pl.reciprocal(denom, approx=True)                                     # EUP slot
    attn = e * jnp.tile(inv, (S, 1))                                            # (S*B, 1)
    attn_out_ref[...] = attn

    # weighted sum over the sequence: one (B,S*B)x(S*B,H) matmul with the selection matrix
    weighted = attn * outs                                                      # (S*B, H)
    intra_out_ref[...] = jnp.dot(sel_ref[...], weighted,
                                 preferred_element_type=jnp.float32)            # (B, H)


# ------------------------------ wrapper -------------------------------------- #
def intra_review_gru(embedded, input_lengths, query, params):
    S, B, H = embedded.shape
    f32 = jnp.float32

    # Wrapper-side layout prep (free XLA ops; keeps relayouts out of the kernel).
    emb2 = embedded.reshape(S * B, H).astype(f32)
    mask = (jnp.arange(S)[:, None] < input_lengths[None, :]).astype(f32)[:, :, None]  # (S,B,1)

    # Fused input-projection weight/bias: columns [f_r, f_z, f_n, b_r, b_z, b_n].
    # Fold b_hh of the r/z gates into the fused bias (n-gate b_hh stays separate because
    # torch applies it inside the r * (.) term).
    w_in = jnp.concatenate([params["wih_f"], params["wih_b"]], axis=1)          # (H, 6H)
    b_in_f = jnp.concatenate(
        [params["bih_f"][:, :2 * H] + params["bhh_f"][:, :2 * H],
         params["bih_f"][:, 2 * H:]], axis=1)
    b_in_b = jnp.concatenate(
        [params["bih_b"][:, :2 * H] + params["bhh_b"][:, :2 * H],
         params["bih_b"][:, 2 * H:]], axis=1)
    b_in = jnp.concatenate([b_in_f, b_in_b], axis=1)                            # (1, 6H)

    # Recurrent weights stay fused per direction: (2, H, 3H) in [r|z|n] column order.
    whh = jnp.stack([params["whh_f"], params["whh_b"]], axis=0)                 # (2, H, 3H)
    bhn = jnp.stack([params["bhh_f"][:, 2 * H:],
                     params["bhh_b"][:, 2 * H:]], axis=0)                       # (2, 1, H)
    wa_row = jnp.transpose(params["wa"])                                        # (1, H)

    # Selection matrix for per-batch sums over the sequence in the flat t-major layout:
    # sel[b, t*B + b'] = 1 iff b' == b.  Built host-side, used by two tiny MXU pushes.
    sel = jnp.asarray(((np.arange(S * B)[None, :] % B)
                       == np.arange(B)[:, None]).astype(np.float32))            # (B, S*B)

    args = (emb2, mask, query.astype(f32),
            w_in, b_in, whh, bhn,
            params["w1"], params["b1"], params["w2"], params["b2"],
            wa_row, params["ba"], sel)

    out_shape = (
        jax.ShapeDtypeStruct((B, H), f32),        # intra_outputs
        jax.ShapeDtypeStruct((2, B, H), f32),     # hidden (fwd, bwd)
        jax.ShapeDtypeStruct((S * B, 1), f32),    # attention, flat t-major; reshaped below
    )

    vspec = pl.BlockSpec(memory_space=pltpu.MemorySpace.VMEM)

    flops = (2 * S * B * H * 6 * H            # fused input projection
             + 2 * S * 2 * B * H * 3 * H      # recurrence: 2 fused (H,3H) matmuls / step
             + 2 * B * H * H                  # query projection
             + 2 * S * B * H * H              # attention linear1 (batched)
             + 2 * B * S * B * H              # selection matmuls (denom + weighted sum)
             + 4 * S * B * H)                 # score reduction + elementwise epilogue
    transcendentals = S * B * H * 6 + S * B   # sigmoids/tanh + softmax exp
    bytes_accessed = int(sum(int(np.prod(a.shape)) * 4 for a in args)
                         + sum(int(np.prod(o.shape)) * 4 for o in out_shape))

    # Scratch: 2x(S*B,3H) + 2x(S*B,H) f32  (~32 KiB here) — fits every generation's
    # default scoped VMEM (16 MiB on v5e), so no vmem_limit_bytes override needed.
    intra, hidden, attn_flat = pl.pallas_call(
        intra_review_gru_kernel,
        out_shape=out_shape,
        in_specs=[vspec] * len(args),
        out_specs=(vspec, vspec, vspec),
        scratch_shapes=[
            pltpu.VMEM((S * B, 3 * H), f32),  # fwd gate projections (flat, t-major)
            pltpu.VMEM((S * B, 3 * H), f32),  # bwd gate projections
            pltpu.VMEM((S * B, H), f32),      # fwd outputs
            pltpu.VMEM((S * B, H), f32),      # bwd outputs
        ],
        cost_estimate=pl.CostEstimate(flops=flops,
                                      transcendentals=transcendentals,
                                      bytes_accessed=bytes_accessed),
    )(*args)

    intra_attn = attn_flat.reshape(S, B, 1)                                     # (S, B, 1)
    return intra, hidden, intra_attn


# --------------------------- pure-JAX reference ------------------------------ #
def reference_forward(emb, mask, query, params):
    S, B, H = emb.shape

    def gates(wih, bih):
        return jnp.einsum("sbh,hg->sbg", emb, wih) + bih

    def run_dir(gx_all, whh, bhh, reverse):
        def step(h, inp):
            gx, m = inp
            gh = h @ whh + bhh
            r = jax.nn.sigmoid(gx[:, :H] + gh[:, :H])
            z = jax.nn.sigmoid(gx[:, H:2 * H] + gh[:, H:2 * H])
            n = jnp.tanh(gx[:, 2 * H:] + r * gh[:, 2 * H:])
            h_new = (1.0 - z) * n + z * h
            h = m * h_new + (1.0 - m) * h
            return h, m * h
        h0 = jnp.zeros((B, H), jnp.float32)
        hT, outs = lax.scan(step, h0, (gx_all, mask), reverse=reverse)
        return hT, outs

    h_f, out_f = run_dir(gates(params["wih_f"], params["bih_f"]),
                         params["whh_f"], params["bhh_f"], reverse=False)
    h_b, out_b = run_dir(gates(params["wih_b"], params["bih_b"]),
                         params["whh_b"], params["bhh_b"], reverse=True)
    outputs = out_f + out_b
    q_proj = query @ params["w2"] + params["b2"]
    x = jnp.maximum(jnp.einsum("sbh,hk->sbk", outputs, params["w1"]) + params["b1"]
                    + q_proj[None, :, :], 0.0)
    score = jnp.einsum("sbh,hk->sbk", x, params["wa"]) + params["ba"]
    attn = jax.nn.softmax(score, axis=0)
    intra = jnp.sum(attn * outputs, axis=0)
    hidden = jnp.stack([h_f, h_b], axis=0)
    return intra, hidden, attn


# --------------------------------- main --------------------------------------- #
if __name__ == "__main__":
    S, B, H = 8, 4, 32            # seq_len, batch, hidden_size
    VOCAB, N_ITEMS, N_USERS = 50, 12, 12

    key = jax.random.PRNGKey(0)
    keys = jax.random.split(key, 24)
    sc = 0.1

    def rnd(k, shape):
        return (sc * jax.random.normal(k, shape)).astype(jnp.float32)

    # Embedding tables (deterministic synthetic weights).
    emb_table = rnd(keys[0], (VOCAB, H))
    item_table = rnd(keys[1], (N_ITEMS, H))
    user_table = rnd(keys[2], (N_USERS, H))

    # GRU + dualFC attention parameters; matrices stored as (in, out), gate order [r,z,n].
    params = {
        "wih_f": rnd(keys[3], (H, 3 * H)), "whh_f": rnd(keys[4], (H, 3 * H)),
        "bih_f": rnd(keys[5], (1, 3 * H)), "bhh_f": rnd(keys[6], (1, 3 * H)),
        "wih_b": rnd(keys[7], (H, 3 * H)), "whh_b": rnd(keys[8], (H, 3 * H)),
        "bih_b": rnd(keys[9], (1, 3 * H)), "bhh_b": rnd(keys[10], (1, 3 * H)),
        "w1": rnd(keys[11], (H, H)), "b1": rnd(keys[12], (1, H)),
        "w2": rnd(keys[13], (H, H)), "b2": rnd(keys[14], (1, H)),
        "wa": rnd(keys[15], (H, 1)), "ba": rnd(keys[16], (1, 1)),
    }

    # Inputs (same conventions as the PyTorch forward).
    input_seq = jax.random.randint(keys[17], (S, B), 0, VOCAB)        # (seq, batch)
    input_lengths = jnp.array([8, 5, 3, 6], dtype=jnp.int32)          # max == S
    item_index = jnp.array([0, 3, 5, 7], dtype=jnp.int32)
    user_index = jnp.array([1, 2, 9, 4], dtype=jnp.int32)

    # Glue: embedding lookups (XLA gather) + elementwise item*user product.
    embedded = emb_table[input_seq]                                   # (S, B, H)
    elm_w_product = item_table[item_index] * user_table[user_index]   # (B, H)

    intra_out, hidden, attn = intra_review_gru(embedded, input_lengths, elm_w_product, params)
    jax.block_until_ready(intra_out)
    jax.block_until_ready(hidden)
    jax.block_until_ready(attn)

    # Cross-check against a pure-JAX reference of the same math (original param layout).
    mask3 = (jnp.arange(S)[:, None] < input_lengths[None, :]).astype(jnp.float32)[..., None]
    ref_intra, ref_hidden, ref_attn = reference_forward(embedded, mask3, elm_w_product, params)
    np.testing.assert_allclose(np.asarray(hidden), np.asarray(ref_hidden), rtol=1e-3, atol=1e-4)
    # intra/attn pass through the approximate EUP reciprocal -> slightly wider atol.
    np.testing.assert_allclose(np.asarray(intra_out), np.asarray(ref_intra), rtol=1e-3, atol=2e-4)
    np.testing.assert_allclose(np.asarray(attn), np.asarray(ref_attn), rtol=1e-3, atol=2e-4)

    print("KERNEL_OK")
</pallas_src>

<mosaic_0001>
module attributes {stable_mosaic.version = 11 : i64} {
  func.func @intra_review_gru_kernel(%arg0: memref<32x32xf32, #tpu.memory_space<vmem>>, %arg1: memref<8x4x1xf32, #tpu.memory_space<vmem>>, %arg2: memref<4x32xf32, #tpu.memory_space<vmem>>, %arg3: memref<32x192xf32, #tpu.memory_space<vmem>>, %arg4: memref<1x192xf32, #tpu.memory_space<vmem>>, %arg5: memref<2x32x96xf32, #tpu.memory_space<vmem>>, %arg6: memref<2x1x32xf32, #tpu.memory_space<vmem>>, %arg7: memref<32x32xf32, #tpu.memory_space<vmem>>, %arg8: memref<1x32xf32, #tpu.memory_space<vmem>>, %arg9: memref<32x32xf32, #tpu.memory_space<vmem>>, %arg10: memref<1x32xf32, #tpu.memory_space<vmem>>, %arg11: memref<1x32xf32, #tpu.memory_space<vmem>>, %arg12: memref<1x1xf32, #tpu.memory_space<vmem>>, %arg13: memref<4x32xf32, #tpu.memory_space<vmem>>, %arg14: memref<4x32xf32, #tpu.memory_space<vmem>>, %arg15: memref<2x4x32xf32, #tpu.memory_space<vmem>>, %arg16: memref<32x1xf32, #tpu.memory_space<vmem>>, %arg17: memref<32x96xf32, #tpu.memory_space<vmem>>, %arg18: memref<32x96xf32, #tpu.memory_space<vmem>>, %arg19: memref<32x32xf32, #tpu.memory_space<vmem>>, %arg20: memref<32x32xf32, #tpu.memory_space<vmem>>) attributes {dimension_semantics = [], scalar_prefetch = 0 : i64, scratch_operands = 4 : i64, tpu.core_type = #tpu.core_type<tc>} {
    %c0 = arith.constant 0 : index
    %c0_0 = arith.constant 0 : index
    %0 = vector.load %arg0[%c0, %c0_0] : memref<32x32xf32, #tpu.memory_space<vmem>>, vector<32x32xf32>
    %c0_1 = arith.constant 0 : index
    %c0_2 = arith.constant 0 : index
    %1 = vector.load %arg3[%c0_1, %c0_2] : memref<32x192xf32, #tpu.memory_space<vmem>>, vector<32x192xf32>
    %cst = arith.constant dense<0.000000e+00> : vector<32x192xf32>
    %2 = tpu.matmul %0, %1, %cst {dimension_numbers = #tpu.dot_dimension_numbers<[1], [0], [0], [1], [0, 0, 1, 1], [], []>} : vector<32x32xf32>, vector<32x192xf32>, vector<32x192xf32> -> vector<32x192xf32>
    %c0_3 = arith.constant 0 : index
    %c0_4 = arith.constant 0 : index
    %3 = vector.load %arg4[%c0_3, %c0_4] : memref<1x192xf32, #tpu.memory_space<vmem>>, vector<1x192xf32>
    %4 = vector.broadcast %3 : vector<1x192xf32> to vector<32x192xf32>
    %5 = arith.addf %2, %4 : vector<32x192xf32>
    %6 = vector.extract_strided_slice %5 {offsets = [0, 0], sizes = [32, 96], strides = [1, 1]} : vector<32x192xf32> to vector<32x96xf32>
    %c0_5 = arith.constant 0 : index
    %c0_6 = arith.constant 0 : index
    %7 = vector.load %arg17[%c0_5, %c0_6] : memref<32x96xf32, #tpu.memory_space<vmem>>, vector<32x96xf32>
    tpu.vector_store %arg17[%c0_5, %c0_6], %6 {strides = array<i32>} : memref<32x96xf32, #tpu.memory_space<vmem>>, vector<32x96xf32>,
    %8 = vector.extract_strided_slice %5 {offsets = [0, 96], sizes = [32, 96], strides = [1, 1]} : vector<32x192xf32> to vector<32x96xf32>
    %c0_7 = arith.constant 0 : index
    %c0_8 = arith.constant 0 : index
    %9 = vector.load %arg18[%c0_7, %c0_8] : memref<32x96xf32, #tpu.memory_space<vmem>>, vector<32x96xf32>
    tpu.vector_store %arg18[%c0_7, %c0_8], %8 {strides = array<i32>} : memref<32x96xf32, #tpu.memory_space<vmem>>, vector<32x96xf32>,
    %c0_9 = arith.constant 0 : index
    %c0_10 = arith.constant 0 : index
    %c0_11 = arith.constant 0 : index
    %10 = vector.load %arg5[%c0_9, %c0_10, %c0_11] : memref<2x32x96xf32, #tpu.memory_space<vmem>>, vector<1x32x96xf32>
    %11 = vector.shape_cast %10 : vector<1x32x96xf32> to vector<32x96xf32>
    %c1 = arith.constant 1 : index
    %c0_12 = arith.constant 0 : index
    %c0_13 = arith.constant 0 : index
    %12 = vector.load %arg5[%c1, %c0_12, %c0_13] : memref<2x32x96xf32, #tpu.memory_space<vmem>>, vector<1x32x96xf32>
    %13 = vector.shape_cast %12 : vector<1x32x96xf32> to vector<32x96xf32>
    %c0_14 = arith.constant 0 : index
    %c0_15 = arith.constant 0 : index
    %c0_16 = arith.constant 0 : index
    %14 = vector.load %arg6[%c0_14, %c0_15, %c0_16] : memref<2x1x32xf32, #tpu.memory_space<vmem>>, vector<1x1x32xf32>
    %15 = vector.shape_cast %14 : vector<1x1x32xf32> to vector<1x32xf32>
    %16 = vector.shape_cast %15 : vector<1x32xf32> to vector<1x32xf32>
    %17 = vector.broadcast %16 : vector<1x32xf32> to vector<4x32xf32>
    %c1_17 = arith.constant 1 : index
    %c0_18 = arith.constant 0 : index
    %c0_19 = arith.constant 0 : index
    %18 = vector.load %arg6[%c1_17, %c0_18, %c0_19] : memref<2x1x32xf32, #tpu.memory_space<vmem>>, vector<1x1x32xf32>
    %19 = vector.shape_cast %18 : vector<1x1x32xf32> to vector<1x32xf32>
    %20 = vector.shape_cast %19 : vector<1x32xf32> to vector<1x32xf32>
    %21 = vector.broadcast %20 : vector<1x32xf32> to vector<4x32xf32>
    %cst_20 = arith.constant 0.000000e+00 : f32
    %22 = vector.broadcast %cst_20 : f32 to vector<4x32xf32>
    %cst_21 = arith.constant 0.000000e+00 : f32
    %23 = vector.broadcast %cst_21 : f32 to vector<4x32xf32>
    %c0_22 = arith.constant 0 : index
    %c0_23 = arith.constant 0 : index
    %c0_24 = arith.constant 0 : index
    %24 = vector.load %arg1[%c0_22, %c0_23, %c0_24] : memref<8x4x1xf32, #tpu.memory_space<vmem>>, vector<1x4x1xf32>
    %25 = vector.shape_cast %24 : vector<1x4x1xf32> to vector<4x1xf32>
    %c7 = arith.constant 7 : index
    %c0_25 = arith.constant 0 : index
    %c0_26 = arith.constant 0 : index
    %26 = vector.load %arg1[%c7, %c0_25, %c0_26] : memref<8x4x1xf32, #tpu.memory_space<vmem>>, vector<1x4x1xf32>
    %27 = vector.shape_cast %26 : vector<1x4x1xf32> to vector<4x1xf32>
    %c0_27 = arith.constant 0 : index
    %c0_28 = arith.constant 0 : index
    %28 = vector.load %arg17[%c0_27, %c0_28] : memref<32x96xf32, #tpu.memory_space<vmem>>, vector<4x96xf32>
    %c28 = arith.constant 28 : index
    %c0_29 = arith.constant 0 : index
    %29 = vector.load %arg18[%c28, %c0_29] : memref<32x96xf32, #tpu.memory_space<vmem>>, vector<4x96xf32>
    %cst_30 = arith.constant dense<0.000000e+00> : vector<4x96xf32>
    %30 = tpu.matmul %22, %11, %cst_30 {dimension_numbers = #tpu.dot_dimension_numbers<[1], [0], [0], [1], [0, 0, 1, 1], [], []>} : vector<4x32xf32>, vector<32x96xf32>, vector<4x96xf32> -> vector<4x96xf32>
    %31 = vector.extract_strided_slice %28 {offsets = [0, 0], sizes = [4, 32], strides = [1, 1]} : vector<4x96xf32> to vector<4x32xf32>
    %32 = vector.extract_strided_slice %30 {offsets = [0, 0], sizes = [4, 32], strides = [1, 1]} : vector<4x96xf32> to vector<4x32xf32>
    %33 = arith.addf %31, %32 : vector<4x32xf32>
    %34 = arith.negf %33 : vector<4x32xf32>
    %35 = math.exp %34 : vector<4x32xf32>
    %cst_31 = arith.constant 1.000000e+00 : f32
    %36 = vector.broadcast %cst_31 : f32 to vector<4x32xf32>
    %37 = arith.addf %36, %35 : vector<4x32xf32>
    %38 = arith.divf %36, %37 : vector<4x32xf32>
    %39 = vector.extract_strided_slice %28 {offsets = [0, 32], sizes = [4, 32], strides = [1, 1]} : vector<4x96xf32> to vector<4x32xf32>
    %40 = vector.extract_strided_slice %30 {offsets = [0, 32], sizes = [4, 32], strides = [1, 1]} : vector<4x96xf32> to vector<4x32xf32>
    %41 = arith.addf %39, %40 : vector<4x32xf32>
    %42 = arith.negf %41 : vector<4x32xf32>
    %43 = math.exp %42 : vector<4x32xf32>
    %cst_32 = arith.constant 1.000000e+00 : f32
    %44 = vector.broadcast %cst_32 : f32 to vector<4x32xf32>
    %45 = arith.addf %44, %43 : vector<4x32xf32>
    %46 = arith.divf %44, %45 : vector<4x32xf32>
    %47 = vector.extract_strided_slice %28 {offsets = [0, 64], sizes = [4, 32], strides = [1, 1]} : vector<4x96xf32> to vector<4x32xf32>
    %48 = vector.extract_strided_slice %30 {offsets = [0, 64], sizes = [4, 32], strides = [1, 1]} : vector<4x96xf32> to vector<4x32xf32>
    %49 = arith.addf %48, %17 : vector<4x32xf32>
    %50 = arith.mulf %38, %49 : vector<4x32xf32>
    %51 = arith.addf %47, %50 : vector<4x32xf32>
    %52 = math.tanh %51 : vector<4x32xf32>
    %53 = arith.subf %22, %52 : vector<4x32xf32>
    %54 = arith.mulf %46, %53 : vector<4x32xf32>
    %55 = arith.addf %52, %54 : vector<4x32xf32>
    %cst_33 = arith.constant dense<0.000000e+00> : vector<4x96xf32>
    %56 = tpu.matmul %23, %13, %cst_33 {dimension_numbers = #tpu.dot_dimension_numbers<[1], [0], [0], [1], [0, 0, 1, 1], [], []>} : vector<4x32xf32>, vector<32x96xf32>, vector<4x96xf32> -> vector<4x96xf32>
    %57 = vector.extract_strided_slice %29 {offsets = [0, 0], sizes = [4, 32], strides = [1, 1]} : vector<4x96xf32> to vector<4x32xf32>
    %58 = vector.extract_strided_slice %56 {offsets = [0, 0], sizes = [4, 32], strides = [1, 1]} : vector<4x96xf32> to vector<4x32xf32>
    %59 = arith.addf %57, %58 : vector<4x32xf32>
    %60 = arith.negf %59 : vector<4x32xf32>
    %61 = math.exp %60 : vector<4x32xf32>
    %cst_34 = arith.constant 1.000000e+00 : f32
    %62 = vector.broadcast %cst_34 : f32 to vector<4x32xf32>
    %63 = arith.addf %62, %61 : vector<4x32xf32>
    %64 = arith.divf %62, %63 : vector<4x32xf32>
    %65 = vector.extract_strided_slice %29 {offsets = [0, 32], sizes = [4, 32], strides = [1, 1]} : vector<4x96xf32> to vector<4x32xf32>
    %66 = vector.extract_strided_slice %56 {offsets = [0, 32], sizes = [4, 32], strides = [1, 1]} : vector<4x96xf32> to vector<4x32xf32>
    %67 = arith.addf %65, %66 : vector<4x32xf32>
    %68 = arith.negf %67 : vector<4x32xf32>
    %69 = math.exp %68 : vector<4x32xf32>
    %cst_35 = arith.constant 1.000000e+00 : f32
    %70 = vector.broadcast %cst_35 : f32 to vector<4x32xf32>
    %71 = arith.addf %70, %69 : vector<4x32xf32>
    %72 = arith.divf %70, %71 : vector<4x32xf32>
    %73 = vector.extract_strided_slice %29 {offsets = [0, 64], sizes = [4, 32], strides = [1, 1]} : vector<4x96xf32> to vector<4x32xf32>
    %74 = vector.extract_strided_slice %56 {offsets = [0, 64], sizes = [4, 32], strides = [1, 1]} : vector<4x96xf32> to vector<4x32xf32>
    %75 = arith.addf %74, %21 : vector<4x32xf32>
    %76 = arith.mulf %64, %75 : vector<4x32xf32>
    %77 = arith.addf %73, %76 : vector<4x32xf32>
    %78 = math.tanh %77 : vector<4x32xf32>
    %79 = arith.subf %23, %78 : vector<4x32xf32>
    %80 = arith.mulf %72, %79 : vector<4x32xf32>
    %81 = arith.addf %78, %80 : vector<4x32xf32>
    %82 = arith.subf %55, %22 : vector<4x32xf32>
    %83 = vector.broadcast %25 : vector<4x1xf32> to vector<4x32xf32>
    %84 = arith.mulf %83, %82 : vector<4x32xf32>
    %85 = arith.addf %22, %84 : vector<4x32xf32>
    %86 = arith.subf %81, %23 : vector<4x32xf32>
    %87 = vector.broadcast %27 : vector<4x1xf32> to vector<4x32xf32>
    %88 = arith.mulf %87, %86 : vector<4x32xf32>
    %89 = arith.addf %23, %88 : vector<4x32xf32>
    %90 = vector.broadcast %25 : vector<4x1xf32> to vector<4x32xf32>
    %91 = arith.mulf %90, %85 : vector<4x32xf32>
    %c0_36 = arith.constant 0 : index
    %c0_37 = arith.constant 0 : index
    %92 = vector.load %arg19[%c0_36, %c0_37] : memref<32x32xf32, #tpu.memory_space<vmem>>, vector<4x32xf32>
    tpu.vector_store %arg19[%c0_36, %c0_37], %91 {strides = array<i32>} : memref<32x32xf32, #tpu.memory_space<vmem>>, vector<4x32xf32>,
    %93 = vector.broadcast %27 : vector<4x1xf32> to vector<4x32xf32>
    %94 = arith.mulf %93, %89 : vector<4x32xf32>
    %c28_38 = arith.constant 28 : index
    %c0_39 = arith.constant 0 : index
    %95 = vector.load %arg20[%c28_38, %c0_39] : memref<32x32xf32, #tpu.memory_space<vmem>>, vector<4x32xf32>
    tpu.vector_store %arg20[%c28_38, %c0_39], %94 {strides = array<i32>} : memref<32x32xf32, #tpu.memory_space<vmem>>, vector<4x32xf32>,
    %c1_40 = arith.constant 1 : index
    %c0_41 = arith.constant 0 : index
    %c0_42 = arith.constant 0 : index
    %96 = vector.load %arg1[%c1_40, %c0_41, %c0_42] : memref<8x4x1xf32, #tpu.memory_space<vmem>>, vector<1x4x1xf32>
    %97 = vector.shape_cast %96 : vector<1x4x1xf32> to vector<4x1xf32>
    %c6 = arith.constant 6 : index
    %c0_43 = arith.constant 0 : index
    %c0_44 = arith.constant 0 : index
    %98 = vector.load %arg1[%c6, %c0_43, %c0_44] : memref<8x4x1xf32, #tpu.memory_space<vmem>>, vector<1x4x1xf32>
    %99 = vector.shape_cast %98 : vector<1x4x1xf32> to vector<4x1xf32>
    %c4 = arith.constant 4 : index
    %c0_45 = arith.constant 0 : index
    %100 = vector.load %arg17[%c4, %c0_45] : memref<32x96xf32, #tpu.memory_space<vmem>>, vector<4x96xf32>
    %c24 = arith.constant 24 : index
    %c0_46 = arith.constant 0 : index
    %101 = vector.load %arg18[%c24, %c0_46] : memref<32x96xf32, #tpu.memory_space<vmem>>, vector<4x96xf32>
    %cst_47 = arith.constant dense<0.000000e+00> : vector<4x96xf32>
    %102 = tpu.matmul %85, %11, %cst_47 {dimension_numbers = #tpu.dot_dimension_numbers<[1], [0], [0], [1], [0, 0, 1, 1], [], []>} : vector<4x32xf32>, vector<32x96xf32>, vector<4x96xf32> -> vector<4x96xf32>
    %103 = vector.extract_strided_slice %100 {offsets = [0, 0], sizes = [4, 32], strides = [1, 1]} : vector<4x96xf32> to vector<4x32xf32>
    %104 = vector.extract_strided_slice %102 {offsets = [0, 0], sizes = [4, 32], strides = [1, 1]} : vector<4x96xf32> to vector<4x32xf32>
    %105 = arith.addf %103, %104 : vector<4x32xf32>
    %106 = arith.negf %105 : vector<4x32xf32>
    %107 = math.exp %106 : vector<4x32xf32>
    %cst_48 = arith.constant 1.000000e+00 : f32
    %108 = vector.broadcast %cst_48 : f32 to vector<4x32xf32>
    %109 = arith.addf %108, %107 : vector<4x32xf32>
    %110 = arith.divf %108, %109 : vector<4x32xf32>
    %111 = vector.extract_strided_slice %100 {offsets = [0, 32], sizes = [4, 32], strides = [1, 1]} : vector<4x96xf32> to vector<4x32xf32>
    %112 = vector.extract_strided_slice %102 {offsets = [0, 32], sizes = [4, 32], strides = [1, 1]} : vector<4x96xf32> to vector<4x32xf32>
    %113 = arith.addf %111, %112 : vector<4x32xf32>
    %114 = arith.negf %113 : vector<4x32xf32>
    %115 = math.exp %114 : vector<4x32xf32>
    %cst_49 = arith.constant 1.000000e+00 : f32
    %116 = vector.broadcast %cst_49 : f32 to vector<4x32xf32>
    %117 = arith.addf %116, %115 : vector<4x32xf32>
    %118 = arith.divf %116, %117 : vector<4x32xf32>
    %119 = vector.extract_strided_slice %100 {offsets = [0, 64], sizes = [4, 32], strides = [1, 1]} : vector<4x96xf32> to vector<4x32xf32>
    %120 = vector.extract_strided_slice %102 {offsets = [0, 64], sizes = [4, 32], strides = [1, 1]} : vector<4x96xf32> to vector<4x32xf32>
    %121 = arith.addf %120, %17 : vector<4x32xf32>
    %122 = arith.mulf %110, %121 : vector<4x32xf32>
    %123 = arith.addf %119, %122 : vector<4x32xf32>
    %124 = math.tanh %123 : vector<4x32xf32>
    %125 = arith.subf %85, %124 : vector<4x32xf32>
    %126 = arith.mulf %118, %125 : vector<4x32xf32>
    %127 = arith.addf %124, %126 : vector<4x32xf32>
    %cst_50 = arith.constant dense<0.000000e+00> : vector<4x96xf32>
    %128 = tpu.matmul %89, %13, %cst_50 {dimension_numbers = #tpu.dot_dimension_numbers<[1], [0], [0], [1], [0, 0, 1, 1], [], []>} : vector<4x32xf32>, vector<32x96xf32>, vector<4x96xf32> -> vector<4x96xf32>
    %129 = vector.extract_strided_slice %101 {offsets = [0, 0], sizes = [4, 32], strides = [1, 1]} : vector<4x96xf32> to vector<4x32xf32>
    %130 = vector.extract_strided_slice %128 {offsets = [0, 0], sizes = [4, 32], strides = [1, 1]} : vector<4x96xf32> to vector<4x32xf32>
    %131 = arith.addf %129, %130 : vector<4x32xf32>
    %132 = arith.negf %131 : vector<4x32xf32>
    %133 = math.exp %132 : vector<4x32xf32>
    %cst_51 = arith.constant 1.000000e+00 : f32
    %134 = vector.broadcast %cst_51 : f32 to vector<4x32xf32>
    %135 = arith.addf %134, %133 : vector<4x32xf32>
    %136 = arith.divf %134, %135 : vector<4x32xf32>
    %137 = vector.extract_strided_slice %101 {offsets = [0, 32], sizes = [4, 32], strides = [1, 1]} : vector<4x96xf32> to vector<4x32xf32>
    %138 = vector.extract_strided_slice %128 {offsets = [0, 32], sizes = [4, 32], strides = [1, 1]} : vector<4x96xf32> to vector<4x32xf32>
    %139 = arith.addf %137, %138 : vector<4x32xf32>
    %140 = arith.negf %139 : vector<4x32xf32>
    %141 = math.exp %140 : vector<4x32xf32>
    %cst_52 = arith.constant 1.000000e+00 : f32
    %142 = vector.broadcast %cst_52 : f32 to vector<4x32xf32>
    %143 = arith.addf %142, %141 : vector<4x32xf32>
    %144 = arith.divf %142, %143 : vector<4x32xf32>
    %145 = vector.extract_strided_slice %101 {offsets = [0, 64], sizes = [4, 32], strides = [1, 1]} : vector<4x96xf32> to vector<4x32xf32>
    %146 = vector.extract_strided_slice %128 {offsets = [0, 64], sizes = [4, 32], strides = [1, 1]} : vector<4x96xf32> to vector<4x32xf32>
    %147 = arith.addf %146, %21 : vector<4x32xf32>
    %148 = arith.mulf %136, %147 : vector<4x32xf32>
    %149 = arith.addf %145, %148 : vector<4x32xf32>
    %150 = math.tanh %149 : vector<4x32xf32>
    %151 = arith.subf %89, %150 : vector<4x32xf32>
    %152 = arith.mulf %144, %151 : vector<4x32xf32>
    %153 = arith.addf %150, %152 : vector<4x32xf32>
    %154 = arith.subf %127, %85 : vector<4x32xf32>
    %155 = vector.broadcast %97 : vector<4x1xf32> to vector<4x32xf32>
    %156 = arith.mulf %155, %154 : vector<4x32xf32>
    %157 = arith.addf %85, %156 : vector<4x32xf32>
    %158 = arith.subf %153, %89 : vector<4x32xf32>
    %159 = vector.broadcast %99 : vector<4x1xf32> to vector<4x32xf32>
    %160 = arith.mulf %159, %158 : vector<4x32xf32>
    %161 = arith.addf %89, %160 : vector<4x32xf32>
    %162 = vector.broadcast %97 : vector<4x1xf32> to vector<4x32xf32>
    %163 = arith.mulf %162, %157 : vector<4x32xf32>
    %c4_53 = arith.constant 4 : index
    %c0_54 = arith.constant 0 : index
    %164 = vector.load %arg19[%c4_53, %c0_54] : memref<32x32xf32, #tpu.memory_space<vmem>>, vector<4x32xf32>
    tpu.vector_store %arg19[%c4_53, %c0_54], %163 {strides = array<i32>} : memref<32x32xf32, #tpu.memory_space<vmem>>, vector<4x32xf32>,
    %165 = vector.broadcast %99 : vector<4x1xf32> to vector<4x32xf32>
    %166 = arith.mulf %165, %161 : vector<4x32xf32>
    %c24_55 = arith.constant 24 : index
    %c0_56 = arith.constant 0 : index
    %167 = vector.load %arg20[%c24_55, %c0_56] : memref<32x32xf32, #tpu.memory_space<vmem>>, vector<4x32xf32>
    tpu.vector_store %arg20[%c24_55, %c0_56], %166 {strides = array<i32>} : memref<32x32xf32, #tpu.memory_space<vmem>>, vector<4x32xf32>,
    %c2 = arith.constant 2 : index
    %c0_57 = arith.constant 0 : index
    %c0_58 = arith.constant 0 : index
    %168 = vector.load %arg1[%c2, %c0_57, %c0_58] : memref<8x4x1xf32, #tpu.memory_space<vmem>>, vector<1x4x1xf32>
    %169 = vector.shape_cast %168 : vector<1x4x1xf32> to vector<4x1xf32>
    %c5 = arith.constant 5 : index
    %c0_59 = arith.constant 0 : index
    %c0_60 = arith.constant 0 : index
    %170 = vector.load %arg1[%c5, %c0_59, %c0_60] : memref<8x4x1xf32, #tpu.memory_space<vmem>>, vector<1x4x1xf32>
    %171 = vector.shape_cast %170 : vector<1x4x1xf32> to vector<4x1xf32>
    %c8 = arith.constant 8 : index
    %c0_61 = arith.constant 0 : index
    %172 = vector.load %arg17[%c8, %c0_61] : memref<32x96xf32, #tpu.memory_space<vmem>>, vector<4x96xf32>
    %c20 = arith.constant 20 : index
    %c0_62 = arith.constant 0 : index
    %173 = vector.load %arg18[%c20, %c0_62] : memref<32x96xf32, #tpu.memory_space<vmem>>, vector<4x96xf32>
    %cst_63 = arith.constant dense<0.000000e+00> : vector<4x96xf32>
    %174 = tpu.matmul %157, %11, %cst_63 {dimension_numbers = #tpu.dot_dimension_numbers<[1], [0], [0], [1], [0, 0, 1, 1], [], []>} : vector<4x32xf32>, vector<32x96xf32>, vector<4x96xf32> -> vector<4x96xf32>
    %175 = vector.extract_strided_slice %172 {offsets = [0, 0], sizes = [4, 32], strides = [1, 1]} : vector<4x96xf32> to vector<4x32xf32>
    %176 = vector.extract_strided_slice %174 {offsets = [0, 0], sizes = [4, 32], strides = [1, 1]} : vector<4x96xf32> to vector<4x32xf32>
    %177 = arith.addf %175, %176 : vector<4x32xf32>
    %178 = arith.negf %177 : vector<4x32xf32>
    %179 = math.exp %178 : vector<4x32xf32>
    %cst_64 = arith.constant 1.000000e+00 : f32
    %180 = vector.broadcast %cst_64 : f32 to vector<4x32xf32>
    %181 = arith.addf %180, %179 : vector<4x32xf32>
    %182 = arith.divf %180, %181 : vector<4x32xf32>
    %183 = vector.extract_strided_slice %172 {offsets = [0, 32], sizes = [4, 32], strides = [1, 1]} : vector<4x96xf32> to vector<4x32xf32>
    %184 = vector.extract_strided_slice %174 {offsets = [0, 32], sizes = [4, 32], strides = [1, 1]} : vector<4x96xf32> to vector<4x32xf32>
    %185 = arith.addf %183, %184 : vector<4x32xf32>
    %186 = arith.negf %185 : vector<4x32xf32>
    %187 = math.exp %186 : vector<4x32xf32>
    %cst_65 = arith.constant 1.000000e+00 : f32
    %188 = vector.broadcast %cst_65 : f32 to vector<4x32xf32>
    %189 = arith.addf %188, %187 : vector<4x32xf32>
    %190 = arith.divf %188, %189 : vector<4x32xf32>
    %191 = vector.extract_strided_slice %172 {offsets = [0, 64], sizes = [4, 32], strides = [1, 1]} : vector<4x96xf32> to vector<4x32xf32>
    %192 = vector.extract_strided_slice %174 {offsets = [0, 64], sizes = [4, 32], strides = [1, 1]} : vector<4x96xf32> to vector<4x32xf32>
    %193 = arith.addf %192, %17 : vector<4x32xf32>
    %194 = arith.mulf %182, %193 : vector<4x32xf32>
    %195 = arith.addf %191, %194 : vector<4x32xf32>
    %196 = math.tanh %195 : vector<4x32xf32>
    %197 = arith.subf %157, %196 : vector<4x32xf32>
    %198 = arith.mulf %190, %197 : vector<4x32xf32>
    %199 = arith.addf %196, %198 : vector<4x32xf32>
    %cst_66 = arith.constant dense<0.000000e+00> : vector<4x96xf32>
    %200 = tpu.matmul %161, %13, %cst_66 {dimension_numbers = #tpu.dot_dimension_numbers<[1], [0], [0], [1], [0, 0, 1, 1], [], []>} : vector<4x32xf32>, vector<32x96xf32>, vector<4x96xf32> -> vector<4x96xf32>
    %201 = vector.extract_strided_slice %173 {offsets = [0, 0], sizes = [4, 32], strides = [1, 1]} : vector<4x96xf32> to vector<4x32xf32>
    %202 = vector.extract_strided_slice %200 {offsets = [0, 0], sizes = [4, 32], strides = [1, 1]} : vector<4x96xf32> to vector<4x32xf32>
    %203 = arith.addf %201, %202 : vector<4x32xf32>
    %204 = arith.negf %203 : vector<4x32xf32>
    %205 = math.exp %204 : vector<4x32xf32>
    %cst_67 = arith.constant 1.000000e+00 : f32
    %206 = vector.broadcast %cst_67 : f32 to vector<4x32xf32>
    %207 = arith.addf %206, %205 : vector<4x32xf32>
    %208 = arith.divf %206, %207 : vector<4x32xf32>
    %209 = vector.extract_strided_slice %173 {offsets = [0, 32], sizes = [4, 32], strides = [1, 1]} : vector<4x96xf32> to vector<4x32xf32>
    %210 = vector.extract_strided_slice %200 {offsets = [0, 32], sizes = [4, 32], strides = [1, 1]} : vector<4x96xf32> to vector<4x32xf32>
    %211 = arith.addf %209, %210 : vector<4x32xf32>
    %212 = arith.negf %211 : vector<4x32xf32>
    %213 = math.exp %212 : vector<4x32xf32>
    %cst_68 = arith.constant 1.000000e+00 : f32
    %214 = vector.broadcast %cst_68 : f32 to vector<4x32xf32>
    %215 = arith.addf %214, %213 : vector<4x32xf32>
    %216 = arith.divf %214, %215 : vector<4x32xf32>
    %217 = vector.extract_strided_slice %173 {offsets = [0, 64], sizes = [4, 32], strides = [1, 1]} : vector<4x96xf32> to vector<4x32xf32>
    %218 = vector.extract_strided_slice %200 {offsets = [0, 64], sizes = [4, 32], strides = [1, 1]} : vector<4x96xf32> to vector<4x32xf32>
    %219 = arith.addf %218, %21 : vector<4x32xf32>
    %220 = arith.mulf %208, %219 : vector<4x32xf32>
    %221 = arith.addf %217, %220 : vector<4x32xf32>
    %222 = math.tanh %221 : vector<4x32xf32>
    %223 = arith.subf %161, %222 : vector<4x32xf32>
    %224 = arith.mulf %216, %223 : vector<4x32xf32>
    %225 = arith.addf %222, %224 : vector<4x32xf32>
    %226 = arith.subf %199, %157 : vector<4x32xf32>
    %227 = vector.broadcast %169 : vector<4x1xf32> to vector<4x32xf32>
    %228 = arith.mulf %227, %226 : vector<4x32xf32>
    %229 = arith.addf %157, %228 : vector<4x32xf32>
    %230 = arith.subf %225, %161 : vector<4x32xf32>
    %231 = vector.broadcast %171 : vector<4x1xf32> to vector<4x32xf32>
    %232 = arith.mulf %231, %230 : vector<4x32xf32>
    %233 = arith.addf %161, %232 : vector<4x32xf32>
    %234 = vector.broadcast %169 : vector<4x1xf32> to vector<4x32xf32>
    %235 = arith.mulf %234, %229 : vector<4x32xf32>
    %c8_69 = arith.constant 8 : index
    %c0_70 = arith.constant 0 : index
    %236 = vector.load %arg19[%c8_69, %c0_70] : memref<32x32xf32, #tpu.memory_space<vmem>>, vector<4x32xf32>
    tpu.vector_store %arg19[%c8_69, %c0_70], %235 {strides = array<i32>} : memref<32x32xf32, #tpu.memory_space<vmem>>, vector<4x32xf32>,
    %237 = vector.broadcast %171 : vector<4x1xf32> to vector<4x32xf32>
    %238 = arith.mulf %237, %233 : vector<4x32xf32>
    %c20_71 = arith.constant 20 : index
    %c0_72 = arith.constant 0 : index
    %239 = vector.load %arg20[%c20_71, %c0_72] : memref<32x32xf32, #tpu.memory_space<vmem>>, vector<4x32xf32>
    tpu.vector_store %arg20[%c20_71, %c0_72], %238 {strides = array<i32>} : memref<32x32xf32, #tpu.memory_space<vmem>>, vector<4x32xf32>,
    %c3 = arith.constant 3 : index
    %c0_73 = arith.constant 0 : index
    %c0_74 = arith.constant 0 : index
    %240 = vector.load %arg1[%c3, %c0_73, %c0_74] : memref<8x4x1xf32, #tpu.memory_space<vmem>>, vector<1x4x1xf32>
    %241 = vector.shape_cast %240 : vector<1x4x1xf32> to vector<4x1xf32>
    %c4_75 = arith.constant 4 : index
    %c0_76 = arith.constant 0 : index
    %c0_77 = arith.constant 0 : index
    %242 = vector.load %arg1[%c4_75, %c0_76, %c0_77] : memref<8x4x1xf32, #tpu.memory_space<vmem>>, vector<1x4x1xf32>
    %243 = vector.shape_cast %242 : vector<1x4x1xf32> to vector<4x1xf32>
    %c12 = arith.constant 12 : index
    %c0_78 = arith.constant 0 : index
    %244 = vector.load %arg17[%c12, %c0_78] : memref<32x96xf32, #tpu.memory_space<vmem>>, vector<4x96xf32>
    %c16 = arith.constant 16 : index
    %c0_79 = arith.constant 0 : index
    %245 = vector.load %arg18[%c16, %c0_79] : memref<32x96xf32, #tpu.memory_space<vmem>>, vector<4x96xf32>
    %cst_80 = arith.constant dense<0.000000e+00> : vector<4x96xf32>
    %246 = tpu.matmul %229, %11, %cst_80 {dimension_numbers = #tpu.dot_dimension_numbers<[1], [0], [0], [1], [0, 0, 1, 1], [], []>} : vector<4x32xf32>, vector<32x96xf32>, vector<4x96xf32> -> vector<4x96xf32>
    %247 = vector.extract_strided_slice %244 {offsets = [0, 0], sizes = [4, 32], strides = [1, 1]} : vector<4x96xf32> to vector<4x32xf32>
    %248 = vector.extract_strided_slice %246 {offsets = [0, 0], sizes = [4, 32], strides = [1, 1]} : vector<4x96xf32> to vector<4x32xf32>
    %249 = arith.addf %247, %248 : vector<4x32xf32>
    %250 = arith.negf %249 : vector<4x32xf32>
    %251 = math.exp %250 : vector<4x32xf32>
    %cst_81 = arith.constant 1.000000e+00 : f32
    %252 = vector.broadcast %cst_81 : f32 to vector<4x32xf32>
    %253 = arith.addf %252, %251 : vector<4x32xf32>
    %254 = arith.divf %252, %253 : vector<4x32xf32>
    %255 = vector.extract_strided_slice %244 {offsets = [0, 32], sizes = [4, 32], strides = [1, 1]} : vector<4x96xf32> to vector<4x32xf32>
    %256 = vector.extract_strided_slice %246 {offsets = [0, 32], sizes = [4, 32], strides = [1, 1]} : vector<4x96xf32> to vector<4x32xf32>
    %257 = arith.addf %255, %256 : vector<4x32xf32>
    %258 = arith.negf %257 : vector<4x32xf32>
    %259 = math.exp %258 : vector<4x32xf32>
    %cst_82 = arith.constant 1.000000e+00 : f32
    %260 = vector.broadcast %cst_82 : f32 to vector<4x32xf32>
    %261 = arith.addf %260, %259 : vector<4x32xf32>
    %262 = arith.divf %260, %261 : vector<4x32xf32>
    %263 = vector.extract_strided_slice %244 {offsets = [0, 64], sizes = [4, 32], strides = [1, 1]} : vector<4x96xf32> to vector<4x32xf32>
    %264 = vector.extract_strided_slice %246 {offsets = [0, 64], sizes = [4, 32], strides = [1, 1]} : vector<4x96xf32> to vector<4x32xf32>
    %265 = arith.addf %264, %17 : vector<4x32xf32>
    %266 = arith.mulf %254, %265 : vector<4x32xf32>
    %267 = arith.addf %263, %266 : vector<4x32xf32>
    %268 = math.tanh %267 : vector<4x32xf32>
    %269 = arith.subf %229, %268 : vector<4x32xf32>
    %270 = arith.mulf %262, %269 : vector<4x32xf32>
    %271 = arith.addf %268, %270 : vector<4x32xf32>
    %cst_83 = arith.constant dense<0.000000e+00> : vector<4x96xf32>
    %272 = tpu.matmul %233, %13, %cst_83 {dimension_numbers = #tpu.dot_dimension_numbers<[1], [0], [0], [1], [0, 0, 1, 1], [], []>} : vector<4x32xf32>, vector<32x96xf32>, vector<4x96xf32> -> vector<4x96xf32>
    %273 = vector.extract_strided_slice %245 {offsets = [0, 0], sizes = [4, 32], strides = [1, 1]} : vector<4x96xf32> to vector<4x32xf32>
    %274 = vector.extract_strided_slice %272 {offsets = [0, 0], sizes = [4, 32], strides = [1, 1]} : vector<4x96xf32> to vector<4x32xf32>
    %275 = arith.addf %273, %274 : vector<4x32xf32>
    %276 = arith.negf %275 : vector<4x32xf32>
    %277 = math.exp %276 : vector<4x32xf32>
    %cst_84 = arith.constant 1.000000e+00 : f32
    %278 = vector.broadcast %cst_84 : f32 to vector<4x32xf32>
    %279 = arith.addf %278, %277 : vector<4x32xf32>
    %280 = arith.divf %278, %279 : vector<4x32xf32>
    %281 = vector.extract_strided_slice %245 {offsets = [0, 32], sizes = [4, 32], strides = [1, 1]} : vector<4x96xf32> to vector<4x32xf32>
    %282 = vector.extract_strided_slice %272 {offsets = [0, 32], sizes = [4, 32], strides = [1, 1]} : vector<4x96xf32> to vector<4x32xf32>
    %283 = arith.addf %281, %282 : vector<4x32xf32>
    %284 = arith.negf %283 : vector<4x32xf32>
    %285 = math.exp %284 : vector<4x32xf32>
    %cst_85 = arith.constant 1.000000e+00 : f32
    %286 = vector.broadcast %cst_85 : f32 to vector<4x32xf32>
    %287 = arith.addf %286, %285 : vector<4x32xf32>
    %288 = arith.divf %286, %287 : vector<4x32xf32>
    %289 = vector.extract_strided_slice %245 {offsets = [0, 64], sizes = [4, 32], strides = [1, 1]} : vector<4x96xf32> to vector<4x32xf32>
    %290 = vector.extract_strided_slice %272 {offsets = [0, 64], sizes = [4, 32], strides = [1, 1]} : vector<4x96xf32> to vector<4x32xf32>
    %291 = arith.addf %290, %21 : vector<4x32xf32>
    %292 = arith.mulf %280, %291 : vector<4x32xf32>
    %293 = arith.addf %289, %292 : vector<4x32xf32>
    %294 = math.tanh %293 : vector<4x32xf32>
    %295 = arith.subf %233, %294 : vector<4x32xf32>
    %296 = arith.mulf %288, %295 : vector<4x32xf32>
    %297 = arith.addf %294, %296 : vector<4x32xf32>
    %298 = arith.subf %271, %229 : vector<4x32xf32>
    %299 = vector.broadcast %241 : vector<4x1xf32> to vector<4x32xf32>
    %300 = arith.mulf %299, %298 : vector<4x32xf32>
    %301 = arith.addf %229, %300 : vector<4x32xf32>
    %302 = arith.subf %297, %233 : vector<4x32xf32>
    %303 = vector.broadcast %243 : vector<4x1xf32> to vector<4x32xf32>
    %304 = arith.mulf %303, %302 : vector<4x32xf32>
    %305 = arith.addf %233, %304 : vector<4x32xf32>
    %306 = vector.broadcast %241 : vector<4x1xf32> to vector<4x32xf32>
    %307 = arith.mulf %306, %301 : vector<4x32xf32>
    %c12_86 = arith.constant 12 : index
    %c0_87 = arith.constant 0 : index
    %308 = vector.load %arg19[%c12_86, %c0_87] : memref<32x32xf32, #tpu.memory_space<vmem>>, vector<4x32xf32>
    tpu.vector_store %arg19[%c12_86, %c0_87], %307 {strides = array<i32>} : memref<32x32xf32, #tpu.memory_space<vmem>>, vector<4x32xf32>,
    %309 = vector.broadcast %243 : vector<4x1xf32> to vector<4x32xf32>
    %310 = arith.mulf %309, %305 : vector<4x32xf32>
    %c16_88 = arith.constant 16 : index
    %c0_89 = arith.constant 0 : index
    %311 = vector.load %arg20[%c16_88, %c0_89] : memref<32x32xf32, #tpu.memory_space<vmem>>, vector<4x32xf32>
    tpu.vector_store %arg20[%c16_88, %c0_89], %310 {strides = array<i32>} : memref<32x32xf32, #tpu.memory_space<vmem>>, vector<4x32xf32>,
    %c4_90 = arith.constant 4 : index
    %c0_91 = arith.constant 0 : index
    %c0_92 = arith.constant 0 : index
    %312 = vector.load %arg1[%c4_90, %c0_91, %c0_92] : memref<8x4x1xf32, #tpu.memory_space<vmem>>, vector<1x4x1xf32>
    %313 = vector.shape_cast %312 : vector<1x4x1xf32> to vector<4x1xf32>
    %c3_93 = arith.constant 3 : index
    %c0_94 = arith.constant 0 : index
    %c0_95 = arith.constant 0 : index
    %314 = vector.load %arg1[%c3_93, %c0_94, %c0_95] : memref<8x4x1xf32, #tpu.memory_space<vmem>>, vector<1x4x1xf32>
    %315 = vector.shape_cast %314 : vector<1x4x1xf32> to vector<4x1xf32>
    %c16_96 = arith.constant 16 : index
    %c0_97 = arith.constant 0 : index
    %316 = vector.load %arg17[%c16_96, %c0_97] : memref<32x96xf32, #tpu.memory_space<vmem>>, vector<4x96xf32>
    %c12_98 = arith.constant 12 : index
    %c0_99 = arith.constant 0 : index
    %317 = vector.load %arg18[%c12_98, %c0_99] : memref<32x96xf32, #tpu.memory_space<vmem>>, vector<4x96xf32>
    %cst_100 = arith.constant dense<0.000000e+00> : vector<4x96xf32>
    %318 = tpu.matmul %301, %11, %cst_100 {dimension_numbers = #tpu.dot_dimension_numbers<[1], [0], [0], [1], [0, 0, 1, 1], [], []>} : vector<4x32xf32>, vector<32x96xf32>, vector<4x96xf32> -> vector<4x96xf32>
    %319 = vector.extract_strided_slice %316 {offsets = [0, 0], sizes = [4, 32], strides = [1, 1]} : vector<4x96xf32> to vector<4x32xf32>
    %320 = vector.extract_strided_slice %318 {offsets = [0, 0], sizes = [4, 32], strides = [1, 1]} : vector<4x96xf32> to vector<4x32xf32>
    %321 = arith.addf %319, %320 : vector<4x32xf32>
    %322 = arith.negf %321 : vector<4x32xf32>
    %323 = math.exp %322 : vector<4x32xf32>
    %cst_101 = arith.constant 1.000000e+00 : f32
    %324 = vector.broadcast %cst_101 : f32 to vector<4x32xf32>
    %325 = arith.addf %324, %323 : vector<4x32xf32>
    %326 = arith.divf %324, %325 : vector<4x32xf32>
    %327 = vector.extract_strided_slice %316 {offsets = [0, 32], sizes = [4, 32], strides = [1, 1]} : vector<4x96xf32> to vector<4x32xf32>
    %328 = vector.extract_strided_slice %318 {offsets = [0, 32], sizes = [4, 32], strides = [1, 1]} : vector<4x96xf32> to vector<4x32xf32>
    %329 = arith.addf %327, %328 : vector<4x32xf32>
    %330 = arith.negf %329 : vector<4x32xf32>
    %331 = math.exp %330 : vector<4x32xf32>
    %cst_102 = arith.constant 1.000000e+00 : f32
    %332 = vector.broadcast %cst_102 : f32 to vector<4x32xf32>
    %333 = arith.addf %332, %331 : vector<4x32xf32>
    %334 = arith.divf %332, %333 : vector<4x32xf32>
    %335 = vector.extract_strided_slice %316 {offsets = [0, 64], sizes = [4, 32], strides = [1, 1]} : vector<4x96xf32> to vector<4x32xf32>
    %336 = vector.extract_strided_slice %318 {offsets = [0, 64], sizes = [4, 32], strides = [1, 1]} : vector<4x96xf32> to vector<4x32xf32>
    %337 = arith.addf %336, %17 : vector<4x32xf32>
    %338 = arith.mulf %326, %337 : vector<4x32xf32>
    %339 = arith.addf %335, %338 : vector<4x32xf32>
    %340 = math.tanh %339 : vector<4x32xf32>
    %341 = arith.subf %301, %340 : vector<4x32xf32>
    %342 = arith.mulf %334, %341 : vector<4x32xf32>
    %343 = arith.addf %340, %342 : vector<4x32xf32>
    %cst_103 = arith.constant dense<0.000000e+00> : vector<4x96xf32>
    %344 = tpu.matmul %305, %13, %cst_103 {dimension_numbers = #tpu.dot_dimension_numbers<[1], [0], [0], [1], [0, 0, 1, 1], [], []>} : vector<4x32xf32>, vector<32x96xf32>, vector<4x96xf32> -> vector<4x96xf32>
    %345 = vector.extract_strided_slice %317 {offsets = [0, 0], sizes = [4, 32], strides = [1, 1]} : vector<4x96xf32> to vector<4x32xf32>
    %346 = vector.extract_strided_slice %344 {offsets = [0, 0], sizes = [4, 32], strides = [1, 1]} : vector<4x96xf32> to vector<4x32xf32>
    %347 = arith.addf %345, %346 : vector<4x32xf32>
    %348 = arith.negf %347 : vector<4x32xf32>
    %349 = math.exp %348 : vector<4x32xf32>
    %cst_104 = arith.constant 1.000000e+00 : f32
    %350 = vector.broadcast %cst_104 : f32 to vector<4x32xf32>
    %351 = arith.addf %350, %349 : vector<4x32xf32>
    %352 = arith.divf %350, %351 : vector<4x32xf32>
    %353 = vector.extract_strided_slice %317 {offsets = [0, 32], sizes = [4, 32], strides = [1, 1]} : vector<4x96xf32> to vector<4x32xf32>
    %354 = vector.extract_strided_slice %344 {offsets = [0, 32], sizes = [4, 32], strides = [1, 1]} : vector<4x96xf32> to vector<4x32xf32>
    %355 = arith.addf %353, %354 : vector<4x32xf32>
    %356 = arith.negf %355 : vector<4x32xf32>
    %357 = math.exp %356 : vector<4x32xf32>
    %cst_105 = arith.constant 1.000000e+00 : f32
    %358 = vector.broadcast %cst_105 : f32 to vector<4x32xf32>
    %359 = arith.addf %358, %357 : vector<4x32xf32>
    %360 = arith.divf %358, %359 : vector<4x32xf32>
    %361 = vector.extract_strided_slice %317 {offsets = [0, 64], sizes = [4, 32], strides = [1, 1]} : vector<4x96xf32> to vector<4x32xf32>
    %362 = vector.extract_strided_slice %344 {offsets = [0, 64], sizes = [4, 32], strides = [1, 1]} : vector<4x96xf32> to vector<4x32xf32>
    %363 = arith.addf %362, %21 : vector<4x32xf32>
    %364 = arith.mulf %352, %363 : vector<4x32xf32>
    %365 = arith.addf %361, %364 : vector<4x32xf32>
    %366 = math.tanh %365 : vector<4x32xf32>
    %367 = arith.subf %305, %366 : vector<4x32xf32>
    %368 = arith.mulf %360, %367 : vector<4x32xf32>
    %369 = arith.addf %366, %368 : vector<4x32xf32>
    %370 = arith.subf %343, %301 : vector<4x32xf32>
    %371 = vector.broadcast %313 : vector<4x1xf32> to vector<4x32xf32>
    %372 = arith.mulf %371, %370 : vector<4x32xf32>
    %373 = arith.addf %301, %372 : vector<4x32xf32>
    %374 = arith.subf %369, %305 : vector<4x32xf32>
    %375 = vector.broadcast %315 : vector<4x1xf32> to vector<4x32xf32>
    %376 = arith.mulf %375, %374 : vector<4x32xf32>
    %377 = arith.addf %305, %376 : vector<4x32xf32>
    %378 = vector.broadcast %313 : vector<4x1xf32> to vector<4x32xf32>
    %379 = arith.mulf %378, %373 : vector<4x32xf32>
    %c16_106 = arith.constant 16 : index
    %c0_107 = arith.constant 0 : index
    %380 = vector.load %arg19[%c16_106, %c0_107] : memref<32x32xf32, #tpu.memory_space<vmem>>, vector<4x32xf32>
    tpu.vector_store %arg19[%c16_106, %c0_107], %379 {strides = array<i32>} : memref<32x32xf32, #tpu.memory_space<vmem>>, vector<4x32xf32>,
    %381 = vector.broadcast %315 : vector<4x1xf32> to vector<4x32xf32>
    %382 = arith.mulf %381, %377 : vector<4x32xf32>
    %c12_108 = arith.constant 12 : index
    %c0_109 = arith.constant 0 : index
    %383 = vector.load %arg20[%c12_108, %c0_109] : memref<32x32xf32, #tpu.memory_space<vmem>>, vector<4x32xf32>
    tpu.vector_store %arg20[%c12_108, %c0_109], %382 {strides = array<i32>} : memref<32x32xf32, #tpu.memory_space<vmem>>, vector<4x32xf32>,
    %c5_110 = arith.constant 5 : index
    %c0_111 = arith.constant 0 : index
    %c0_112 = arith.constant 0 : index
    %384 = vector.load %arg1[%c5_110, %c0_111, %c0_112] : memref<8x4x1xf32, #tpu.memory_space<vmem>>, vector<1x4x1xf32>
    %385 = vector.shape_cast %384 : vector<1x4x1xf32> to vector<4x1xf32>
    %c2_113 = arith.constant 2 : index
    %c0_114 = arith.constant 0 : index
    %c0_115 = arith.constant 0 : index
    %386 = vector.load %arg1[%c2_113, %c0_114, %c0_115] : memref<8x4x1xf32, #tpu.memory_space<vmem>>, vector<1x4x1xf32>
    %387 = vector.shape_cast %386 : vector<1x4x1xf32> to vector<4x1xf32>
    %c20_116 = arith.constant 20 : index
    %c0_117 = arith.constant 0 : index
    %388 = vector.load %arg17[%c20_116, %c0_117] : memref<32x96xf32, #tpu.memory_space<vmem>>, vector<4x96xf32>
    %c8_118 = arith.constant 8 : index
    %c0_119 = arith.constant 0 : index
    %389 = vector.load %arg18[%c8_118, %c0_119] : memref<32x96xf32, #tpu.memory_space<vmem>>, vector<4x96xf32>
    %cst_120 = arith.constant dense<0.000000e+00> : vector<4x96xf32>
    %390 = tpu.matmul %373, %11, %cst_120 {dimension_numbers = #tpu.dot_dimension_numbers<[1], [0], [0], [1], [0, 0, 1, 1], [], []>} : vector<4x32xf32>, vector<32x96xf32>, vector<4x96xf32> -> vector<4x96xf32>
    %391 = vector.extract_strided_slice %388 {offsets = [0, 0], sizes = [4, 32], strides = [1, 1]} : vector<4x96xf32> to vector<4x32xf32>
    %392 = vector.extract_strided_slice %390 {offsets = [0, 0], sizes = [4, 32], strides = [1, 1]} : vector<4x96xf32> to vector<4x32xf32>
    %393 = arith.addf %391, %392 : vector<4x32xf32>
    %394 = arith.negf %393 : vector<4x32xf32>
    %395 = math.exp %394 : vector<4x32xf32>
    %cst_121 = arith.constant 1.000000e+00 : f32
    %396 = vector.broadcast %cst_121 : f32 to vector<4x32xf32>
    %397 = arith.addf %396, %395 : vector<4x32xf32>
    %398 = arith.divf %396, %397 : vector<4x32xf32>
    %399 = vector.extract_strided_slice %388 {offsets = [0, 32], sizes = [4, 32], strides = [1, 1]} : vector<4x96xf32> to vector<4x32xf32>
    %400 = vector.extract_strided_slice %390 {offsets = [0, 32], sizes = [4, 32], strides = [1, 1]} : vector<4x96xf32> to vector<4x32xf32>
    %401 = arith.addf %399, %400 : vector<4x32xf32>
    %402 = arith.negf %401 : vector<4x32xf32>
    %403 = math.exp %402 : vector<4x32xf32>
    %cst_122 = arith.constant 1.000000e+00 : f32
    %404 = vector.broadcast %cst_122 : f32 to vector<4x32xf32>
    %405 = arith.addf %404, %403 : vector<4x32xf32>
    %406 = arith.divf %404, %405 : vector<4x32xf32>
    %407 = vector.extract_strided_slice %388 {offsets = [0, 64], sizes = [4, 32], strides = [1, 1]} : vector<4x96xf32> to vector<4x32xf32>
    %408 = vector.extract_strided_slice %390 {offsets = [0, 64], sizes = [4, 32], strides = [1, 1]} : vector<4x96xf32> to vector<4x32xf32>
    %409 = arith.addf %408, %17 : vector<4x32xf32>
    %410 = arith.mulf %398, %409 : vector<4x32xf32>
    %411 = arith.addf %407, %410 : vector<4x32xf32>
    %412 = math.tanh %411 : vector<4x32xf32>
    %413 = arith.subf %373, %412 : vector<4x32xf32>
    %414 = arith.mulf %406, %413 : vector<4x32xf32>
    %415 = arith.addf %412, %414 : vector<4x32xf32>
    %cst_123 = arith.constant dense<0.000000e+00> : vector<4x96xf32>
    %416 = tpu.matmul %377, %13, %cst_123 {dimension_numbers = #tpu.dot_dimension_numbers<[1], [0], [0], [1], [0, 0, 1, 1], [], []>} : vector<4x32xf32>, vector<32x96xf32>, vector<4x96xf32> -> vector<4x96xf32>
    %417 = vector.extract_strided_slice %389 {offsets = [0, 0], sizes = [4, 32], strides = [1, 1]} : vector<4x96xf32> to vector<4x32xf32>
    %418 = vector.extract_strided_slice %416 {offsets = [0, 0], sizes = [4, 32], strides = [1, 1]} : vector<4x96xf32> to vector<4x32xf32>
    %419 = arith.addf %417, %418 : vector<4x32xf32>
    %420 = arith.negf %419 : vector<4x32xf32>
    %421 = math.exp %420 : vector<4x32xf32>
    %cst_124 = arith.constant 1.000000e+00 : f32
    %422 = vector.broadcast %cst_124 : f32 to vector<4x32xf32>
    %423 = arith.addf %422, %421 : vector<4x32xf32>
    %424 = arith.divf %422, %423 : vector<4x32xf32>
    %425 = vector.extract_strided_slice %389 {offsets = [0, 32], sizes = [4, 32], strides = [1, 1]} : vector<4x96xf32> to vector<4x32xf32>
    %426 = vector.extract_strided_slice %416 {offsets = [0, 32], sizes = [4, 32], strides = [1, 1]} : vector<4x96xf32> to vector<4x32xf32>
    %427 = arith.addf %425, %426 : vector<4x32xf32>
    %428 = arith.negf %427 : vector<4x32xf32>
    %429 = math.exp %428 : vector<4x32xf32>
    %cst_125 = arith.constant 1.000000e+00 : f32
    %430 = vector.broadcast %cst_125 : f32 to vector<4x32xf32>
    %431 = arith.addf %430, %429 : vector<4x32xf32>
    %432 = arith.divf %430, %431 : vector<4x32xf32>
    %433 = vector.extract_strided_slice %389 {offsets = [0, 64], sizes = [4, 32], strides = [1, 1]} : vector<4x96xf32> to vector<4x32xf32>
    %434 = vector.extract_strided_slice %416 {offsets = [0, 64], sizes = [4, 32], strides = [1, 1]} : vector<4x96xf32> to vector<4x32xf32>
    %435 = arith.addf %434, %21 : vector<4x32xf32>
    %436 = arith.mulf %424, %435 : vector<4x32xf32>
    %437 = arith.addf %433, %436 : vector<4x32xf32>
    %438 = math.tanh %437 : vector<4x32xf32>
    %439 = arith.subf %377, %438 : vector<4x32xf32>
    %440 = arith.mulf %432, %439 : vector<4x32xf32>
    %441 = arith.addf %438, %440 : vector<4x32xf32>
    %442 = arith.subf %415, %373 : vector<4x32xf32>
    %443 = vector.broadcast %385 : vector<4x1xf32> to vector<4x32xf32>
    %444 = arith.mulf %443, %442 : vector<4x32xf32>
    %445 = arith.addf %373, %444 : vector<4x32xf32>
    %446 = arith.subf %441, %377 : vector<4x32xf32>
    %447 = vector.broadcast %387 : vector<4x1xf32> to vector<4x32xf32>
    %448 = arith.mulf %447, %446 : vector<4x32xf32>
    %449 = arith.addf %377, %448 : vector<4x32xf32>
    %450 = vector.broadcast %385 : vector<4x1xf32> to vector<4x32xf32>
    %451 = arith.mulf %450, %445 : vector<4x32xf32>
    %c20_126 = arith.constant 20 : index
    %c0_127 = arith.constant 0 : index
    %452 = vector.load %arg19[%c20_126, %c0_127] : memref<32x32xf32, #tpu.memory_space<vmem>>, vector<4x32xf32>
    tpu.vector_store %arg19[%c20_126, %c0_127], %451 {strides = array<i32>} : memref<32x32xf32, #tpu.memory_space<vmem>>, vector<4x32xf32>,
    %453 = vector.broadcast %387 : vector<4x1xf32> to vector<4x32xf32>
    %454 = arith.mulf %453, %449 : vector<4x32xf32>
    %c8_128 = arith.constant 8 : index
    %c0_129 = arith.constant 0 : index
    %455 = vector.load %arg20[%c8_128, %c0_129] : memref<32x32xf32, #tpu.memory_space<vmem>>, vector<4x32xf32>
    tpu.vector_store %arg20[%c8_128, %c0_129], %454 {strides = array<i32>} : memref<32x32xf32, #tpu.memory_space<vmem>>, vector<4x32xf32>,
    %c6_130 = arith.constant 6 : index
    %c0_131 = arith.constant 0 : index
    %c0_132 = arith.constant 0 : index
    %456 = vector.load %arg1[%c6_130, %c0_131, %c0_132] : memref<8x4x1xf32, #tpu.memory_space<vmem>>, vector<1x4x1xf32>
    %457 = vector.shape_cast %456 : vector<1x4x1xf32> to vector<4x1xf32>
    %c1_133 = arith.constant 1 : index
    %c0_134 = arith.constant 0 : index
    %c0_135 = arith.constant 0 : index
    %458 = vector.load %arg1[%c1_133, %c0_134, %c0_135] : memref<8x4x1xf32, #tpu.memory_space<vmem>>, vector<1x4x1xf32>
    %459 = vector.shape_cast %458 : vector<1x4x1xf32> to vector<4x1xf32>
    %c24_136 = arith.constant 24 : index
    %c0_137 = arith.constant 0 : index
    %460 = vector.load %arg17[%c24_136, %c0_137] : memref<32x96xf32, #tpu.memory_space<vmem>>, vector<4x96xf32>
    %c4_138 = arith.constant 4 : index
    %c0_139 = arith.constant 0 : index
    %461 = vector.load %arg18[%c4_138, %c0_139] : memref<32x96xf32, #tpu.memory_space<vmem>>, vector<4x96xf32>
    %cst_140 = arith.constant dense<0.000000e+00> : vector<4x96xf32>
    %462 = tpu.matmul %445, %11, %cst_140 {dimension_numbers = #tpu.dot_dimension_numbers<[1], [0], [0], [1], [0, 0, 1, 1], [], []>} : vector<4x32xf32>, vector<32x96xf32>, vector<4x96xf32> -> vector<4x96xf32>
    %463 = vector.extract_strided_slice %460 {offsets = [0, 0], sizes = [4, 32], strides = [1, 1]} : vector<4x96xf32> to vector<4x32xf32>
    %464 = vector.extract_strided_slice %462 {offsets = [0, 0], sizes = [4, 32], strides = [1, 1]} : vector<4x96xf32> to vector<4x32xf32>
    %465 = arith.addf %463, %464 : vector<4x32xf32>
    %466 = arith.negf %465 : vector<4x32xf32>
    %467 = math.exp %466 : vector<4x32xf32>
    %cst_141 = arith.constant 1.000000e+00 : f32
    %468 = vector.broadcast %cst_141 : f32 to vector<4x32xf32>
    %469 = arith.addf %468, %467 : vector<4x32xf32>
    %470 = arith.divf %468, %469 : vector<4x32xf32>
    %471 = vector.extract_strided_slice %460 {offsets = [0, 32], sizes = [4, 32], strides = [1, 1]} : vector<4x96xf32> to vector<4x32xf32>
    %472 = vector.extract_strided_slice %462 {offsets = [0, 32], sizes = [4, 32], strides = [1, 1]} : vector<4x96xf32> to vector<4x32xf32>
    %473 = arith.addf %471, %472 : vector<4x32xf32>
    %474 = arith.negf %473 : vector<4x32xf32>
    %475 = math.exp %474 : vector<4x32xf32>
    %cst_142 = arith.constant 1.000000e+00 : f32
    %476 = vector.broadcast %cst_142 : f32 to vector<4x32xf32>
    %477 = arith.addf %476, %475 : vector<4x32xf32>
    %478 = arith.divf %476, %477 : vector<4x32xf32>
    %479 = vector.extract_strided_slice %460 {offsets = [0, 64], sizes = [4, 32], strides = [1, 1]} : vector<4x96xf32> to vector<4x32xf32>
    %480 = vector.extract_strided_slice %462 {offsets = [0, 64], sizes = [4, 32], strides = [1, 1]} : vector<4x96xf32> to vector<4x32xf32>
    %481 = arith.addf %480, %17 : vector<4x32xf32>
    %482 = arith.mulf %470, %481 : vector<4x32xf32>
    %483 = arith.addf %479, %482 : vector<4x32xf32>
    %484 = math.tanh %483 : vector<4x32xf32>
    %485 = arith.subf %445, %484 : vector<4x32xf32>
    %486 = arith.mulf %478, %485 : vector<4x32xf32>
    %487 = arith.addf %484, %486 : vector<4x32xf32>
    %cst_143 = arith.constant dense<0.000000e+00> : vector<4x96xf32>
    %488 = tpu.matmul %449, %13, %cst_143 {dimension_numbers = #tpu.dot_dimension_numbers<[1], [0], [0], [1], [0, 0, 1, 1], [], []>} : vector<4x32xf32>, vector<32x96xf32>, vector<4x96xf32> -> vector<4x96xf32>
    %489 = vector.extract_strided_slice %461 {offsets = [0, 0], sizes = [4, 32], strides = [1, 1]} : vector<4x96xf32> to vector<4x32xf32>
    %490 = vector.extract_strided_slice %488 {offsets = [0, 0], sizes = [4, 32], strides = [1, 1]} : vector<4x96xf32> to vector<4x32xf32>
    %491 = arith.addf %489, %490 : vector<4x32xf32>
    %492 = arith.negf %491 : vector<4x32xf32>
    %493 = math.exp %492 : vector<4x32xf32>
    %cst_144 = arith.constant 1.000000e+00 : f32
    %494 = vector.broadcast %cst_144 : f32 to vector<4x32xf32>
    %495 = arith.addf %494, %493 : vector<4x32xf32>
    %496 = arith.divf %494, %495 : vector<4x32xf32>
    %497 = vector.extract_strided_slice %461 {offsets = [0, 32], sizes = [4, 32], strides = [1, 1]} : vector<4x96xf32> to vector<4x32xf32>
    %498 = vector.extract_strided_slice %488 {offsets = [0, 32], sizes = [4, 32], strides = [1, 1]} : vector<4x96xf32> to vector<4x32xf32>
    %499 = arith.addf %497, %498 : vector<4x32xf32>
    %500 = arith.negf %499 : vector<4x32xf32>
    %501 = math.exp %500 : vector<4x32xf32>
    %cst_145 = arith.constant 1.000000e+00 : f32
    %502 = vector.broadcast %cst_145 : f32 to vector<4x32xf32>
    %503 = arith.addf %502, %501 : vector<4x32xf32>
    %504 = arith.divf %502, %503 : vector<4x32xf32>
    %505 = vector.extract_strided_slice %461 {offsets = [0, 64], sizes = [4, 32], strides = [1, 1]} : vector<4x96xf32> to vector<4x32xf32>
    %506 = vector.extract_strided_slice %488 {offsets = [0, 64], sizes = [4, 32], strides = [1, 1]} : vector<4x96xf32> to vector<4x32xf32>
    %507 = arith.addf %506, %21 : vector<4x32xf32>
    %508 = arith.mulf %496, %507 : vector<4x32xf32>
    %509 = arith.addf %505, %508 : vector<4x32xf32>
    %510 = math.tanh %509 : vector<4x32xf32>
    %511 = arith.subf %449, %510 : vector<4x32xf32>
    %512 = arith.mulf %504, %511 : vector<4x32xf32>
    %513 = arith.addf %510, %512 : vector<4x32xf32>
    %514 = arith.subf %487, %445 : vector<4x32xf32>
    %515 = vector.broadcast %457 : vector<4x1xf32> to vector<4x32xf32>
    %516 = arith.mulf %515, %514 : vector<4x32xf32>
    %517 = arith.addf %445, %516 : vector<4x32xf32>
    %518 = arith.subf %513, %449 : vector<4x32xf32>
    %519 = vector.broadcast %459 : vector<4x1xf32> to vector<4x32xf32>
    %520 = arith.mulf %519, %518 : vector<4x32xf32>
    %521 = arith.addf %449, %520 : vector<4x32xf32>
    %522 = vector.broadcast %457 : vector<4x1xf32> to vector<4x32xf32>
    %523 = arith.mulf %522, %517 : vector<4x32xf32>
    %c24_146 = arith.constant 24 : index
    %c0_147 = arith.constant 0 : index
    %524 = vector.load %arg19[%c24_146, %c0_147] : memref<32x32xf32, #tpu.memory_space<vmem>>, vector<4x32xf32>
    tpu.vector_store %arg19[%c24_146, %c0_147], %523 {strides = array<i32>} : memref<32x32xf32, #tpu.memory_space<vmem>>, vector<4x32xf32>,
    %525 = vector.broadcast %459 : vector<4x1xf32> to vector<4x32xf32>
    %526 = arith.mulf %525, %521 : vector<4x32xf32>
    %c4_148 = arith.constant 4 : index
    %c0_149 = arith.constant 0 : index
    %527 = vector.load %arg20[%c4_148, %c0_149] : memref<32x32xf32, #tpu.memory_space<vmem>>, vector<4x32xf32>
    tpu.vector_store %arg20[%c4_148, %c0_149], %526 {strides = array<i32>} : memref<32x32xf32, #tpu.memory_space<vmem>>, vector<4x32xf32>,
    %c7_150 = arith.constant 7 : index
    %c0_151 = arith.constant 0 : index
    %c0_152 = arith.constant 0 : index
    %528 = vector.load %arg1[%c7_150, %c0_151, %c0_152] : memref<8x4x1xf32, #tpu.memory_space<vmem>>, vector<1x4x1xf32>
    %529 = vector.shape_cast %528 : vector<1x4x1xf32> to vector<4x1xf32>
    %c0_153 = arith.constant 0 : index
    %c0_154 = arith.constant 0 : index
    %c0_155 = arith.constant 0 : index
    %530 = vector.load %arg1[%c0_153, %c0_154, %c0_155] : memref<8x4x1xf32, #tpu.memory_space<vmem>>, vector<1x4x1xf32>
    %531 = vector.shape_cast %530 : vector<1x4x1xf32> to vector<4x1xf32>
    %c28_156 = arith.constant 28 : index
    %c0_157 = arith.constant 0 : index
    %532 = vector.load %arg17[%c28_156, %c0_157] : memref<32x96xf32, #tpu.memory_space<vmem>>, vector<4x96xf32>
    %c0_158 = arith.constant 0 : index
    %c0_159 = arith.constant 0 : index
    %533 = vector.load %arg18[%c0_158, %c0_159] : memref<32x96xf32, #tpu.memory_space<vmem>>, vector<4x96xf32>
    %cst_160 = arith.constant dense<0.000000e+00> : vector<4x96xf32>
    %534 = tpu.matmul %517, %11, %cst_160 {dimension_numbers = #tpu.dot_dimension_numbers<[1], [0], [0], [1], [0, 0, 1, 1], [], []>} : vector<4x32xf32>, vector<32x96xf32>, vector<4x96xf32> -> vector<4x96xf32>
    %535 = vector.extract_strided_slice %532 {offsets = [0, 0], sizes = [4, 32], strides = [1, 1]} : vector<4x96xf32> to vector<4x32xf32>
    %536 = vector.extract_strided_slice %534 {offsets = [0, 0], sizes = [4, 32], strides = [1, 1]} : vector<4x96xf32> to vector<4x32xf32>
    %537 = arith.addf %535, %536 : vector<4x32xf32>
    %538 = arith.negf %537 : vector<4x32xf32>
    %539 = math.exp %538 : vector<4x32xf32>
    %cst_161 = arith.constant 1.000000e+00 : f32
    %540 = vector.broadcast %cst_161 : f32 to vector<4x32xf32>
    %541 = arith.addf %540, %539 : vector<4x32xf32>
    %542 = arith.divf %540, %541 : vector<4x32xf32>
    %543 = vector.extract_strided_slice %532 {offsets = [0, 32], sizes = [4, 32], strides = [1, 1]} : vector<4x96xf32> to vector<4x32xf32>
    %544 = vector.extract_strided_slice %534 {offsets = [0, 32], sizes = [4, 32], strides = [1, 1]} : vector<4x96xf32> to vector<4x32xf32>
    %545 = arith.addf %543, %544 : vector<4x32xf32>
    %546 = arith.negf %545 : vector<4x32xf32>
    %547 = math.exp %546 : vector<4x32xf32>
    %cst_162 = arith.constant 1.000000e+00 : f32
    %548 = vector.broadcast %cst_162 : f32 to vector<4x32xf32>
    %549 = arith.addf %548, %547 : vector<4x32xf32>
    %550 = arith.divf %548, %549 : vector<4x32xf32>
    %551 = vector.extract_strided_slice %532 {offsets = [0, 64], sizes = [4, 32], strides = [1, 1]} : vector<4x96xf32> to vector<4x32xf32>
    %552 = vector.extract_strided_slice %534 {offsets = [0, 64], sizes = [4, 32], strides = [1, 1]} : vector<4x96xf32> to vector<4x32xf32>
    %553 = arith.addf %552, %17 : vector<4x32xf32>
    %554 = arith.mulf %542, %553 : vector<4x32xf32>
    %555 = arith.addf %551, %554 : vector<4x32xf32>
    %556 = math.tanh %555 : vector<4x32xf32>
    %557 = arith.subf %517, %556 : vector<4x32xf32>
    %558 = arith.mulf %550, %557 : vector<4x32xf32>
    %559 = arith.addf %556, %558 : vector<4x32xf32>
    %cst_163 = arith.constant dense<0.000000e+00> : vector<4x96xf32>
    %560 = tpu.matmul %521, %13, %cst_163 {dimension_numbers = #tpu.dot_dimension_numbers<[1], [0], [0], [1], [0, 0, 1, 1], [], []>} : vector<4x32xf32>, vector<32x96xf32>, vector<4x96xf32> -> vector<4x96xf32>
    %561 = vector.extract_strided_slice %533 {offsets = [0, 0], sizes = [4, 32], strides = [1, 1]} : vector<4x96xf32> to vector<4x32xf32>
    %562 = vector.extract_strided_slice %560 {offsets = [0, 0], sizes = [4, 32], strides = [1, 1]} : vector<4x96xf32> to vector<4x32xf32>
    %563 = arith.addf %561, %562 : vector<4x32xf32>
    %564 = arith.negf %563 : vector<4x32xf32>
    %565 = math.exp %564 : vector<4x32xf32>
    %cst_164 = arith.constant 1.000000e+00 : f32
    %566 = vector.broadcast %cst_164 : f32 to vector<4x32xf32>
    %567 = arith.addf %566, %565 : vector<4x32xf32>
    %568 = arith.divf %566, %567 : vector<4x32xf32>
    %569 = vector.extract_strided_slice %533 {offsets = [0, 32], sizes = [4, 32], strides = [1, 1]} : vector<4x96xf32> to vector<4x32xf32>
    %570 = vector.extract_strided_slice %560 {offsets = [0, 32], sizes = [4, 32], strides = [1, 1]} : vector<4x96xf32> to vector<4x32xf32>
    %571 = arith.addf %569, %570 : vector<4x32xf32>
    %572 = arith.negf %571 : vector<4x32xf32>
    %573 = math.exp %572 : vector<4x32xf32>
    %cst_165 = arith.constant 1.000000e+00 : f32
    %574 = vector.broadcast %cst_165 : f32 to vector<4x32xf32>
    %575 = arith.addf %574, %573 : vector<4x32xf32>
    %576 = arith.divf %574, %575 : vector<4x32xf32>
    %577 = vector.extract_strided_slice %533 {offsets = [0, 64], sizes = [4, 32], strides = [1, 1]} : vector<4x96xf32> to vector<4x32xf32>
    %578 = vector.extract_strided_slice %560 {offsets = [0, 64], sizes = [4, 32], strides = [1, 1]} : vector<4x96xf32> to vector<4x32xf32>
    %579 = arith.addf %578, %21 : vector<4x32xf32>
    %580 = arith.mulf %568, %579 : vector<4x32xf32>
    %581 = arith.addf %577, %580 : vector<4x32xf32>
    %582 = math.tanh %581 : vector<4x32xf32>
    %583 = arith.subf %521, %582 : vector<4x32xf32>
    %584 = arith.mulf %576, %583 : vector<4x32xf32>
    %585 = arith.addf %582, %584 : vector<4x32xf32>
    %586 = arith.subf %559, %517 : vector<4x32xf32>
    %587 = vector.broadcast %529 : vector<4x1xf32> to vector<4x32xf32>
    %588 = arith.mulf %587, %586 : vector<4x32xf32>
    %589 = arith.addf %517, %588 : vector<4x32xf32>
    %590 = arith.subf %585, %521 : vector<4x32xf32>
    %591 = vector.broadcast %531 : vector<4x1xf32> to vector<4x32xf32>
    %592 = arith.mulf %591, %590 : vector<4x32xf32>
    %593 = arith.addf %521, %592 : vector<4x32xf32>
    %594 = vector.broadcast %529 : vector<4x1xf32> to vector<4x32xf32>
    %595 = arith.mulf %594, %589 : vector<4x32xf32>
    %c28_166 = arith.constant 28 : index
    %c0_167 = arith.constant 0 : index
    %596 = vector.load %arg19[%c28_166, %c0_167] : memref<32x32xf32, #tpu.memory_space<vmem>>, vector<4x32xf32>
    tpu.vector_store %arg19[%c28_166, %c0_167], %595 {strides = array<i32>} : memref<32x32xf32, #tpu.memory_space<vmem>>, vector<4x32xf32>,
    %597 = vector.broadcast %531 : vector<4x1xf32> to vector<4x32xf32>
    %598 = arith.mulf %597, %593 : vector<4x32xf32>
    %c0_168 = arith.constant 0 : index
    %c0_169 = arith.constant 0 : index
    %599 = vector.load %arg20[%c0_168, %c0_169] : memref<32x32xf32, #tpu.memory_space<vmem>>, vector<4x32xf32>
    tpu.vector_store %arg20[%c0_168, %c0_169], %598 {strides = array<i32>} : memref<32x32xf32, #tpu.memory_space<vmem>>, vector<4x32xf32>,
    %c0_170 = arith.constant 0 : index
    %c0_171 = arith.constant 0 : index
    %c0_172 = arith.constant 0 : index
    %600 = vector.load %arg15[%c0_170, %c0_171, %c0_172] : memref<2x4x32xf32, #tpu.memory_space<vmem>>, vector<1x4x32xf32>
    %601 = vector.shape_cast %600 : vector<1x4x32xf32> to vector<4x32xf32>
    %602 = vector.shape_cast %589 : vector<4x32xf32> to vector<1x4x32xf32>
    tpu.vector_store %arg15[%c0_170, %c0_171, %c0_172], %602 {strides = array<i32>} : memref<2x4x32xf32, #tpu.memory_space<vmem>>, vector<1x4x32xf32>,
    %c1_173 = arith.constant 1 : index
    %c0_174 = arith.constant 0 : index
    %c0_175 = arith.constant 0 : index
    %603 = vector.load %arg15[%c1_173, %c0_174, %c0_175] : memref<2x4x32xf32, #tpu.memory_space<vmem>>, vector<1x4x32xf32>
    %604 = vector.shape_cast %603 : vector<1x4x32xf32> to vector<4x32xf32>
    %605 = vector.shape_cast %593 : vector<4x32xf32> to vector<1x4x32xf32>
    tpu.vector_store %arg15[%c1_173, %c0_174, %c0_175], %605 {strides = array<i32>} : memref<2x4x32xf32, #tpu.memory_space<vmem>>, vector<1x4x32xf32>,
    %c0_176 = arith.constant 0 : index
    %c0_177 = arith.constant 0 : index
    %606 = vector.load %arg19[%c0_176, %c0_177] : memref<32x32xf32, #tpu.memory_space<vmem>>, vector<32x32xf32>
    %c0_178 = arith.constant 0 : index
    %c0_179 = arith.constant 0 : index
    %607 = vector.load %arg20[%c0_178, %c0_179] : memref<32x32xf32, #tpu.memory_space<vmem>>, vector<32x32xf32>
    %608 = arith.addf %606, %607 : vector<32x32xf32>
    %c0_180 = arith.constant 0 : index
    %c0_181 = arith.constant 0 : index
    %609 = vector.load %arg2[%c0_180, %c0_181] : memref<4x32xf32, #tpu.memory_space<vmem>>, vector<4x32xf32>
    %c0_182 = arith.constant 0 : index
    %c0_183 = arith.constant 0 : index
    %610 = vector.load %arg9[%c0_182, %c0_183] : memref<32x32xf32, #tpu.memory_space<vmem>>, vector<32x32xf32>
    %cst_184 = arith.constant dense<0.000000e+00> : vector<4x32xf32>
    %611 = tpu.matmul %609, %610, %cst_184 {dimension_numbers = #tpu.dot_dimension_numbers<[1], [0], [0], [1], [0, 0, 1, 1], [], []>} : vector<4x32xf32>, vector<32x32xf32>, vector<4x32xf32> -> vector<4x32xf32>
    %c0_185 = arith.constant 0 : index
    %c0_186 = arith.constant 0 : index
    %612 = vector.load %arg10[%c0_185, %c0_186] : memref<1x32xf32, #tpu.memory_space<vmem>>, vector<1x32xf32>
    %613 = vector.broadcast %612 : vector<1x32xf32> to vector<4x32xf32>
    %614 = arith.addf %611, %613 : vector<4x32xf32>
    %c0_187 = arith.constant 0 : index
    %c0_188 = arith.constant 0 : index
    %615 = vector.load %arg8[%c0_187, %c0_188] : memref<1x32xf32, #tpu.memory_space<vmem>>, vector<1x32xf32>
    %616 = vector.broadcast %615 : vector<1x32xf32> to vector<4x32xf32>
    %617 = arith.addf %616, %614 : vector<4x32xf32>
    %618 = tpu.concatenate %617, %617, %617, %617, %617, %617, %617, %617 in 0 : vector<4x32xf32>, vector<4x32xf32>, vector<4x32xf32>, vector<4x32xf32>, vector<4x32xf32>, vector<4x32xf32>, vector<4x32xf32>, vector<4x32xf32> -> vector<32x32xf32>
    %c0_189 = arith.constant 0 : index
    %c0_190 = arith.constant 0 : index
    %619 = vector.load %arg7[%c0_189, %c0_190] : memref<32x32xf32, #tpu.memory_space<vmem>>, vector<32x32xf32>
    %cst_191 = arith.constant dense<0.000000e+00> : vector<32x32xf32>
    %620 = tpu.matmul %608, %619, %cst_191 {dimension_numbers = #tpu.dot_dimension_numbers<[1], [0], [0], [1], [0, 0, 1, 1], [], []>} : vector<32x32xf32>, vector<32x32xf32>, vector<32x32xf32> -> vector<32x32xf32>
    %621 = arith.addf %620, %618 : vector<32x32xf32>
    %cst_192 = arith.constant 0.000000e+00 : f32
    %622 = vector.broadcast %cst_192 : f32 to vector<32x32xf32>
    %623 = arith.maximumf %621, %622 : vector<32x32xf32>
    %c0_193 = arith.constant 0 : index
    %c0_194 = arith.constant 0 : index
    %624 = vector.load %arg11[%c0_193, %c0_194] : memref<1x32xf32, #tpu.memory_space<vmem>>, vector<1x32xf32>
    %625 = vector.broadcast %624 : vector<1x32xf32> to vector<32x32xf32>
    %626 = arith.mulf %623, %625 : vector<32x32xf32>
    %cst_195 = arith.constant dense<0.000000e+00> : vector<32xf32>
    %627 = vector.multi_reduction <add>, %626, %cst_195 [1] : vector<32x32xf32> to vector<32xf32>
    %628 = vector.shape_cast %627 : vector<32xf32> to vector<32x1xf32>
    %c0_196 = arith.constant 0 : index
    %c0_197 = arith.constant 0 : index
    %629 = vector.load %arg12[%c0_196, %c0_197] : memref<1x1xf32, #tpu.memory_space<vmem>>, vector<1x1xf32>
    %630 = vector.broadcast %629 : vector<1x1xf32> to vector<32x1xf32>
    %631 = arith.addf %628, %630 : vector<32x1xf32>
    %cst_198 = arith.constant dense<0xFF800000> : vector<1xf32>
    %632 = vector.multi_reduction <maximumf>, %631, %cst_198 [0] : vector<32x1xf32> to vector<1xf32>
    %633 = vector.shape_cast %632 : vector<1xf32> to vector<1x1xf32>
    %634 = vector.broadcast %633 : vector<1x1xf32> to vector<32x1xf32>
    %635 = arith.subf %631, %634 : vector<32x1xf32>
    %636 = math.exp %635 : vector<32x1xf32>
    %c0_199 = arith.constant 0 : index
    %c0_200 = arith.constant 0 : index
    %637 = vector.load %arg13[%c0_199, %c0_200] : memref<4x32xf32, #tpu.memory_space<vmem>>, vector<4x32xf32>
    %cst_201 = arith.constant dense<0.000000e+00> : vector<4x1xf32>
    %638 = tpu.matmul %637, %636, %cst_201 {dimension_numbers = #tpu.dot_dimension_numbers<[1], [0], [0], [1], [0, 0, 1, 1], [], []>} : vector<4x32xf32>, vector<32x1xf32>, vector<4x1xf32> -> vector<4x1xf32>
    %639 = tpu.reciprocal %638 {approx = true} : vector<4x1xf32> -> vector<4x1xf32>
    %640 = tpu.concatenate %639, %639, %639, %639, %639, %639, %639, %639 in 0 : vector<4x1xf32>, vector<4x1xf32>, vector<4x1xf32>, vector<4x1xf32>, vector<4x1xf32>, vector<4x1xf32>, vector<4x1xf32>, vector<4x1xf32> -> vector<32x1xf32>
    %641 = arith.mulf %636, %640 : vector<32x1xf32>
    %c0_202 = arith.constant 0 : index
    %c0_203 = arith.constant 0 : index
    %642 = vector.load %arg16[%c0_202, %c0_203] : memref<32x1xf32, #tpu.memory_space<vmem>>, vector<32x1xf32>
    tpu.vector_store %arg16[%c0_202, %c0_203], %641 {strides = array<i32>} : memref<32x1xf32, #tpu.memory_space<vmem>>, vector<32x1xf32>,
    %643 = vector.broadcast %641 : vector<32x1xf32> to vector<32x32xf32>
    %644 = arith.mulf %643, %608 : vector<32x32xf32>
    %c0_204 = arith.constant 0 : index
    %c0_205 = arith.constant 0 : index
    %645 = vector.load %arg13[%c0_204, %c0_205] : memref<4x32xf32, #tpu.memory_space<vmem>>, vector<4x32xf32>
    %cst_206 = arith.constant dense<0.000000e+00> : vector<4x32xf32>
    %646 = tpu.matmul %645, %644, %cst_206 {dimension_numbers = #tpu.dot_dimension_numbers<[1], [0], [0], [1], [0, 0, 1, 1], [], []>} : vector<4x32xf32>, vector<32x32xf32>, vector<4x32xf32> -> vector<4x32xf32>
    %c0_207 = arith.constant 0 : index
    %c0_208 = arith.constant 0 : index
    %647 = vector.load %arg14[%c0_207, %c0_208] : memref<4x32xf32, #tpu.memory_space<vmem>>, vector<4x32xf32>
    tpu.vector_store %arg14[%c0_207, %c0_208], %646 {strides = array<i32>} : memref<4x32xf32, #tpu.memory_space<vmem>>, vector<4x32xf32>,
    return
  }
}

</mosaic_0001>

<bundles_post_ra>
// kernel: tpu_custom_call.1
= control target key start
LH: loop header
LB: loop body
LE: loop exit
PB: predicated region body
PF: predicated region fallthrough
CT: control target
= control target key end

     0   :  { %s4249_s0 = inlined_call_operand.vmem [shape: f32[32,32], index: 0, kind: input, shape index: {}]   ;;  %s4250_s1 = inlined_call_operand.vmem [shape: f32[8,4,1], index: 1, kind: input, shape index: {}]   ;;  %s4251_s2 = inlined_call_operand.vmem [shape: f32[4,32], index: 2, kind: input, shape index: {}]   ;;  %s4252_s3 = inlined_call_operand.hbm [shape: f32[32,192], index: 3, kind: input, shape index: {}]   ;;  %s4253_s4 = inlined_call_operand.vmem [shape: f32[1,192], index: 4, kind: input, shape index: {}]   ;;  %s4254_s5 = inlined_call_operand.hbm [shape: f32[2,32,96], index: 5, kind: input, shape index: {}]   ;;  %s4255_s6 = inlined_call_operand.vmem [shape: f32[2,1,32], index: 6, kind: input, shape index: {}]   ;;  %s4256_s7 = inlined_call_operand.hbm [shape: f32[32,32], index: 7, kind: input, shape index: {}]   ;;  %s4257_s8 = inlined_call_operand.vmem [shape: f32[1,32], index: 8, kind: input, shape index: {}]   ;;  %s4258_s9 = inlined_call_operand.hbm [shape: f32[32,32], index: 9, kind: input, shape index: {}]   ;;  %s4259_s10 = inlined_call_operand.vmem [shape: f32[1,32], index: 10, kind: input, shape index: {}]   ;;  %s4260_s11 = inlined_call_operand.vmem [shape: f32[1,32], index: 11, kind: input, shape index: {}]   ;;  %s4261_s12 = inlined_call_operand.<no memory space> [shape: f32[1,1], index: 12, kind: input, shape index: {}]   ;;  %s4262_s13 = inlined_call_operand.vmem [shape: f32[4,32], index: 13, kind: input, shape index: {}]   ;;  %s4263_s14 = inlined_call_operand.hbm [shape: f32[4,32], index: 14, kind: output, shape index: {0}]   ;;  %s4264_s15 = inlined_call_operand.hbm [shape: f32[2,4,32], index: 15, kind: output, shape index: {1}]   ;;  %s4265_s16 = inlined_call_operand.vmem [shape: f32[32,1], index: 16, kind: output, shape index: {2}]  }
   0x1   :  { %4267 = sst [smem:[#allocation23_spill]] %s4249_s0  ;;  %v22_v0 = vstv %s4261_s12 }
   0x2   :  { %23 = vst [vmem:[#allocation6] sm:$0x1] %v22_v0 }
   0x3   :  { %24 = vsyncpa [#allocation8], 0 }
   0x4   :  { %25 = vsyncpa [#allocation11], 0 }
   0x5   :  { %26 = vsyncpa [#allocation14], 0 }
   0x6   :  { %27 = vsyncpa [#allocation9], 0 }
   0x7   :  { %28 = vsyncpa [#allocation17], 0  ;;  %s3399_s23 = smov [#allocation10]  }
   0x8   :  { %s54_s24 = sshll.u32 %s3399_s23, 4  ;;  %s55_s24 = int_to_ptr.vmem [resolvable:$true] %s54_s24 }
   0x9   :  { %s3277_s25 = scalar_lea.vmem %s55_s24, 1024  ;;  %p3282_p1 = scmp.lt.s32.totalorder %s55_s24, %s55_s24 }
   0xa   :  { %p3278_p0 = scmp.ne.s32.totalorder %s55_s24, %s3277_s25  ;;  %p3283_p2 = scmp.lt.s32.totalorder %s3277_s25, %s3277_s25 }
   0xc   :  { %p3284_p3 = por %p3283_p2, %p3282_p1 }
   0xe   :  { %p3285_p4 = pnand %p3284_p3, %p3278_p0 }
  0x10   :  { %3288 = shalt.err (!%p3285_p4)
}
  0x11   :  { %s3400_s26 = smov 128   ;;  %s3401_s27 = smov 8  }
  0x12   :  { %60 = dma.hbm_to_vmem [thread:$0]  %s4254_s5, 1024, %s55_s24, [#allocation11], %s3400_s26, %s3400_s26, %s3401_s27  }
  0x13   :  { %s3402_s29 = smov [#allocation7]  }
  0x14   :  { %s40_s30 = sshll.u32 %s3402_s29, 4  ;;  %s41_s30 = int_to_ptr.vmem [resolvable:$true] %s40_s30 }
  0x15   :  { %s3297_s0 = scalar_lea.vmem %s41_s30, 1024  ;;  %p3302_p6 = scmp.lt.s32.totalorder %s41_s30, %s41_s30 }
  0x16   :  { %p3298_p5 = scmp.ne.s32.totalorder %s41_s30, %s3297_s0  ;;  %p3303_p7 = scmp.lt.s32.totalorder %s3297_s0, %s3297_s0 }
  0x18   :  { %p3304_p8 = por %p3303_p7, %p3302_p6 }
  0x1a   :  { %p3305_p9 = pnand %p3304_p8, %p3298_p5 }
  0x1c   :  { %3308 = shalt.err (!%p3305_p9)
}
  0x1d   :  { %s3403_s17 = smov 256   ;;  %s3404_s18 = smov 16  }
  0x1e   :  { %46 = dma.hbm_to_vmem [thread:$0]  %s4252_s3, 1024, %s41_s30, [#allocation8], %s3403_s17, %s3403_s17, %s3404_s18  }
  0x1f   :  { %s3405_s21 = smov [#allocation12]   ;;  %s3406_s23 = smov [#allocation13]  }
  0x20   :  { %s68_s22 = sshll.u32 %s3405_s21, 4  ;;  %s82_s5 = sshll.u32 %s3406_s23, 4  ;;  %s69_s22 = int_to_ptr.vmem [resolvable:$true] %s68_s22  ;;  %s83_s5 = int_to_ptr.vmem [resolvable:$true] %s82_s5 }
  0x21   :  { %s3317_s24 = scalar_lea.vmem %s69_s22, 512  ;;  %p3322_p11 = scmp.lt.s32.totalorder %s69_s22, %s69_s22 }
  0x22   :  { %p3318_p10 = scmp.ne.s32.totalorder %s69_s22, %s3317_s24  ;;  %p3323_p12 = scmp.lt.s32.totalorder %s3317_s24, %s3317_s24 }
  0x24   :  { %p3324_p13 = por %p3323_p12, %p3322_p11 }
  0x26   :  { %p3325_p0 = pnand %p3324_p13, %p3318_p10 }
  0x28   :  { %3328 = shalt.err (!%p3325_p0)
}
  0x29   :  { %74 = dma.hbm_to_vmem [thread:$0]  %s4256_s7, 512, %s69_s22, [#allocation11], %s3400_s26, %s3400_s26, %s3401_s27  }
  0x2a   :  { %s3337_s3 = scalar_lea.vmem %s83_s5, 512  ;;  %p3342_p2 = scmp.lt.s32.totalorder %s83_s5, %s83_s5 }
  0x2b   :  { %p3338_p1 = scmp.ne.s32.totalorder %s83_s5, %s3337_s3  ;;  %p3343_p3 = scmp.lt.s32.totalorder %s3337_s3, %s3337_s3 }
  0x2d   :  { %p3344_p4 = por %p3343_p3, %p3342_p2 }
  0x2f   :  { %p3345_p5 = pnand %p3344_p4, %p3338_p1 }
  0x31   :  { %3348 = shalt.err (!%p3345_p5)
}
  0x32   :  { %88 = dma.hbm_to_vmem [thread:$0]  %s4258_s9, 512, %s83_s5, [#allocation14], %s3400_s26, %s3400_s26, %s3401_s27  }
  0x33   :  { %3389 = dma.done.wait [#allocation8], 1024  }
  0x34   :  { %3390 = vsyncadd [#allocation8], 4294966272 }
  0x35   :  { %3391 = dma.done.wait [#allocation11], 1536  }
  0x36   :  { %3392 = vsyncadd [#allocation11], 4294965760 }
  0x37   :  { %3393 = dma.done.wait [#allocation14], 512  }
  0x38   :  { %3394 = vsyncadd [#allocation14], 4294966784  ;;  %v3407_v1 = vmov 0.0   ;;  %vm3408_vm0 = vmmov 0   ;;  %v120_v2 = vld [vmem:[#allocation7 + $0x38] sm:$0xff]  ;;  %v119_v3 = vld [vmem:[#allocation7 + $0x30] sm:$0xff]  ;;  %v123_v24 = vlaneseq }
  0x39   :  { %210 = vmatprep.mubr.f32.mxu0 %v3407_v1  ;;  %2913 = vmatprep.subr.mxu1 %v3407_v1  ;;  %v118_v4 = vld [vmem:[#allocation7 + $0x28] sm:$0xff]  ;;  %v117_v5 = vld [vmem:[#allocation7 + $0x20] sm:$0xff]  ;;  %v116_v6 = vld [vmem:[#allocation7 + $0x18] sm:$0xff]  ;;  %s4268_s26 = sld [smem:[#allocation23_spill]]  ;;  %vm133_vm1 = vcmask 261120   ;;  %s3409_s20 = smov 64  }
  0x3a   :  { %2921 = vmatprep.mubr.msk.f32.mxu1 %vm3408_vm0, %v3407_v1  ;;  %170 = vmatprep.subr.mxu0 %v120_v2  ;;  %v115_v7 = vld [vmem:[#allocation7 + $0x10] sm:$0xff]  ;;  %v3529_v8 = vld [vmem:[#allocation10 + $0x18] sm:$0xff]  ;;  %v114_v10 = vld [vmem:[#allocation7 + $0x8] sm:$0xff]  ;;  %v124_v25 = vshrl.u32 %v123_v24, 7  ;;  %vm235_vm2 = vcmask 785408   ;;  %s3412_s25 = smov 96  }
  0x3b   :  { %171 = vmatpush1.msra.mxu0 %v119_v3  ;;  %v3531_v9 = vld [vmem:[#allocation10 + $0x10] sm:$0xff]  ;;  %2914 = vmatpush3.msra.mxu1 %v3529_v8  ;;  %v113_v11 = vld [vmem:[#allocation7] sm:$0xff]  ;;  %v3535_v12 = vld [vmem:[#allocation10 + $0x8] sm:$0xff]  ;;  %vm531_vm3 = vcmask 257024   ;;  %vm2358_vm4 = vcmask 1043456   ;;  %vm2499_vm5 = vcmask 7168  }
  0x3c   :  { %172 = vmatprep.subr.mxu0 %v118_v4  ;;  %2915 = vmatprep.subr.mxu1 %v3407_v1  ;;  %v3542_v14 = vld [vmem:[#allocation10] sm:$0xff]  ;;  %v3547_v15 = vld [vmem:[#allocation10 + $0x38] sm:$0xff]  ;;  %v3556_v17 = vld [vmem:[#allocation10 + $0x30] sm:$0xff]  ;;  %v125_v26 = vsub.s32 0, %v124_v25  ;;  %v129_v28 = vsub.s32 1, %v124_v25 }
  0x3d   :  { %173 = vmatpush1.msra.mxu0 %v117_v5  ;;  %2916 = vmatpush3.msra.mxu1 %v3531_v9  ;;  %v2754_v18 = vld [vmem:[%s4255_s6 + $0x1] ss:$0 sm:$0xff]  ;;  %v3566_v19 = vld [vmem:[#allocation10 + $0x28] sm:$0xff]  ;;  %v2752_v22 = vld [vmem:[%s4255_s6] ss:$0 sm:$0xff] }
  0x3e   :  { %174 = vmatprep.subr.mxu0 %v116_v6  ;;  %2917 = vmatprep.subr.mxu1 %v3407_v1  ;;  %v3574_v21 = vld [vmem:[#allocation10 + $0x20] sm:$0xff] }
  0x3f   :  { %175 = vmatpush1.msra.mxu0 %v115_v7  ;;  %v109_v13 = vld [vmem:[%s4268_s26] sm:$0xff]  ;;  %2918 = vmatpush3.msra.mxu1 %v3535_v12  ;;  %v110_v16 = vld [vmem:[%s4268_s26 + $0x8] sm:$0xff]  ;;  %v111_v20 = vld [vmem:[%s4268_s26 + $0x10] sm:$0xff] }
  0x40   :  { %176 = vmatprep.subr.mxu0 %v114_v10  ;;  %2919 = vmatprep.subr.mxu1 %v3407_v1  ;;  %v112_v23 = vld [vmem:[%s4268_s26 + $0x18] sm:$0xff]  ;;  %v121_v27 = vld [vmem:[%s4253_s4] sm:$0x3]  ;;  %s3410_s4 = smov 32   ;;  %s3413_s26 = smov [#allocation16]  }
  0x41   :  { %177 = vmatpush1.msra.mxu0 %v113_v11  ;;  %2920 = vmatpush3.msra.mxu1 %v3542_v14  ;;  %v126_v29 = vrot.slane %v121_v27, %v125_v26  ;;  %v130_v30 = vrot.slane %v121_v27, %v129_v28  ;;  %v2755_v28 = vld [vmem:[%s4250_s1 + $0x1c] sm:$0xf]  ;;  %s2726_s27 = sshll.u32 %s3413_s26, 4  ;;  %s2727_s27 = int_to_ptr.vmem [resolvable:$true] %s2726_s27 }
  0x42   :  { %2748 = vmatmul.mubr.msk.f32.vlgmr.msra.gmra.mxu0 %vm133_vm1, %v109_v13  ;;  %2922 = vmatmul.mubr.f32.vlgmr.msra.gmra.mxu1 %v3407_v1  ;;  %s3349_s30 = scalar_lea.vmem %s2727_s27, 128  ;;  %p3354_p7 = scmp.lt.s32.totalorder %s2727_s27, %s2727_s27 }
  0x43   :  { %216 = vmatprep.mubr.f32.mxu0 %v3407_v1  ;;  %2924 = vmatprep.subr.mxu1 %v3407_v1  ;;  %p3350_p6 = scmp.ne.s32.totalorder %s2727_s27, %s3349_s30  ;;  %p3355_p8 = scmp.lt.s32.totalorder %s3349_s30, %s3349_s30 }
  0x44   :  { %2925 = vmatpush3.msra.mxu1 %v3547_v15  ;;  %2932 = vmatprep.mubr.msk.f32.mxu1 %vm3408_vm0, %v3407_v1 }
  0x45   :  { %2926 = vmatprep.subr.mxu1 %v3407_v1  ;;  %486 = vrot.lane.b32.xlu0 %v2754_v18, %s3409_s20  ;;  %p3356_p9 = por %p3355_p8, %p3354_p7 }
  0x46   :  { %2749 = vmatmul.mubr.msk.f32.gmra.mxu0 %vm133_vm1, %v110_v16  ;;  %2927 = vmatpush3.msra.mxu1 %v3556_v17  ;;  %v3411_v16 = vmov 0  }
  0x47   :  { %222 = vmatprep.mubr.f32.mxu0 %v3407_v1  ;;  %2928 = vmatprep.subr.mxu1 %v3407_v1  ;;  %p3357_p10 = pnand %p3356_p9, %p3350_p6 }
  0x48   :  { %2929 = vmatpush3.msra.mxu1 %v3566_v19  ;;  %2935 = vmatprep.subr.mxu0 %v3407_v1 }
  0x49   :  { %2930 = vmatprep.subr.mxu1 %v3407_v1  ;;  %383 = vrot.lane.b32.xlu0 %v2752_v22, %s3409_s20 }
  0x4a   :  { %2750 = vmatmul.mubr.msk.f32.gmra.mxu0 %vm133_vm1, %v111_v20  ;;  %2931 = vmatpush3.msra.mxu1 %v3574_v21 }
  0x4b   :  { %228 = vmatprep.mubr.f32.mxu0 %v3407_v1  ;;  %2933 = vmatmul.mubr.f32.vlgmr.msra.gmra.mxu1 %v3407_v1 }
  0x4c   :  { %2946 = vmatprep.subr.mxu1 %v3407_v1  ;;  %2936 = vmatpush3.msra.mxu0 %v3529_v8 }
  0x4d   :  { %2947 = vmatpush3.msra.mxu1 %v3547_v15  ;;  %2937 = vmatprep.subr.mxu0 %v3407_v1 }
  0x4e   :  { %2751 = vmatmul.mubr.msk.f32.gmra.mxu0 %vm133_vm1, %v112_v23  ;;  %2948 = vmatprep.subr.mxu1 %v3407_v1 }
  0x4f   :  { %2949 = vmatpush3.msra.mxu1 %v3556_v17  ;;  %2954 = vmatprep.mubr.msk.f32.mxu1 %vm3408_vm0, %v3407_v1 }
  0x50   :  { %2950 = vmatprep.subr.mxu1 %v3407_v1  ;;  %2938 = vmatpush3.msra.mxu0 %v3531_v9 }
  0x51   :  { %2951 = vmatpush3.msra.mxu1 %v3566_v19  ;;  %2939 = vmatprep.subr.mxu0 %v3407_v1 }
  0x52   :  { %2952 = vmatprep.subr.mxu1 %v3407_v1  ;;  %2940 = vmatpush3.msra.mxu0 %v3535_v12 }
  0x53   :  { %2953 = vmatpush3.msra.mxu1 %v3574_v21  ;;  %2941 = vmatprep.subr.mxu0 %v3407_v1 }
  0x54   :  { %2942 = vmatpush3.msra.mxu0 %v3542_v14  ;;  %2943 = vmatprep.mubr.msk.f32.mxu0 %vm3408_vm0, %v3407_v1 }
  0x55   :  { %2968 = vmatprep.subr.mxu1 %v3407_v1  ;;  %2957 = vmatprep.subr.mxu0 %v3407_v1 }
  0x56   :  { %3153 = vset.pattern.permute.xlu0 %v3411_v16  ;;  %3154 = vset.pattern.permute.xlu1 %v3411_v16 }
  0xb7   :  { %v3630_v43 = vpop.permute.xlu0 %486 }
  0xbb   :  { %v3640_v52 = vpop.permute.xlu0 %383 }
 0x102   :  { %v212_v31 = vpop.f32.mrf.mxu0  ;;  %v372_v34 = vpop.f32.mrf.mxu1 }
 0x103   :  { %v3616_v32 = vadd.f32 %v212_v31, %v126_v29  ;;  %v386_v54 = vadd.f32 %v3640_v52, %v372_v34 }
 0x104   :  { %v214_v33 = vpop.f32.mrf.mxu0  ;;  %v2923_v37 = vpop.f32.mrf.mxu1 }
 0x105   :  { %236 = vst.msk [vmem:[#allocation2] sm:$0xff] %vm235_vm2, %v3616_v32  ;;  %v3620_v35 = vadd.f32 %v214_v33, %v130_v30 }
 0x106   :  { %v218_v36 = vpop.f32.mrf.mxu0 }
 0x107   :  { %v3622_v38 = vadd.f32 %v218_v36, %v126_v29 }
 0x108   :  { %v220_v39 = vpop.f32.mrf.mxu0 }
 0x109   :  { %237 = vst.msk [vmem:[#allocation2 + $0x8] sm:$0xff] %vm235_vm2, %v3622_v38  ;;  %v3626_v40 = vadd.f32 %v220_v39, %v130_v30 }
 0x10a   :  { %v224_v41 = vpop.f32.mrf.mxu0 }
 0x10b   :  { %v3628_v42 = vadd.f32 %v224_v41, %v126_v29  ;;  %v475_v45 = vpop.f32.mrf.mxu1 }
 0x10c   :  { %v226_v44 = vpop.f32.mrf.mxu0  ;;  %v489_v47 = vadd.f32 %v3630_v43, %v475_v45  ;;  %v301_v55 = vld [vmem:[#allocation2] sm:$0xf] }
 0x10d   :  { %238 = vst.msk [vmem:[#allocation2 + $0x10] sm:$0xff] %vm235_vm2, %v3628_v42  ;;  %v3634_v46 = vadd.f32 %v226_v44, %v130_v30  ;;  %v2934_v49 = vpop.f32.mrf.mxu1  ;;  %v376_v56 = vadd.f32 %v372_v34, %v301_v55  ;;  %v298_v34 = vld [vmem:[%s4250_s1] sm:$0xf] }
 0x10e   :  { %v230_v48 = vpop.f32.mrf.mxu0  ;;  %491 = vrot.lane.b32.xlu0 %v489_v47, %s3409_s20 }
 0x10f   :  { %v231_v50 = vadd.f32 %v230_v48, %v126_v29  ;;  %v2756_v57 = vmul.f32 -1.442695, %v376_v56 }
 0x110   :  { %v232_v51 = vpop.f32.mrf.mxu0 }
 0x111   :  { %239 = vst.msk [vmem:[#allocation2 + $0x18] sm:$0xff] %vm235_vm2, %v231_v50  ;;  %260 = vrot.lane.b32.xlu1 %v231_v50, %s3410_s4  ;;  %v233_v53 = vadd.f32 %v232_v51, %v130_v30  ;;  %3155 = vpow2.f32 %v2756_v57 }
 0x115   :  { %262 = vrot.lane.b32.xlu1 %v233_v53, %s3410_s4 }
 0x119   :  { %388 = vrot.lane.b32.xlu1 %v386_v54, %s3409_s20 }
 0x11e   :  { %v3156_v58 = vpop.eup %3155 }
 0x11f   :  { %v380_v59 = vadd.f32 1.0, %v3156_v58 }
 0x121   :  { %3157 = vrcp.f32 %v380_v59 }
 0x12e   :  { %v3158_v63 = vpop.eup %3157 }
 0x180   :  { %v492_v10 = vpop.permute.xlu0 %491 }
 0x183   :  { %v261_v60 = vpop.permute.xlu1 %260 }
 0x187   :  { %v263_v61 = vpop.permute.xlu1 %262 }
 0x188   :  { %v267_v62 = vsel %vm133_vm1, %v261_v60, %v263_v61  ;;  %v543_v61 = vld [vmem:[#allocation2 + $0x4] sm:$0xf] }
 0x189   :  { %275 = vst.msk [vmem:[#allocation3 + $0x18] sm:$0xff] %vm235_vm2, %v267_v62 }
 0x18b   :  { %v389_v0 = vpop.permute.xlu1 %388 }
 0x18c   :  { %v391_v2 = vmul.f32 %v3158_v63, %v389_v0 }
 0x18e   :  { %393 = vrot.lane.b32.xlu1 %v391_v2, %s3409_s20 }
 0x190   :  { %v302_v3 = vld [vmem:[#allocation3 + $0x1c] sm:$0xf]  ;;  %v544_v58 = vld [vmem:[#allocation3 + $0x18] sm:$0xf] }
 0x191   :  { %v479_v4 = vadd.f32 %v475_v45, %v302_v3 }
 0x193   :  { %v2757_v5 = vmul.f32 -1.442695, %v479_v4 }
 0x195   :  { %3159 = vpow2.f32 %v2757_v5 }
 0x1a2   :  { %v3160_v6 = vpop.eup %3159 }
 0x1a3   :  { %v483_v7 = vadd.f32 1.0, %v3160_v6 }
 0x1a5   :  { %3161 = vrcp.f32 %v483_v7 }
 0x1b2   :  { %v3162_v11 = vpop.eup %3161 }
 0x1b3   :  { %v494_v13 = vmul.f32 %v3162_v11, %v492_v10 }
 0x1b5   :  { %496 = vrot.lane.b32.xlu0 %v494_v13, %s3409_s20 }
 0x200   :  { %v394_v18 = vpop.permute.xlu1 %393 }
 0x201   :  { %v396_v20 = vadd.f32 %v394_v18, %v301_v55 }
 0x203   :  { %3163 = vtanh.f32 %v396_v20 }
 0x210   :  { %v3164_v22 = vpop.eup %3163 }
 0x211   :  { %v398_v23 = vsub.f32 0.0, %v3164_v22 }
 0x213   :  { %400 = vrot.lane.b32.xlu1 %v398_v23, %s3412_s25 }
 0x227   :  { %v497_v24 = vpop.permute.xlu0 %496 }
 0x228   :  { %v499_v25 = vadd.f32 %v497_v24, %v302_v3 }
 0x22a   :  { %3165 = vtanh.f32 %v499_v25  ;;  %v2759_v25 = vld [vmem:[%s4250_s1 + $0x18] sm:$0xf] }
 0x237   :  { %v3166_v26 = vpop.eup %3165 }
 0x238   :  { %v501_v27 = vsub.f32 0.0, %v3166_v26 }
 0x23a   :  { %503 = vrot.lane.b32.xlu0 %v501_v27, %s3412_s25 }
 0x23e   :  { %521 = vperm.xlu0 %3153, %v2755_v28  }
 0x285   :  { %v401_v29 = vpop.permute.xlu1 %400 }
 0x286   :  { %v403_v30 = vmul.f32 %v3158_v63, %v401_v29 }
 0x288   :  { %405 = vrot.lane.b32.xlu0 %v403_v30, %s3410_s4 }
 0x2ac   :  { %v504_v31 = vpop.permute.xlu0 %503 }
 0x2ad   :  { %v506_v33 = vmul.f32 %v3162_v11, %v504_v31 }
 0x2af   :  { %508 = vrot.lane.b32.xlu1 %v506_v33, %s3410_s4 }
 0x2b3   :  { %514 = vperm.xlu1 %3154, %v298_v34  }
 0x2b9   :  { %v3659_v39 = vpop.permute.xlu0 %521 }
 0x2fa   :  { %v406_v44 = vpop.permute.xlu0 %405 }
 0x2fb   :  { %v408_v45 = vadd.f32 %v3164_v22, %v406_v44 }
 0x321   :  { %v509_v36 = vpop.permute.xlu1 %508 }
 0x322   :  { %v511_v37 = vadd.f32 %v3166_v26, %v509_v36  ;;  %v2758_v26 = vld [vmem:[%s4250_s1 + $0x4] sm:$0xf] }
 0x324   :  { %v3662_v41 = vmul.f32 %v3659_v39, %v511_v37 }
 0x326   :  { %651 = vrot.lane.b32.xlu1 %v3662_v41, %s3409_s20 }
 0x32e   :  { %v3666_v47 = vpop.permute.xlu1 %514 }
 0x32f   :  { %v3669_v48 = vmul.f32 %v3666_v47, %v408_v45 }
 0x331   :  { %546 = vrot.lane.b32.xlu0 %v3669_v48, %s3409_s20 }
 0x398   :  { %v652_v49 = vpop.permute.xlu1 %651 }
 0x399   :  { %2955 = vmatmul.mubr.msk.f32.vlgmr.msra.gmra.mxu1 %vm133_vm1, %v652_v49 }
 0x39a   :  { %2969 = vmatpush3.msra.mxu1 %v3547_v15  ;;  %2976 = vmatprep.mubr.msk.f32.mxu1 %vm3408_vm0, %v3407_v1 }
 0x39b   :  { %2970 = vmatprep.subr.mxu1 %v3407_v1 }
 0x39c   :  { %2971 = vmatpush3.msra.mxu1 %v3556_v17 }
 0x39d   :  { %2972 = vmatprep.subr.mxu1 %v3407_v1 }
 0x39e   :  { %2973 = vmatpush3.msra.mxu1 %v3566_v19 }
 0x39f   :  { %2974 = vmatprep.subr.mxu1 %v3407_v1 }
 0x3a0   :  { %2975 = vmatpush3.msra.mxu1 %v3574_v21 }
 0x3a1   :  { %2990 = vmatprep.subr.mxu1 %v3407_v1 }
 0x3a3   :  { %v547_v50 = vpop.permute.xlu0 %546 }
 0x3a4   :  { %2944 = vmatmul.mubr.msk.f32.vlgmr.msra.gmra.mxu0 %vm133_vm1, %v547_v50 }
 0x3a5   :  { %2958 = vmatpush3.msra.mxu0 %v3529_v8  ;;  %2965 = vmatprep.mubr.msk.f32.mxu0 %vm3408_vm0, %v3407_v1 }
 0x3a6   :  { %2959 = vmatprep.subr.mxu0 %v3407_v1 }
 0x3a7   :  { %2960 = vmatpush3.msra.mxu0 %v3531_v9 }
 0x3a8   :  { %2961 = vmatprep.subr.mxu0 %v3407_v1 }
 0x3a9   :  { %2962 = vmatpush3.msra.mxu0 %v3535_v12 }
 0x3aa   :  { %2963 = vmatprep.subr.mxu0 %v3407_v1 }
 0x3ab   :  { %2964 = vmatpush3.msra.mxu0 %v3542_v14 }
 0x3ac   :  { %2979 = vmatprep.subr.mxu0 %v3407_v1 }
 0x459   :  { %v721_v51 = vpop.f32.mrf.mxu1 }
 0x45a   :  { %v732_v53 = vadd.f32 %v721_v51, %v3630_v43  ;;  %v725_v59 = vadd.f32 %v721_v51, %v544_v58 }
 0x45b   :  { %v2956_v54 = vpop.f32.mrf.mxu1 }
 0x45c   :  { %734 = vrot.lane.b32.xlu1 %v732_v53, %s3409_s20  ;;  %v2763_v60 = vmul.f32 -1.442695, %v725_v59 }
 0x45e   :  { %3167 = vpow2.f32 %v2763_v60 }
 0x464   :  { %v616_v55 = vpop.f32.mrf.mxu0 }
 0x465   :  { %v627_v56 = vadd.f32 %v616_v55, %v3640_v52  ;;  %v620_v62 = vadd.f32 %v616_v55, %v543_v61 }
 0x466   :  { %v2945_v57 = vpop.f32.mrf.mxu0 }
 0x467   :  { %629 = vrot.lane.b32.xlu0 %v627_v56, %s3409_s20  ;;  %v2761_v63 = vmul.f32 -1.442695, %v620_v62 }
 0x469   :  { %3169 = vpow2.f32 %v2761_v63 }
 0x46b   :  { %v3168_v0 = vpop.eup %3167 }
 0x46c   :  { %v729_v2 = vadd.f32 1.0, %v3168_v0 }
 0x46e   :  { %3171 = vrcp.f32 %v729_v2 }
 0x476   :  { %v3170_v3 = vpop.eup %3169 }
 0x477   :  { %v624_v4 = vadd.f32 1.0, %v3170_v3 }
 0x479   :  { %3173 = vrcp.f32 %v624_v4 }
 0x47b   :  { %v3172_v5 = vpop.eup %3171 }
 0x486   :  { %v3174_v10 = vpop.eup %3173 }
 0x4ce   :  { %v735_v6 = vpop.permute.xlu1 %734 }
 0x4cf   :  { %v737_v7 = vmul.f32 %v3172_v5, %v735_v6  ;;  %v787_v6 = vld [vmem:[#allocation2 + $0x8] sm:$0xf] }
 0x4d1   :  { %739 = vrot.lane.b32.xlu1 %v737_v7, %s3409_s20 }
 0x4d9   :  { %v630_v11 = vpop.permute.xlu0 %629 }
 0x4da   :  { %v632_v13 = vmul.f32 %v3174_v10, %v630_v11 }
 0x4dc   :  { %634 = vrot.lane.b32.xlu0 %v632_v13, %s3409_s20 }
 0x543   :  { %v740_v16 = vpop.permute.xlu1 %739 }
 0x544   :  { %v742_v18 = vadd.f32 %v740_v16, %v544_v58 }
 0x546   :  { %3175 = vtanh.f32 %v742_v18 }
 0x54e   :  { %v635_v20 = vpop.permute.xlu0 %634 }
 0x54f   :  { %v637_v22 = vadd.f32 %v635_v20, %v543_v61 }
 0x551   :  { %3177 = vtanh.f32 %v637_v22 }
 0x553   :  { %v3176_v23 = vpop.eup %3175 }
 0x554   :  { %v744_v24 = vsub.f32 %v3662_v41, %v3176_v23 }
 0x556   :  { %746 = vrot.lane.b32.xlu1 %v744_v24, %s3412_s25 }
 0x55a   :  { %766 = vperm.xlu1 %3154, %v2759_v25  }
 0x55e   :  { %v3178_v27 = vpop.eup %3177  ;;  %758 = vperm.xlu1 %3154, %v2758_v26  }
 0x55f   :  { %v639_v28 = vsub.f32 %v3669_v48, %v3178_v27 }
 0x561   :  { %641 = vrot.lane.b32.xlu0 %v639_v28, %s3412_s25 }
 0x5c8   :  { %v747_v29 = vpop.permute.xlu1 %746 }
 0x5c9   :  { %v749_v30 = vmul.f32 %v3172_v5, %v747_v29 }
 0x5cb   :  { %751 = vrot.lane.b32.xlu0 %v749_v30, %s3410_s4 }
 0x5d3   :  { %v642_v31 = vpop.permute.xlu0 %641 }
 0x5d4   :  { %v644_v33 = vmul.f32 %v3174_v10, %v642_v31 }
 0x5d5   :  { %v3714_v44 = vpop.permute.xlu1 %766 }
 0x5d6   :  { %646 = vrot.lane.b32.xlu0 %v644_v33, %s3410_s4 }
 0x5d9   :  { %v3725_v54 = vpop.permute.xlu1 %758 }
 0x63d   :  { %v752_v34 = vpop.permute.xlu0 %751 }
 0x63e   :  { %v754_v36 = vadd.f32 %v3176_v23, %v752_v34  ;;  %v2765_v34 = vld [vmem:[%s4250_s1 + $0x14] sm:$0xf] }
 0x640   :  { %v763_v37 = vsub.f32 %v754_v36, %v3662_v41  ;;  %v2764_v36 = vld [vmem:[%s4250_s1 + $0x8] sm:$0xf] }
 0x642   :  { %v769_v45 = vmul.f32 %v3714_v44, %v763_v37 }
 0x644   :  { %v3718_v49 = vadd.f32 %v769_v45, %v3662_v41 }
 0x646   :  { %895 = vrot.lane.b32.xlu1 %v3718_v49, %s3409_s20 }
 0x648   :  { %v647_v50 = vpop.permute.xlu0 %646 }
 0x649   :  { %v649_v51 = vadd.f32 %v3178_v27, %v647_v50 }
 0x64a   :  { %256 = vrot.lane.b32.xlu1 %v3628_v42, %s3410_s4 }
 0x64b   :  { %v755_v53 = vsub.f32 %v649_v51, %v3669_v48 }
 0x64d   :  { %v761_v55 = vmul.f32 %v3725_v54, %v755_v53 }
 0x64f   :  { %v3729_v56 = vadd.f32 %v761_v55, %v3669_v48 }
 0x651   :  { %790 = vrot.lane.b32.xlu0 %v3729_v56, %s3409_s20 }
 0x655   :  { %258 = vrot.lane.b32.xlu0 %v3634_v46, %s3410_s4 }
 0x6b8   :  { %v896_v57 = vpop.permute.xlu1 %895 }
 0x6b9   :  { %2977 = vmatmul.mubr.msk.f32.vlgmr.msra.gmra.mxu1 %vm133_vm1, %v896_v57 }
 0x6ba   :  { %2991 = vmatpush3.msra.mxu1 %v3547_v15  ;;  %2998 = vmatprep.mubr.msk.f32.mxu1 %vm3408_vm0, %v3407_v1 }
 0x6bb   :  { %2992 = vmatprep.subr.mxu1 %v3407_v1 }
 0x6bc   :  { %2993 = vmatpush3.msra.mxu1 %v3556_v17  ;;  %v257_v46 = vpop.permute.xlu1 %256 }
 0x6bd   :  { %2994 = vmatprep.subr.mxu1 %v3407_v1 }
 0x6be   :  { %2995 = vmatpush3.msra.mxu1 %v3566_v19 }
 0x6bf   :  { %2996 = vmatprep.subr.mxu1 %v3407_v1 }
 0x6c0   :  { %2997 = vmatpush3.msra.mxu1 %v3574_v21 }
 0x6c1   :  { %3012 = vmatprep.subr.mxu1 %v3407_v1 }
 0x6c3   :  { %v791_v42 = vpop.permute.xlu0 %790 }
 0x6c4   :  { %2966 = vmatmul.mubr.msk.f32.vlgmr.msra.gmra.mxu0 %vm133_vm1, %v791_v42 }
 0x6c5   :  { %2980 = vmatpush3.msra.mxu0 %v3529_v8  ;;  %2987 = vmatprep.mubr.msk.f32.mxu0 %vm3408_vm0, %v3407_v1 }
 0x6c6   :  { %2981 = vmatprep.subr.mxu0 %v3407_v1 }
 0x6c7   :  { %v259_v58 = vpop.permute.xlu0 %258  ;;  %2982 = vmatpush3.msra.mxu0 %v3531_v9 }
 0x6c8   :  { %v266_v59 = vsel %vm133_vm1, %v257_v46, %v259_v58  ;;  %2983 = vmatprep.subr.mxu0 %v3407_v1 }
 0x6c9   :  { %274 = vst.msk [vmem:[#allocation3 + $0x10] sm:$0xff] %vm235_vm2, %v266_v59  ;;  %2984 = vmatpush3.msra.mxu0 %v3535_v12 }
 0x6ca   :  { %2985 = vmatprep.subr.mxu0 %v3407_v1 }
 0x6cb   :  { %2986 = vmatpush3.msra.mxu0 %v3542_v14 }
 0x6cc   :  { %3001 = vmatprep.subr.mxu0 %v3407_v1 }
 0x6d0   :  { %v788_v3 = vld [vmem:[#allocation3 + $0x14] sm:$0xf] }
 0x779   :  { %v965_v60 = vpop.f32.mrf.mxu1 }
 0x77a   :  { %v976_v61 = vadd.f32 %v965_v60, %v3630_v43  ;;  %v969_v4 = vadd.f32 %v965_v60, %v788_v3 }
 0x77b   :  { %v2978_v62 = vpop.f32.mrf.mxu1 }
 0x77c   :  { %978 = vrot.lane.b32.xlu1 %v976_v61, %s3409_s20  ;;  %v2769_v5 = vmul.f32 -1.442695, %v969_v4 }
 0x77e   :  { %3179 = vpow2.f32 %v2769_v5 }
 0x784   :  { %v860_v63 = vpop.f32.mrf.mxu0 }
 0x785   :  { %v871_v0 = vadd.f32 %v860_v63, %v3640_v52  ;;  %v864_v7 = vadd.f32 %v860_v63, %v787_v6 }
 0x786   :  { %v2967_v2 = vpop.f32.mrf.mxu0 }
 0x787   :  { %873 = vrot.lane.b32.xlu0 %v871_v0, %s3409_s20  ;;  %v2767_v10 = vmul.f32 -1.442695, %v864_v7 }
 0x789   :  { %3181 = vpow2.f32 %v2767_v10 }
 0x78b   :  { %v3180_v11 = vpop.eup %3179 }
 0x78c   :  { %v973_v13 = vadd.f32 1.0, %v3180_v11 }
 0x78e   :  { %3183 = vrcp.f32 %v973_v13 }
 0x796   :  { %v3182_v16 = vpop.eup %3181 }
 0x797   :  { %v868_v18 = vadd.f32 1.0, %v3182_v16 }
 0x799   :  { %3185 = vrcp.f32 %v868_v18  ;;  %v1032_v18 = vld [vmem:[#allocation3 + $0x10] sm:$0xf] }
 0x79b   :  { %v3184_v20 = vpop.eup %3183 }
 0x7a6   :  { %v3186_v24 = vpop.eup %3185 }
 0x7ee   :  { %v979_v22 = vpop.permute.xlu1 %978 }
 0x7ef   :  { %v981_v23 = vmul.f32 %v3184_v20, %v979_v22 }
 0x7f1   :  { %983 = vrot.lane.b32.xlu1 %v981_v23, %s3409_s20  ;;  %v1031_v23 = vld [vmem:[#allocation2 + $0xc] sm:$0xf] }
 0x7f9   :  { %v874_v25 = vpop.permute.xlu0 %873 }
 0x7fa   :  { %v876_v26 = vmul.f32 %v3186_v24, %v874_v25 }
 0x7fc   :  { %878 = vrot.lane.b32.xlu0 %v876_v26, %s3409_s20 }
 0x863   :  { %v984_v27 = vpop.permute.xlu1 %983 }
 0x864   :  { %v986_v28 = vadd.f32 %v984_v27, %v788_v3 }
 0x866   :  { %3187 = vtanh.f32 %v986_v28 }
 0x86e   :  { %v879_v29 = vpop.permute.xlu0 %878 }
 0x86f   :  { %v881_v30 = vadd.f32 %v879_v29, %v787_v6 }
 0x871   :  { %3189 = vtanh.f32 %v881_v30 }
 0x873   :  { %v3188_v31 = vpop.eup %3187 }
 0x874   :  { %v988_v33 = vsub.f32 %v3718_v49, %v3188_v31 }
 0x876   :  { %990 = vrot.lane.b32.xlu1 %v988_v33, %s3412_s25 }
 0x87a   :  { %1010 = vperm.xlu1 %3154, %v2765_v34  }
 0x87e   :  { %v3190_v37 = vpop.eup %3189  ;;  %1002 = vperm.xlu1 %3154, %v2764_v36  }
 0x87f   :  { %v883_v45 = vsub.f32 %v3729_v56, %v3190_v37 }
 0x881   :  { %885 = vrot.lane.b32.xlu0 %v883_v45, %s3412_s25 }
 0x8e8   :  { %v991_v50 = vpop.permute.xlu1 %990 }
 0x8e9   :  { %v993_v51 = vmul.f32 %v3184_v20, %v991_v50 }
 0x8eb   :  { %995 = vrot.lane.b32.xlu0 %v993_v51, %s3410_s4 }
 0x8f3   :  { %v886_v53 = vpop.permute.xlu0 %885 }
 0x8f4   :  { %v888_v55 = vmul.f32 %v3186_v24, %v886_v53 }
 0x8f5   :  { %v3778_v58 = vpop.permute.xlu1 %1010 }
 0x8f6   :  { %890 = vrot.lane.b32.xlu0 %v888_v55, %s3410_s4 }
 0x8f9   :  { %v3787_v0 = vpop.permute.xlu1 %1002 }
 0x95d   :  { %v996_v57 = vpop.permute.xlu0 %995 }
 0x95e   :  { %v998_v42 = vadd.f32 %v3188_v31, %v996_v57 }
 0x960   :  { %v1007_v46 = vsub.f32 %v998_v42, %v3718_v49  ;;  %v2771_v42 = vld [vmem:[%s4250_s1 + $0x10] sm:$0xf] }
 0x962   :  { %v1013_v59 = vmul.f32 %v3778_v58, %v1007_v46  ;;  %v2770_v46 = vld [vmem:[%s4250_s1 + $0xc] sm:$0xf] }
 0x964   :  { %v3782_v60 = vadd.f32 %v1013_v59, %v3718_v49 }
 0x966   :  { %1139 = vrot.lane.b32.xlu1 %v3782_v60, %s3409_s20 }
 0x968   :  { %v891_v61 = vpop.permute.xlu0 %890 }
 0x969   :  { %v893_v62 = vadd.f32 %v3190_v37, %v891_v61 }
 0x96b   :  { %v999_v63 = vsub.f32 %v893_v62, %v3729_v56 }
 0x96d   :  { %v1005_v2 = vmul.f32 %v3787_v0, %v999_v63 }
 0x96f   :  { %v3791_v3 = vadd.f32 %v1005_v2, %v3729_v56 }
 0x971   :  { %1034 = vrot.lane.b32.xlu0 %v3791_v3, %s3409_s20 }
 0x9d8   :  { %v1140_v4 = vpop.permute.xlu1 %1139 }
 0x9d9   :  { %2999 = vmatmul.mubr.msk.f32.vlgmr.msra.gmra.mxu1 %vm133_vm1, %v1140_v4 }
 0x9da   :  { %3013 = vmatpush3.msra.mxu1 %v3547_v15  ;;  %3020 = vmatprep.mubr.msk.f32.mxu1 %vm3408_vm0, %v3407_v1 }
 0x9db   :  { %3014 = vmatprep.subr.mxu1 %v3407_v1 }
 0x9dc   :  { %3015 = vmatpush3.msra.mxu1 %v3556_v17 }
 0x9dd   :  { %3016 = vmatprep.subr.mxu1 %v3407_v1 }
 0x9de   :  { %3017 = vmatpush3.msra.mxu1 %v3566_v19 }
 0x9df   :  { %3018 = vmatprep.subr.mxu1 %v3407_v1 }
 0x9e0   :  { %3019 = vmatpush3.msra.mxu1 %v3574_v21 }
 0x9e1   :  { %3034 = vmatprep.subr.mxu1 %v3407_v1 }
 0x9e3   :  { %v1035_v5 = vpop.permute.xlu0 %1034 }
 0x9e4   :  { %2988 = vmatmul.mubr.msk.f32.vlgmr.msra.gmra.mxu0 %vm133_vm1, %v1035_v5 }
 0x9e5   :  { %3002 = vmatpush3.msra.mxu0 %v3529_v8  ;;  %3009 = vmatprep.mubr.msk.f32.mxu0 %vm3408_vm0, %v3407_v1 }
 0x9e6   :  { %3003 = vmatprep.subr.mxu0 %v3407_v1 }
 0x9e7   :  { %3004 = vmatpush3.msra.mxu0 %v3531_v9 }
 0x9e8   :  { %3005 = vmatprep.subr.mxu0 %v3407_v1 }
 0x9e9   :  { %3006 = vmatpush3.msra.mxu0 %v3535_v12 }
 0x9ea   :  { %3007 = vmatprep.subr.mxu0 %v3407_v1 }
 0x9eb   :  { %3008 = vmatpush3.msra.mxu0 %v3542_v14 }
 0x9ec   :  { %3023 = vmatprep.subr.mxu0 %v3407_v1 }
 0xa99   :  { %v1209_v6 = vpop.f32.mrf.mxu1 }
 0xa9a   :  { %v1220_v7 = vadd.f32 %v1209_v6, %v3630_v43  ;;  %v1213_v20 = vadd.f32 %v1209_v6, %v1032_v18 }
 0xa9b   :  { %v3000_v10 = vpop.f32.mrf.mxu1 }
 0xa9c   :  { %1222 = vrot.lane.b32.xlu1 %v1220_v7, %s3409_s20  ;;  %v2775_v22 = vmul.f32 -1.442695, %v1213_v20 }
 0xa9e   :  { %3191 = vpow2.f32 %v2775_v22 }
 0xaa4   :  { %v1104_v11 = vpop.f32.mrf.mxu0 }
 0xaa5   :  { %v1115_v13 = vadd.f32 %v1104_v11, %v3640_v52  ;;  %v1108_v24 = vadd.f32 %v1104_v11, %v1031_v23 }
 0xaa6   :  { %v2989_v16 = vpop.f32.mrf.mxu0 }
 0xaa7   :  { %1117 = vrot.lane.b32.xlu0 %v1115_v13, %s3409_s20  ;;  %v2773_v25 = vmul.f32 -1.442695, %v1108_v24 }
 0xaa9   :  { %3193 = vpow2.f32 %v2773_v25 }
 0xaab   :  { %v3192_v26 = vpop.eup %3191 }
 0xaac   :  { %v1217_v27 = vadd.f32 1.0, %v3192_v26 }
 0xaae   :  { %3195 = vrcp.f32 %v1217_v27 }
 0xab6   :  { %v3194_v28 = vpop.eup %3193 }
 0xab7   :  { %v1112_v29 = vadd.f32 1.0, %v3194_v28 }
 0xab9   :  { %3197 = vrcp.f32 %v1112_v29 }
 0xabb   :  { %v3196_v30 = vpop.eup %3195 }
 0xac6   :  { %v3198_v34 = vpop.eup %3197 }
 0xb0e   :  { %v1223_v31 = vpop.permute.xlu1 %1222 }
 0xb0f   :  { %v1225_v33 = vmul.f32 %v3196_v30, %v1223_v31 }
 0xb11   :  { %1227 = vrot.lane.b32.xlu1 %v1225_v33, %s3409_s20  ;;  %v1273_v33 = vld [vmem:[#allocation2 + $0x10] sm:$0xf] }
 0xb19   :  { %v1118_v36 = vpop.permute.xlu0 %1117 }
 0xb1a   :  { %v1120_v37 = vmul.f32 %v3198_v34, %v1118_v36 }
 0xb1c   :  { %1122 = vrot.lane.b32.xlu0 %v1120_v37, %s3409_s20 }
 0xb83   :  { %v1228_v45 = vpop.permute.xlu1 %1227 }
 0xb84   :  { %v1230_v50 = vadd.f32 %v1228_v45, %v1032_v18 }
 0xb86   :  { %3199 = vtanh.f32 %v1230_v50 }
 0xb8e   :  { %v1123_v51 = vpop.permute.xlu0 %1122 }
 0xb8f   :  { %v1125_v53 = vadd.f32 %v1123_v51, %v1031_v23 }
 0xb91   :  { %3201 = vtanh.f32 %v1125_v53 }
 0xb93   :  { %v3200_v55 = vpop.eup %3199 }
 0xb94   :  { %v1232_v57 = vsub.f32 %v3782_v60, %v3200_v55 }
 0xb96   :  { %1234 = vrot.lane.b32.xlu1 %v1232_v57, %s3412_s25 }
 0xb9a   :  { %1254 = vperm.xlu1 %3154, %v2771_v42  }
 0xb9e   :  { %v3202_v59 = vpop.eup %3201  ;;  %1246 = vperm.xlu1 %3154, %v2770_v46  }
 0xb9f   :  { %v1127_v61 = vsub.f32 %v3791_v3, %v3202_v59 }
 0xba1   :  { %1129 = vrot.lane.b32.xlu0 %v1127_v61, %s3412_s25 }
 0xc08   :  { %v1235_v62 = vpop.permute.xlu1 %1234 }
 0xc09   :  { %v1237_v63 = vmul.f32 %v3196_v30, %v1235_v62 }
 0xc0b   :  { %1239 = vrot.lane.b32.xlu0 %v1237_v63, %s3410_s4 }
 0xc13   :  { %v1130_v2 = vpop.permute.xlu0 %1129 }
 0xc14   :  { %v1132_v4 = vmul.f32 %v3198_v34, %v1130_v2 }
 0xc15   :  { %v3836_v10 = vpop.permute.xlu1 %1254 }
 0xc16   :  { %1134 = vrot.lane.b32.xlu0 %v1132_v4, %s3410_s4 }
 0xc19   :  { %v3847_v22 = vpop.permute.xlu1 %1246 }
 0xc7d   :  { %v1240_v5 = vpop.permute.xlu0 %1239 }
 0xc7e   :  { %v1242_v6 = vadd.f32 %v3200_v55, %v1240_v5  ;;  %v2777_v5 = vld [vmem:[%s4250_s1 + $0xc] sm:$0xf] }
 0xc80   :  { %v1251_v7 = vsub.f32 %v1242_v6, %v3782_v60  ;;  %v2776_v6 = vld [vmem:[%s4250_s1 + $0x10] sm:$0xf] }
 0xc82   :  { %v1257_v11 = vmul.f32 %v3836_v10, %v1251_v7 }
 0xc84   :  { %v3840_v13 = vadd.f32 %v1257_v11, %v3782_v60 }
 0xc86   :  { %1381 = vrot.lane.b32.xlu1 %v3840_v13, %s3409_s20 }
 0xc88   :  { %v1135_v16 = vpop.permute.xlu0 %1134 }
 0xc89   :  { %v1137_v18 = vadd.f32 %v3202_v59, %v1135_v16 }
 0xc8a   :  { %252 = vrot.lane.b32.xlu1 %v3622_v38, %s3410_s4 }
 0xc8b   :  { %v1243_v20 = vsub.f32 %v1137_v18, %v3791_v3 }
 0xc8d   :  { %v1249_v23 = vmul.f32 %v3847_v22, %v1243_v20 }
 0xc8f   :  { %v3851_v24 = vadd.f32 %v1249_v23, %v3791_v3 }
 0xc91   :  { %1276 = vrot.lane.b32.xlu0 %v3851_v24, %s3409_s20 }
 0xc95   :  { %254 = vrot.lane.b32.xlu0 %v3626_v40, %s3410_s4 }
 0xcf8   :  { %v1382_v25 = vpop.permute.xlu1 %1381 }
 0xcf9   :  { %3021 = vmatmul.mubr.msk.f32.vlgmr.msra.gmra.mxu1 %vm133_vm1, %v1382_v25 }
 0xcfa   :  { %3035 = vmatpush3.msra.mxu1 %v3547_v15  ;;  %3042 = vmatprep.mubr.msk.f32.mxu1 %vm3408_vm0, %v3407_v1 }
 0xcfb   :  { %3036 = vmatprep.subr.mxu1 %v3407_v1 }
 0xcfc   :  { %3037 = vmatpush3.msra.mxu1 %v3556_v17  ;;  %v253_v15 = vpop.permute.xlu1 %252 }
 0xcfd   :  { %3038 = vmatprep.subr.mxu1 %v3407_v1 }
 0xcfe   :  { %3039 = vmatpush3.msra.mxu1 %v3566_v19 }
 0xcff   :  { %3040 = vmatprep.subr.mxu1 %v3407_v1 }
 0xd00   :  { %3041 = vmatpush3.msra.mxu1 %v3574_v21 }
 0xd01   :  { %3056 = vmatprep.subr.mxu1 %v3407_v1 }
 0xd03   :  { %v1277_v38 = vpop.permute.xlu0 %1276 }
 0xd04   :  { %3010 = vmatmul.mubr.msk.f32.vlgmr.msra.gmra.mxu0 %vm133_vm1, %v1277_v38 }
 0xd05   :  { %3024 = vmatpush3.msra.mxu0 %v3529_v8  ;;  %3031 = vmatprep.mubr.msk.f32.mxu0 %vm3408_vm0, %v3407_v1 }
 0xd06   :  { %3025 = vmatprep.subr.mxu0 %v3407_v1 }
 0xd07   :  { %v255_v17 = vpop.permute.xlu0 %254  ;;  %3026 = vmatpush3.msra.mxu0 %v3531_v9 }
 0xd08   :  { %v265_v40 = vsel %vm133_vm1, %v253_v15, %v255_v17  ;;  %3027 = vmatprep.subr.mxu0 %v3407_v1 }
 0xd09   :  { %273 = vst.msk [vmem:[#allocation3 + $0x8] sm:$0xff] %vm235_vm2, %v265_v40  ;;  %3028 = vmatpush3.msra.mxu0 %v3535_v12 }
 0xd0a   :  { %3029 = vmatprep.subr.mxu0 %v3407_v1 }
 0xd0b   :  { %3030 = vmatpush3.msra.mxu0 %v3542_v14 }
 0xd0c   :  { %3045 = vmatprep.subr.mxu0 %v3407_v1 }
 0xd10   :  { %v1274_v30 = vld [vmem:[#allocation3 + $0xc] sm:$0xf] }
 0xdb9   :  { %v1451_v8 = vpop.f32.mrf.mxu1 }
 0xdba   :  { %v1462_v26 = vadd.f32 %v1451_v8, %v3630_v43  ;;  %v1455_v12 = vadd.f32 %v1451_v8, %v1274_v30 }
 0xdbb   :  { %v3022_v27 = vpop.f32.mrf.mxu1 }
 0xdbc   :  { %1464 = vrot.lane.b32.xlu1 %v1462_v26, %s3409_s20  ;;  %v2781_v31 = vmul.f32 -1.442695, %v1455_v12 }
 0xdbe   :  { %3203 = vpow2.f32 %v2781_v31  ;;  %v3918_v31 = vld [vmem:[#allocation10 + $0x38] sm:$0xff] }
 0xdc4   :  { %v1346_v9 = vpop.f32.mrf.mxu0 }
 0xdc5   :  { %v1357_v28 = vadd.f32 %v1346_v9, %v3640_v52  ;;  %v1350_v14 = vadd.f32 %v1346_v9, %v1273_v33 }
 0xdc6   :  { %v3011_v29 = vpop.f32.mrf.mxu0 }
 0xdc7   :  { %1359 = vrot.lane.b32.xlu0 %v1357_v28, %s3409_s20  ;;  %v2779_v34 = vmul.f32 -1.442695, %v1350_v14 }
 0xdc9   :  { %3205 = vpow2.f32 %v2779_v34  ;;  %v3933_v34 = vld [vmem:[#allocation10 + $0x18] sm:$0xff] }
 0xdcb   :  { %v3204_v36 = vpop.eup %3203 }
 0xdcc   :  { %v1459_v37 = vadd.f32 1.0, %v3204_v36  ;;  %v3939_v36 = vld [vmem:[#allocation10 + $0x10] sm:$0xff] }
 0xdce   :  { %3207 = vrcp.f32 %v1459_v37 }
 0xdd6   :  { %v3206_v45 = vpop.eup %3205 }
 0xdd7   :  { %v1354_v50 = vadd.f32 1.0, %v3206_v45 }
 0xdd9   :  { %3209 = vrcp.f32 %v1354_v50 }
 0xddb   :  { %v3208_v51 = vpop.eup %3207 }
 0xde6   :  { %v3210_v57 = vpop.eup %3209 }
 0xe2e   :  { %v1465_v53 = vpop.permute.xlu1 %1464 }
 0xe2f   :  { %v1467_v55 = vmul.f32 %v3208_v51, %v1465_v53 }
 0xe31   :  { %1469 = vrot.lane.b32.xlu1 %v1467_v55, %s3409_s20 }
 0xe39   :  { %v1360_v42 = vpop.permute.xlu0 %1359 }
 0xe3a   :  { %v1362_v46 = vmul.f32 %v3210_v57, %v1360_v42 }
 0xe3c   :  { %1364 = vrot.lane.b32.xlu0 %v1362_v46, %s3409_s20 }
 0xea3   :  { %v1470_v59 = vpop.permute.xlu1 %1469 }
 0xea4   :  { %v1472_v61 = vadd.f32 %v1470_v59, %v1274_v30  ;;  %v1515_v59 = vld [vmem:[#allocation2 + $0x14] sm:$0xf] }
 0xea6   :  { %3211 = vtanh.f32 %v1472_v61 }
 0xeae   :  { %v1365_v62 = vpop.permute.xlu0 %1364 }
 0xeaf   :  { %v1367_v63 = vadd.f32 %v1365_v62, %v1273_v33  ;;  %v3924_v33 = vld [vmem:[#allocation10 + $0x30] sm:$0xff] }
 0xeb1   :  { %3213 = vtanh.f32 %v1367_v63 }
 0xeb3   :  { %v3212_v2 = vpop.eup %3211 }
 0xeb4   :  { %v1474_v4 = vsub.f32 %v3840_v13, %v3212_v2 }
 0xeb6   :  { %1476 = vrot.lane.b32.xlu1 %v1474_v4, %s3412_s25 }
 0xeba   :  { %1496 = vperm.xlu1 %3154, %v2777_v5  }
 0xebe   :  { %v3214_v7 = vpop.eup %3213  ;;  %1488 = vperm.xlu1 %3154, %v2776_v6  }
 0xebf   :  { %v1369_v11 = vsub.f32 %v3851_v24, %v3214_v7 }
 0xec1   :  { %1371 = vrot.lane.b32.xlu0 %v1369_v11, %s3412_s25 }
 0xf28   :  { %v1477_v16 = vpop.permute.xlu1 %1476 }
 0xf29   :  { %v1479_v18 = vmul.f32 %v3208_v51, %v1477_v16 }
 0xf2b   :  { %1481 = vrot.lane.b32.xlu0 %v1479_v18, %s3410_s4 }
 0xf33   :  { %v1372_v20 = vpop.permute.xlu0 %1371 }
 0xf34   :  { %v1374_v23 = vmul.f32 %v3210_v57, %v1372_v20  ;;  %v1516_v57 = vld [vmem:[#allocation3 + $0x8] sm:$0xf] }
 0xf35   :  { %v3900_v17 = vpop.permute.xlu1 %1496 }
 0xf36   :  { %1376 = vrot.lane.b32.xlu0 %v1374_v23, %s3410_s4 }
 0xf39   :  { %v3909_v28 = vpop.permute.xlu1 %1488 }
 0xf9d   :  { %v1482_v25 = vpop.permute.xlu0 %1481 }
 0xf9e   :  { %v1484_v38 = vadd.f32 %v3212_v2, %v1482_v25 }
 0xfa0   :  { %v1493_v15 = vsub.f32 %v1484_v38, %v3840_v13 }
 0xfa2   :  { %v1499_v40 = vmul.f32 %v3900_v17, %v1493_v15 }
 0xfa4   :  { %v3904_v8 = vadd.f32 %v1499_v40, %v3840_v13 }
 0xfa6   :  { %1623 = vrot.lane.b32.xlu1 %v3904_v8, %s3409_s20 }
 0xfa8   :  { %v1377_v26 = vpop.permute.xlu0 %1376 }
 0xfa9   :  { %v1379_v27 = vadd.f32 %v3214_v7, %v1377_v26 }
 0xfab   :  { %v1485_v9 = vsub.f32 %v1379_v27, %v3851_v24  ;;  %v2783_v27 = vld [vmem:[%s4250_s1 + $0x8] sm:$0xf] }
 0xfad   :  { %v1491_v29 = vmul.f32 %v3909_v28, %v1485_v9  ;;  %v2782_v9 = vld [vmem:[%s4250_s1 + $0x14] sm:$0xf] }
 0xfaf   :  { %v3913_v30 = vadd.f32 %v1491_v29, %v3851_v24 }
 0xfb1   :  { %1518 = vrot.lane.b32.xlu0 %v3913_v30, %s3409_s20 }
0x1018   :  { %v1624_v12 = vpop.permute.xlu1 %1623 }
0x1019   :  { %3043 = vmatmul.mubr.msk.f32.vlgmr.msra.gmra.mxu1 %vm133_vm1, %v1624_v12 }
0x101a   :  { %3057 = vmatpush3.msra.mxu1 %v3918_v31  ;;  %3064 = vmatprep.mubr.msk.f32.mxu1 %vm3408_vm0, %v3407_v1 }
0x101b   :  { %3058 = vmatprep.subr.mxu1 %v3407_v1 }
0x101c   :  { %3059 = vmatpush3.msra.mxu1 %v3924_v33 }
0x101d   :  { %3060 = vmatprep.subr.mxu1 %v3407_v1 }
0x101e   :  { %3061 = vmatpush3.msra.mxu1 %v3566_v19  ;;  %v3943_v19 = vld [vmem:[#allocation10 + $0x8] sm:$0xff] }
0x101f   :  { %3062 = vmatprep.subr.mxu1 %v3407_v1 }
0x1020   :  { %3063 = vmatpush3.msra.mxu1 %v3574_v21  ;;  %v3947_v21 = vld [vmem:[#allocation10] sm:$0xff] }
0x1021   :  { %3078 = vmatprep.subr.mxu1 %v3407_v1 }
0x1023   :  { %v1519_v14 = vpop.permute.xlu0 %1518 }
0x1024   :  { %3032 = vmatmul.mubr.msk.f32.vlgmr.msra.gmra.mxu0 %vm133_vm1, %v1519_v14 }
0x1025   :  { %3046 = vmatpush3.msra.mxu0 %v3933_v34  ;;  %3053 = vmatprep.mubr.msk.f32.mxu0 %vm3408_vm0, %v3407_v1 }
0x1026   :  { %3047 = vmatprep.subr.mxu0 %v3407_v1 }
0x1027   :  { %3048 = vmatpush3.msra.mxu0 %v3939_v36 }
0x1028   :  { %3049 = vmatprep.subr.mxu0 %v3407_v1 }
0x1029   :  { %3050 = vmatpush3.msra.mxu0 %v3943_v19 }
0x102a   :  { %3051 = vmatprep.subr.mxu0 %v3407_v1 }
0x102b   :  { %3052 = vmatpush3.msra.mxu0 %v3947_v21 }
0x102c   :  { %3067 = vmatprep.subr.mxu0 %v3407_v1 }
0x10d9   :  { %v1693_v37 = vpop.f32.mrf.mxu1 }
0x10da   :  { %v1704_v45 = vadd.f32 %v1693_v37, %v3630_v43  ;;  %v1697_v42 = vadd.f32 %v1693_v37, %v1516_v57 }
0x10db   :  { %v3044_v50 = vpop.f32.mrf.mxu1 }
0x10dc   :  { %1706 = vrot.lane.b32.xlu1 %v1704_v45, %s3409_s20  ;;  %v2787_v46 = vmul.f32 -1.442695, %v1697_v42 }
0x10de   :  { %3215 = vpow2.f32 %v2787_v46 }
0x10e4   :  { %v1588_v51 = vpop.f32.mrf.mxu0 }
0x10e5   :  { %v1599_v53 = vadd.f32 %v1588_v51, %v3640_v52  ;;  %v1592_v61 = vadd.f32 %v1588_v51, %v1515_v59 }
0x10e6   :  { %v3033_v55 = vpop.f32.mrf.mxu0 }
0x10e7   :  { %1601 = vrot.lane.b32.xlu0 %v1599_v53, %s3409_s20  ;;  %v2785_v62 = vmul.f32 -1.442695, %v1592_v61 }
0x10e9   :  { %3217 = vpow2.f32 %v2785_v62 }
0x10eb   :  { %v3216_v63 = vpop.eup %3215 }
0x10ec   :  { %v1701_v2 = vadd.f32 1.0, %v3216_v63 }
0x10ee   :  { %3219 = vrcp.f32 %v1701_v2 }
0x10f6   :  { %v3218_v4 = vpop.eup %3217 }
0x10f7   :  { %v1596_v5 = vadd.f32 1.0, %v3218_v4 }
0x10f9   :  { %3221 = vrcp.f32 %v1596_v5 }
0x10fb   :  { %v3220_v6 = vpop.eup %3219 }
0x1106   :  { %v3222_v16 = vpop.eup %3221 }
0x114e   :  { %v1707_v7 = vpop.permute.xlu1 %1706 }
0x114f   :  { %v1709_v11 = vmul.f32 %v3220_v6, %v1707_v7 }
0x1151   :  { %1711 = vrot.lane.b32.xlu1 %v1709_v11, %s3409_s20 }
0x1159   :  { %v1602_v18 = vpop.permute.xlu0 %1601 }
0x115a   :  { %v1604_v20 = vmul.f32 %v3222_v16, %v1602_v18 }
0x115c   :  { %1606 = vrot.lane.b32.xlu0 %v1604_v20, %s3409_s20 }
0x11c3   :  { %v1712_v23 = vpop.permute.xlu1 %1711 }
0x11c4   :  { %v1714_v25 = vadd.f32 %v1712_v23, %v1516_v57 }
0x11c6   :  { %3223 = vtanh.f32 %v1714_v25 }
0x11ce   :  { %v1607_v38 = vpop.permute.xlu0 %1606 }
0x11cf   :  { %v1609_v15 = vadd.f32 %v1607_v38, %v1515_v59  ;;  %v1757_v38 = vld [vmem:[#allocation2 + $0x18] sm:$0xf] }
0x11d1   :  { %3225 = vtanh.f32 %v1609_v15 }
0x11d3   :  { %v3224_v40 = vpop.eup %3223 }
0x11d4   :  { %v1716_v26 = vsub.f32 %v3904_v8, %v3224_v40 }
0x11d6   :  { %1718 = vrot.lane.b32.xlu1 %v1716_v26, %s3412_s25 }
0x11da   :  { %1738 = vperm.xlu1 %3154, %v2783_v27  }
0x11de   :  { %v3226_v29 = vpop.eup %3225  ;;  %1730 = vperm.xlu1 %3154, %v2782_v9  }
0x11df   :  { %v1611_v12 = vsub.f32 %v3913_v30, %v3226_v29 }
0x11e1   :  { %1613 = vrot.lane.b32.xlu0 %v1611_v12, %s3412_s25 }
0x1248   :  { %v1719_v14 = vpop.permute.xlu1 %1718 }
0x1249   :  { %v1721_v37 = vmul.f32 %v3220_v6, %v1719_v14  ;;  %v3268_v6 = vld [vmem:[#allocation10 + $0x20] sm:$0xff] }
0x124b   :  { %1723 = vrot.lane.b32.xlu0 %v1721_v37, %s3410_s4 }
0x1253   :  { %v1614_v45 = vpop.permute.xlu0 %1613 }
0x1254   :  { %v1616_v50 = vmul.f32 %v3222_v16, %v1614_v45 }
0x1255   :  { %v3970_v57 = vpop.permute.xlu1 %1738 }
0x1256   :  { %1618 = vrot.lane.b32.xlu0 %v1616_v50, %s3410_s4 }
0x1259   :  { %v3981_v63 = vpop.permute.xlu1 %1730 }
0x12bd   :  { %v1724_v51 = vpop.permute.xlu0 %1723 }
0x12be   :  { %v1726_v53 = vadd.f32 %v3224_v40, %v1724_v51 }
0x12c0   :  { %v1735_v55 = vsub.f32 %v1726_v53, %v3904_v8 }
0x12c2   :  { %v1741_v42 = vmul.f32 %v3970_v57, %v1735_v55 }
0x12c4   :  { %v3974_v46 = vadd.f32 %v1741_v42, %v3904_v8 }
0x12c6   :  { %1865 = vrot.lane.b32.xlu1 %v3974_v46, %s3409_s20 }
0x12c8   :  { %v1619_v59 = vpop.permute.xlu0 %1618 }
0x12c9   :  { %v1621_v61 = vadd.f32 %v3226_v29, %v1619_v59 }
0x12ca   :  { %248 = vrot.lane.b32.xlu1 %v3616_v32, %s3410_s4  ;;  %v3267_v32 = vld [vmem:[#allocation10 + $0x28] sm:$0xff] }
0x12cb   :  { %v1727_v62 = vsub.f32 %v1621_v61, %v3913_v30 }
0x12cd   :  { %v1733_v2 = vmul.f32 %v3981_v63, %v1727_v62  ;;  %v2789_v62 = vld [vmem:[%s4250_s1 + $0x4] sm:$0xf] }
0x12cf   :  { %v3985_v4 = vadd.f32 %v1733_v2, %v3913_v30  ;;  %v2788_v2 = vld [vmem:[%s4250_s1 + $0x18] sm:$0xf] }
0x12d1   :  { %1760 = vrot.lane.b32.xlu0 %v3985_v4, %s3409_s20 }
0x12d5   :  { %250 = vrot.lane.b32.xlu0 %v3620_v35, %s3410_s4 }
0x1338   :  { %v1866_v5 = vpop.permute.xlu1 %1865 }
0x1339   :  { %3065 = vmatmul.mubr.msk.f32.vlgmr.msra.gmra.mxu1 %vm133_vm1, %v1866_v5 }
0x133a   :  { %3079 = vmatpush3.msra.mxu1 %v3918_v31  ;;  %3086 = vmatprep.mubr.msk.f32.mxu1 %vm3408_vm0, %v3407_v1 }
0x133b   :  { %3080 = vmatprep.subr.mxu1 %v3407_v1 }
0x133c   :  { %3081 = vmatpush3.msra.mxu1 %v3924_v33  ;;  %v249_v31 = vpop.permute.xlu1 %248 }
0x133d   :  { %3082 = vmatprep.subr.mxu1 %v3407_v1 }
0x133e   :  { %3083 = vmatpush3.msra.mxu1 %v3267_v32 }
0x133f   :  { %3084 = vmatprep.subr.mxu1 %v3407_v1 }
0x1340   :  { %3085 = vmatpush3.msra.mxu1 %v3268_v6 }
0x1343   :  { %v1761_v35 = vpop.permute.xlu0 %1760 }
0x1344   :  { %3054 = vmatmul.mubr.msk.f32.vlgmr.msra.gmra.mxu0 %vm133_vm1, %v1761_v35 }
0x1345   :  { %3068 = vmatpush3.msra.mxu0 %v3933_v34  ;;  %3075 = vmatprep.mubr.msk.f32.mxu0 %vm3408_vm0, %v3407_v1 }
0x1346   :  { %3069 = vmatprep.subr.mxu0 %v3407_v1 }
0x1347   :  { %v251_v33 = vpop.permute.xlu0 %250  ;;  %3070 = vmatpush3.msra.mxu0 %v3939_v36 }
0x1348   :  { %v264_v7 = vsel %vm133_vm1, %v249_v31, %v251_v33  ;;  %3071 = vmatprep.subr.mxu0 %v3407_v1 }
0x1349   :  { %272 = vst.msk [vmem:[#allocation3] sm:$0xff] %vm235_vm2, %v264_v7  ;;  %3072 = vmatpush3.msra.mxu0 %v3943_v19 }
0x134a   :  { %3073 = vmatprep.subr.mxu0 %v3407_v1 }
0x134b   :  { %3074 = vmatpush3.msra.mxu0 %v3947_v21 }
0x134c   :  { %3089 = vmatprep.subr.mxu0 %v3407_v1 }
0x1350   :  { %v1758_v23 = vld [vmem:[#allocation3 + $0x4] sm:$0xf] }
0x13f9   :  { %v1935_v34 = vpop.f32.mrf.mxu1 }
0x13fa   :  { %v1946_v11 = vadd.f32 %v1935_v34, %v3630_v43  ;;  %v1939_v19 = vadd.f32 %v1935_v34, %v1758_v23 }
0x13fb   :  { %v3066_v16 = vpop.f32.mrf.mxu1 }
0x13fc   :  { %1948 = vrot.lane.b32.xlu1 %v1946_v11, %s3409_s20  ;;  %v2793_v25 = vmul.f32 -1.442695, %v1939_v19 }
0x13fe   :  { %3227 = vpow2.f32 %v2793_v25 }
0x1404   :  { %v1830_v36 = vpop.f32.mrf.mxu0 }
0x1405   :  { %v1841_v18 = vadd.f32 %v1830_v36, %v3640_v52  ;;  %v1834_v21 = vadd.f32 %v1830_v36, %v1757_v38 }
0x1406   :  { %v3055_v20 = vpop.f32.mrf.mxu0 }
0x1407   :  { %1843 = vrot.lane.b32.xlu0 %v1841_v18, %s3409_s20  ;;  %v2791_v15 = vmul.f32 -1.442695, %v1834_v21 }
0x1409   :  { %3229 = vpow2.f32 %v2791_v15 }
0x140b   :  { %v3228_v40 = vpop.eup %3227 }
0x140c   :  { %v1943_v26 = vadd.f32 1.0, %v3228_v40 }
0x140e   :  { %3231 = vrcp.f32 %v1943_v26 }
0x1416   :  { %v3230_v27 = vpop.eup %3229 }
0x1417   :  { %v1838_v9 = vadd.f32 1.0, %v3230_v27 }
0x1419   :  { %3233 = vrcp.f32 %v1838_v9 }
0x141b   :  { %v3232_v29 = vpop.eup %3231 }
0x1426   :  { %v3234_v37 = vpop.eup %3233 }
0x146e   :  { %v1949_v12 = vpop.permute.xlu1 %1948 }
0x146f   :  { %v1951_v14 = vmul.f32 %v3232_v29, %v1949_v12 }
0x1471   :  { %1953 = vrot.lane.b32.xlu1 %v1951_v14, %s3409_s20 }
0x1479   :  { %v1844_v45 = vpop.permute.xlu0 %1843 }
0x147a   :  { %v1846_v50 = vmul.f32 %v3234_v37, %v1844_v45 }
0x147c   :  { %1848 = vrot.lane.b32.xlu0 %v1846_v50, %s3409_s20 }
0x14e3   :  { %v1954_v51 = vpop.permute.xlu1 %1953 }
0x14e4   :  { %v1956_v53 = vadd.f32 %v1954_v51, %v1758_v23  ;;  %v1999_v51 = vld [vmem:[#allocation2 + $0x1c] sm:$0xf] }
0x14e6   :  { %3235 = vtanh.f32 %v1956_v53 }
0x14ee   :  { %v1849_v55 = vpop.permute.xlu0 %1848 }
0x14ef   :  { %v1851_v42 = vadd.f32 %v1849_v55, %v1757_v38 }
0x14f1   :  { %3237 = vtanh.f32 %v1851_v42 }
0x14f3   :  { %v3236_v59 = vpop.eup %3235 }
0x14f4   :  { %v1958_v61 = vsub.f32 %v3974_v46, %v3236_v59 }
0x14f6   :  { %1960 = vrot.lane.b32.xlu1 %v1958_v61, %s3412_s25 }
0x14fa   :  { %1980 = vperm.xlu1 %3154, %v2789_v62  }
0x14fe   :  { %v3238_v5 = vpop.eup %3237  ;;  %1972 = vperm.xlu1 %3154, %v2788_v2  }
0x14ff   :  { %v1853_v32 = vsub.f32 %v3985_v4, %v3238_v5 }
0x1501   :  { %1855 = vrot.lane.b32.xlu0 %v1853_v32, %s3412_s25 }
0x1568   :  { %v1961_v6 = vpop.permute.xlu1 %1960 }
0x1569   :  { %v1963_v35 = vmul.f32 %v3232_v29, %v1961_v6 }
0x156b   :  { %1965 = vrot.lane.b32.xlu0 %v1963_v35, %s3410_s4 }
0x1573   :  { %v1856_v31 = vpop.permute.xlu0 %1855 }
0x1574   :  { %v1858_v33 = vmul.f32 %v3234_v37, %v1856_v31  ;;  %v2000_v37 = vld [vmem:[#allocation3] sm:$0xf] }
0x1575   :  { %v4031_v16 = vpop.permute.xlu1 %1980 }
0x1576   :  { %1860 = vrot.lane.b32.xlu0 %v1858_v33, %s3410_s4 }
0x1579   :  { %v4040_v25 = vpop.permute.xlu1 %1972 }
0x15dd   :  { %v1966_v7 = vpop.permute.xlu0 %1965 }
0x15de   :  { %v1968_v34 = vadd.f32 %v3236_v59, %v1966_v7 }
0x15e0   :  { %v1977_v11 = vsub.f32 %v1968_v34, %v3974_v46 }
0x15e2   :  { %v1983_v36 = vmul.f32 %v4031_v16, %v1977_v11 }
0x15e4   :  { %v4035_v18 = vadd.f32 %v1983_v36, %v3974_v46  ;;  %v1998_v36 = vld [vmem:[%s4250_s1] sm:$0xf] }
0x15e6   :  { %2107 = vrot.lane.b32.xlu1 %v4035_v18, %s3409_s20 }
0x15e8   :  { %v1861_v20 = vpop.permute.xlu0 %1860 }
0x15e9   :  { %v1863_v23 = vadd.f32 %v3238_v5, %v1861_v20  ;;  %v2794_v20 = vld [vmem:[%s4250_s1 + $0x1c] sm:$0xf] }
0x15eb   :  { %v1969_v19 = vsub.f32 %v1863_v23, %v3985_v4 }
0x15ed   :  { %v1975_v38 = vmul.f32 %v4040_v25, %v1969_v19 }
0x15ef   :  { %v4044_v21 = vadd.f32 %v1975_v38, %v3985_v4  ;;  %v526_v38 = vmul.f32 %v3669_v48, %v3666_v47  ;;  %v1021_v47 = vmul.f32 %v3782_v60, %v3778_v58  ;;  %v1501_v48 = vmul.f32 %v3913_v30, %v3909_v28 }
0x15f0   :  { %v771_v28 = vmul.f32 %v3729_v56, %v3725_v54  ;;  %v1749_v54 = vmul.f32 %v3974_v46, %v3970_v57 }
0x15f1   :  { %2002 = vrot.lane.b32.xlu0 %v4044_v21, %s3409_s20 }
0x1658   :  { %v2108_v15 = vpop.permute.xlu1 %2107 }
0x1659   :  { %3087 = vmatmul.mubr.msk.f32.vlgmr.msra.gmra.mxu1 %vm133_vm1, %v2108_v15  ;;  %v1991_v15 = vmul.f32 %v4035_v18, %v4031_v16 }
0x1663   :  { %v2003_v40 = vpop.permute.xlu0 %2002 }
0x1664   :  { %3076 = vmatmul.mubr.msk.f32.vlgmr.msra.gmra.mxu0 %vm133_vm1, %v2003_v40  ;;  %v1015_v40 = vmul.f32 %v3791_v3, %v3787_v0  ;;  %v533_v0 = vmul.f32 %v3662_v41, %v3659_v39  ;;  %v1985_v3 = vmul.f32 %v4044_v21, %v4040_v25  ;;  %v1259_v41 = vmul.f32 %v3851_v24, %v3847_v22  ;;  %v2266_v25 = vld [vmem:[#allocation13 + $0x18] sm:$0xff] }
0x1665   :  { %3097 = vmatprep.mubr.msk.f32.mxu0 %vm3408_vm0, %v3407_v1  ;;  %3090 = vmatpush3.msra.mxu0 %v2266_v25  ;;  %v1265_v22 = vmul.f32 %v3840_v13, %v3836_v10 }
0x1666   :  { %3091 = vmatprep.subr.mxu0 %v3407_v1 }
0x1719   :  { %v2177_v26 = vpop.f32.mrf.mxu1 }
0x171a   :  { %v2188_v27 = vadd.f32 %v2177_v26, %v3630_v43  ;;  %v2181_v45 = vadd.f32 %v2177_v26, %v2000_v37  ;;  %v1507_v26 = vmul.f32 %v3904_v8, %v3900_v17 }
0x171b   :  { %v3088_v9 = vpop.f32.mrf.mxu1 }
0x171c   :  { %2190 = vrot.lane.b32.xlu1 %v2188_v27, %s3409_s20  ;;  %v2798_v50 = vmul.f32 -1.442695, %v2181_v45  ;;  %v2265_v27 = vld [vmem:[#allocation13 + $0x10] sm:$0xff]  ;;  %v1743_v9 = vmul.f32 %v3985_v4, %v3981_v63  ;;  %v2363_v63 = vld [vmem:[#allocation12 + $0x18] sm:$0xff] }
0x171d   :  { %3092 = vmatpush3.msra.mxu0 %v2265_v27  ;;  %3100 = vmatprep.subr.mxu1 %v2363_v63  ;;  %v2262_v45 = vld [vmem:[%s4251_s2] sm:$0xf] }
0x171e   :  { %3239 = vpow2.f32 %v2798_v50  ;;  %3093 = vmatprep.subr.mxu0 %v3407_v1  ;;  %3101 = vmatpush3.msra.mxu1 %v2363_v63  ;;  %v2362_v50 = vld [vmem:[#allocation12 + $0x10] sm:$0xff] }
0x171f   :  { %3102 = vmatprep.subr.mxu1 %v2362_v50 }
0x1720   :  { %3103 = vmatpush3.msra.mxu1 %v2362_v50 }
0x1724   :  { %v2072_v29 = vpop.f32.mrf.mxu0 }
0x1725   :  { %v2083_v12 = vadd.f32 %v2072_v29, %v3640_v52  ;;  %v2076_v53 = vadd.f32 %v2072_v29, %v1999_v51 }
0x1726   :  { %v3077_v14 = vpop.f32.mrf.mxu0 }
0x1727   :  { %2085 = vrot.lane.b32.xlu0 %v2083_v12, %s3409_s20  ;;  %v2796_v55 = vmul.f32 -1.442695, %v2076_v53  ;;  %v2264_v12 = vld [vmem:[#allocation13 + $0x8] sm:$0xff]  ;;  %v2263_v14 = vld [vmem:[#allocation13] sm:$0xff] }
0x1728   :  { %3094 = vmatpush3.msra.mxu0 %v2264_v12 }
0x1729   :  { %3241 = vpow2.f32 %v2796_v55  ;;  %3095 = vmatprep.subr.mxu0 %v3407_v1  ;;  %v2360_v55 = vld [vmem:[#allocation12] sm:$0xff] }
0x172a   :  { %3096 = vmatpush3.msra.mxu0 %v2263_v14 }
0x172b   :  { %v3240_v42 = vpop.eup %3239  ;;  %3098 = vmatmul.mubr.msk.f32.vlgmr.msra.gmra.mxu0 %vm133_vm1, %v2262_v45  ;;  %3114 = vmatprep.subr.mxu0 %v3407_v1 }
0x172c   :  { %v2185_v59 = vadd.f32 1.0, %v3240_v42  ;;  %3122 = vmatprep.mubr.msk.f32.mxu0 %vm3408_vm0, %v3407_v1 }
0x172e   :  { %3243 = vrcp.f32 %v2185_v59 }
0x1736   :  { %v3242_v43 = vpop.eup %3241 }
0x1737   :  { %v2080_v61 = vadd.f32 1.0, %v3242_v43 }
0x1739   :  { %3245 = vrcp.f32 %v2080_v61 }
0x173b   :  { %v3244_v62 = vpop.eup %3243 }
0x1746   :  { %v3246_v5 = vpop.eup %3245 }
0x178e   :  { %v2191_v2 = vpop.permute.xlu1 %2190 }
0x178f   :  { %v2193_v52 = vmul.f32 %v3244_v62, %v2191_v2  ;;  %v777_v2 = vmul.f32 %v3718_v49, %v3714_v44 }
0x1791   :  { %2195 = vrot.lane.b32.xlu1 %v2193_v52, %s3409_s20 }
0x1799   :  { %v2086_v32 = vpop.permute.xlu0 %2085 }
0x179a   :  { %v2088_v6 = vmul.f32 %v3246_v5, %v2086_v32 }
0x179c   :  { %2090 = vrot.lane.b32.xlu0 %v2088_v6, %s3409_s20 }
0x1803   :  { %v2196_v35 = vpop.permute.xlu1 %2195 }
0x1804   :  { %v2198_v31 = vadd.f32 %v2196_v35, %v2000_v37 }
0x1806   :  { %3247 = vtanh.f32 %v2198_v31 }
0x180e   :  { %v2091_v33 = vpop.permute.xlu0 %2090 }
0x180f   :  { %v2093_v7 = vadd.f32 %v2091_v33, %v1999_v51  ;;  %v2361_v51 = vld [vmem:[#allocation12 + $0x8] sm:$0xff] }
0x1810   :  { %3104 = vmatprep.subr.mxu1 %v2361_v51 }
0x1811   :  { %3249 = vtanh.f32 %v2093_v7  ;;  %3105 = vmatpush3.msra.mxu1 %v2361_v51  ;;  %v2807_v51 = vld [vmem:[#allocation6] ss:$0 sm:$0xff] }
0x1812   :  { %3106 = vmatprep.subr.mxu1 %v2360_v55 }
0x1813   :  { %v4058_v34 = vpop.eup %3247  ;;  %3107 = vmatpush3.msra.mxu1 %v2360_v55 }
0x1814   :  { %v2200_v11 = vsub.f32 %v4035_v18, %v4058_v34  ;;  %3125 = vmatprep.subr.mxu1 %v3407_v1 }
0x1816   :  { %2202 = vrot.lane.b32.xlu1 %v2200_v11, %s3412_s25 }
0x181a   :  { %2222 = vperm.xlu1 %3154, %v1998_v36  }
0x181e   :  { %v4069_v23 = vpop.eup %3249  ;;  %2214 = vperm.xlu1 %3154, %v2794_v20  }
0x181f   :  { %v2095_v19 = vsub.f32 %v4044_v21, %v4069_v23 }
0x1821   :  { %2097 = vrot.lane.b32.xlu0 %v2095_v19, %s3412_s25 }
0x1822   :  { %528 = vrot.lane.b32.xlu1 %v526_v38, %s3409_s20 }
0x1826   :  { %1993 = vrot.lane.b32.xlu1 %v1991_v15, %s3409_s20 }
0x182a   :  { %1017 = vrot.lane.b32.xlu1 %v1015_v40, %s3409_s20 }
0x182e   :  { %1509 = vrot.lane.b32.xlu1 %v1507_v26, %s3409_s20 }
0x1832   :  { %1023 = vrot.lane.b32.xlu1 %v1021_v47, %s3409_s20 }
0x1836   :  { %1503 = vrot.lane.b32.xlu1 %v1501_v48, %s3409_s20 }
0x183a   :  { %535 = vrot.lane.b32.xlu1 %v533_v0, %s3409_s20  ;;  %v2343_v0 = vpop.f32.mrf.mxu0 }
0x183e   :  { %1987 = vrot.lane.b32.xlu1 %v1985_v3, %s3409_s20  ;;  %v3099_v3 = vpop.f32.mrf.mxu0 }
0x1888   :  { %v2203_v17 = vpop.permute.xlu1 %2202 }
0x1889   :  { %v2205_v8 = vmul.f32 %v3244_v62, %v2203_v17  ;;  %v2799_v17 = vld [vmem:[%s4259_s10] ss:$0 sm:$0xff] }
0x188b   :  { %2207 = vrot.lane.b32.xlu0 %v2205_v8, %s3410_s4  ;;  %v2344_v8 = vadd.f32 %v2799_v17, %v2343_v0 }
0x1893   :  { %v2098_v58 = vpop.permute.xlu0 %2097 }
0x1894   :  { %v2100_v60 = vmul.f32 %v3246_v5, %v2098_v58  ;;  %v2801_v58 = vld [vmem:[%s4257_s8] ss:$0 sm:$0xff] }
0x1895   :  { %v2223_v16 = vpop.permute.xlu1 %2222 }
0x1896   :  { %2102 = vrot.lane.b32.xlu0 %v2100_v60, %s3410_s4  ;;  %v2354_v60 = vadd.f32 %v2801_v58, %v2344_v8 }
0x1899   :  { %v4102_v39 = vpop.permute.xlu1 %2214 }
0x189a   :  { %773 = vrot.lane.b32.xlu0 %v771_v28, %s3409_s20 }
0x189d   :  { %v529_v30 = vpop.permute.xlu1 %528 }
0x189e   :  { %532 = vst.msk [vmem:[#allocation4] sm:$0xf] %vm531_vm3, %v529_v30  ;;  %1261 = vrot.lane.b32.xlu0 %v1259_v41, %s3409_s20  ;;  %v2806_v30 = vld [vmem:[%s4260_s11] ss:$0 sm:$0xff] }
0x18a1   :  { %v1994_v56 = vpop.permute.xlu1 %1993 }
0x18a2   :  { %1996 = vst.msk [vmem:[#allocation5 + $0x4] sm:$0xf] %vm531_vm3, %v1994_v56  ;;  %1751 = vrot.lane.b32.xlu0 %v1749_v54, %s3409_s20 }
0x18a5   :  { %v1018_v24 = vpop.permute.xlu1 %1017 }
0x18a6   :  { %1020 = vst.msk [vmem:[#allocation4 + $0x8] sm:$0xf] %vm531_vm3, %v1018_v24  ;;  %1267 = vrot.lane.b32.xlu0 %v1265_v22, %s3409_s20 }
0x18a9   :  { %v1510_v57 = vpop.permute.xlu1 %1509 }
0x18aa   :  { %1512 = vst.msk [vmem:[#allocation5 + $0xc] sm:$0xf] %vm531_vm3, %v1510_v57  ;;  %1745 = vrot.lane.b32.xlu0 %v1743_v9, %s3409_s20 }
0x18ad   :  { %v1024_v46 = vpop.permute.xlu1 %1023 }
0x18ae   :  { %1026 = vst.msk [vmem:[#allocation5 + $0x14] sm:$0xf] %vm531_vm3, %v1024_v46 }
0x18b1   :  { %v1504_v29 = vpop.permute.xlu1 %1503 }
0x18b2   :  { %1506 = vst.msk [vmem:[#allocation4 + $0x10] sm:$0xf] %vm531_vm3, %v1504_v29 }
0x18b5   :  { %v536_v10 = vpop.permute.xlu1 %535 }
0x18b6   :  { %538 = vst.msk [vmem:[#allocation5 + $0x1c] sm:$0xf] %vm531_vm3, %v536_v10 }
0x18b9   :  { %v1988_v13 = vpop.permute.xlu1 %1987 }
0x18ba   :  { %1990 = vst.msk [vmem:[#allocation4 + $0x18] sm:$0xf] %vm531_vm3, %v1988_v13 }
0x18fd   :  { %v2208_v4 = vpop.permute.xlu0 %2207 }
0x18fe   :  { %v2210_v37 = vadd.f32 %v4058_v34, %v2208_v4 }
0x1900   :  { %v2219_v53 = vsub.f32 %v2210_v37, %v4035_v18 }
0x1902   :  { %v2225_v42 = vmul.f32 %v2223_v16, %v2219_v53 }
0x1904   :  { %v4138_v59 = vadd.f32 %v2225_v42, %v4035_v18 }
0x1906   :  { %v2233_v43 = vmul.f32 %v4138_v59, %v2223_v16  ;;  %v2356_v16 = vrot.slane %v2354_v60, 4 }
0x1908   :  { %v2103_v61 = vpop.permute.xlu0 %2102  ;;  %2235 = vrot.lane.b32.xlu0 %v2233_v43, %s3409_s20  ;;  %v2359_v28 = vsel %vm2358_vm4, %v2354_v60, %v2356_v16  ;;  %v2525_v60 = vld [vmem:[%s4262_s13] sm:$0xf] }
0x1909   :  { %v2105_v62 = vadd.f32 %v4069_v23, %v2103_v61 }
0x190b   :  { %v2211_v52 = vsub.f32 %v2105_v62, %v4044_v21 }
0x190c   :  { %v774_v5 = vpop.permute.xlu0 %773  ;;  %779 = vrot.lane.b32.xlu0 %v777_v2, %s3409_s20 }
0x190d   :  { %v2217_v18 = vmul.f32 %v4102_v39, %v2211_v52  ;;  %776 = vst.msk [vmem:[#allocation4 + $0x4] sm:$0xf] %vm531_vm3, %v774_v5 }
0x190f   :  { %v4151_v32 = vadd.f32 %v2217_v18, %v4044_v21 }
0x1910   :  { %v1262_v6 = vpop.permute.xlu0 %1261 }
0x1911   :  { %1264 = vst.msk [vmem:[#allocation4 + $0xc] sm:$0xf] %vm531_vm3, %v1262_v6  ;;  %v2227_v35 = vmul.f32 %v4151_v32, %v4102_v39 }
0x1913   :  { %2229 = vrot.lane.b32.xlu0 %v2227_v35, %s3409_s20 }
0x1914   :  { %v1752_v44 = vpop.permute.xlu0 %1751  ;;  %v2250_v34 = vld [vmem:[#allocation4] sm:$0xff] }
0x1915   :  { %1754 = vst.msk [vmem:[#allocation5 + $0x8] sm:$0xf] %vm531_vm3, %v1752_v44 }
0x1918   :  { %v1268_v49 = vpop.permute.xlu0 %1267  ;;  %v2251_v23 = vld [vmem:[#allocation4 + $0x8] sm:$0xff] }
0x1919   :  { %1270 = vst.msk [vmem:[#allocation5 + $0x10] sm:$0xf] %vm531_vm3, %v1268_v49 }
0x191c   :  { %v1746_v31 = vpop.permute.xlu0 %1745  ;;  %v2255_v7 = vld [vmem:[#allocation5 + $0x8] sm:$0xff] }
0x191d   :  { %1748 = vst.msk [vmem:[#allocation4 + $0x14] sm:$0xf] %vm531_vm3, %v1746_v31  ;;  %v4164_v19 = vadd.f32 %v2255_v7, %v2251_v23 }
0x1920   :  { %v2256_v38 = vld [vmem:[#allocation5 + $0x10] sm:$0xff] }
0x1924   :  { %v2252_v36 = vld [vmem:[#allocation4 + $0x10] sm:$0xff] }
0x1925   :  { %v4168_v40 = vadd.f32 %v2256_v38, %v2252_v36 }
0x197a   :  { %v2236_v33 = vpop.permute.xlu0 %2235 }
0x197b   :  { %2238 = vst.msk [vmem:[#allocation5] sm:$0xf] %vm531_vm3, %v2236_v33 }
0x197e   :  { %v780_v21 = vpop.permute.xlu0 %779 }
0x197f   :  { %782 = vst.msk [vmem:[#allocation5 + $0x18] sm:$0xf] %vm531_vm3, %v780_v21 }
0x1982   :  { %v2254_v11 = vld [vmem:[#allocation5] sm:$0xff] }
0x1983   :  { %v4162_v20 = vadd.f32 %v2254_v11, %v2250_v34 }
0x1985   :  { %v2230_v15 = vpop.permute.xlu0 %2229  ;;  %3108 = vmatprep.mubr.msk.f32.mxu1 %vm133_vm1, %v4162_v20 }
0x1986   :  { %2232 = vst.msk [vmem:[#allocation4 + $0x1c] sm:$0xf] %vm531_vm3, %v2230_v15  ;;  %3109 = vmatmul.mubr.msk.f32.vlgmr.msra.gmra.mxu1 %vm133_vm1, %v4164_v19  ;;  %v2257_v47 = vld [vmem:[#allocation5 + $0x18] sm:$0xff] }
0x1987   :  { %3111 = vmatprep.mubr.msk.f32.mxu1 %vm133_vm1, %v4168_v40 }
0x198d   :  { %v2253_v26 = vld [vmem:[#allocation4 + $0x18] sm:$0xff] }
0x198e   :  { %v4175_v48 = vadd.f32 %v2257_v47, %v2253_v26 }
0x1990   :  { %3112 = vmatmul.mubr.msk.f32.gmra.mxu1 %vm133_vm1, %v4175_v48 }
0x1991   :  { %3133 = vmatprep.mubr.msk.f32.mxu1 %vm3408_vm0, %v3407_v1 }
0x1a46   :  { %v3110_v39 = vpop.f32.mrf.mxu1 }
0x1a47   :  { %v2448_v41 = vadd.f32 %v3110_v39, %v2359_v28 }
0x1a48   :  { %v2442_v25 = vpop.f32.mrf.mxu1 }
0x1a49   :  { %v2462_v27 = vmax.f32 %v2448_v41, 0.0  ;;  %v2443_v54 = vadd.f32 %v2442_v25, %v2359_v28 }
0x1a4b   :  { %v2473_v56 = vmul.f32 %v2806_v30, %v2462_v27  ;;  %v2461_v22 = vmax.f32 %v2443_v54, 0.0 }
0x1a4d   :  { %v2472_v24 = vmul.f32 %v2806_v30, %v2461_v22  ;;  %v2479_v9 = vsel %vm133_vm1, %v2473_v56, 0.0 }
0x1a4e   :  { %2480 = vadd.xlane.f32.xlu0 %v2479_v9 }
0x1a4f   :  { %v2476_v57 = vsel %vm133_vm1, %v2472_v24, 0.0 }
0x1a50   :  { %v3113_v46 = vpop.f32.mrf.mxu1  ;;  %2477 = vadd.xlane.f32.xlu1 %v2476_v57 }
0x1a51   :  { %v2458_v29 = vadd.f32 %v3113_v46, %v2359_v28 }
0x1a52   :  { %v2452_v10 = vpop.f32.mrf.mxu1 }
0x1a53   :  { %v2464_v13 = vmax.f32 %v2458_v29, 0.0  ;;  %v2453_v12 = vadd.f32 %v2452_v10, %v2359_v28 }
0x1a55   :  { %v2475_v14 = vmul.f32 %v2806_v30, %v2464_v13  ;;  %v2463_v63 = vmax.f32 %v2453_v12, 0.0 }
0x1a57   :  { %v2474_v4 = vmul.f32 %v2806_v30, %v2463_v63  ;;  %v2485_v37 = vsel %vm133_vm1, %v2475_v14, 0.0 }
0x1a58   :  { %2486 = vadd.xlane.f32.xlu1 %v2485_v37 }
0x1a59   :  { %v2482_v45 = vsel %vm133_vm1, %v2474_v4, 0.0 }
0x1a5a   :  { %2483 = vadd.xlane.f32.xlu0 %v2482_v45 }
0x1ad7   :  { %v2481_v53 = vpop.xlane.xlu0 %2480 }
0x1ad8   :  { %v2496_v43 = vadd.f32 %v2807_v51, %v2481_v53 }
0x1ad9   :  { %v2478_v50 = vpop.xlane.xlu1 %2477 }
0x1ada   :  { %v2495_v55 = vadd.f32 %v2807_v51, %v2478_v50  ;;  %v2501_v5 = vsel %vm2499_vm5, %v2496_v43, -inf }
0x1adc   :  { %v2500_v2 = vsel %vm2499_vm5, %v2495_v55, -inf }
0x1add   :  { %v2504_v35 = vmax.f32 %v2500_v2, %v2501_v5 }
0x1ae1   :  { %v2487_v42 = vpop.xlane.xlu1 %2486 }
0x1ae2   :  { %v2498_v61 = vadd.f32 %v2807_v51, %v2487_v42 }
0x1ae3   :  { %v2484_v62 = vpop.xlane.xlu0 %2483 }
0x1ae4   :  { %v2497_v52 = vadd.f32 %v2807_v51, %v2484_v62  ;;  %v2503_v18 = vsel %vm2499_vm5, %v2498_v61, -inf }
0x1ae6   :  { %v2502_v6 = vsel %vm2499_vm5, %v2497_v52, -inf }
0x1ae7   :  { %v2505_v44 = vmax.f32 %v2502_v6, %v2503_v18 }
0x1ae9   :  { %v2506_v49 = vmax.f32 %v2504_v35, %v2505_v44 }
0x1aeb   :  { %v2507_v31 = vrot.slane %v2506_v49, 4 }
0x1aed   :  { %v2508_v33 = vmax.f32 %v2506_v49, %v2507_v31 }
0x1aef   :  { %v2509_v21 = vrot.slane %v2508_v33, 2 }
0x1af1   :  { %v2510_v7 = vmax.f32 %v2508_v33, %v2509_v21 }
0x1af3   :  { %v2511_v34 = vrot.slane %v2510_v7, 1 }
0x1af5   :  { %v2512_v11 = vmax.f32 %v2510_v7, %v2511_v34 }
0x1af7   :  { %v2516_v36 = vsub.f32 %v2498_v61, %v2512_v11  ;;  %v2515_v23 = vsub.f32 %v2497_v52, %v2512_v11  ;;  %v2514_v38 = vsub.f32 %v2496_v43, %v2512_v11  ;;  %v2513_v26 = vsub.f32 %v2495_v55, %v2512_v11 }
0x1af9   :  { %v2523_v15 = vmul.f32 1.442695, %v2516_v36  ;;  %v2521_v47 = vmul.f32 1.442695, %v2515_v23  ;;  %v2519_v0 = vmul.f32 1.442695, %v2514_v38 }
0x1afa   :  { %v2517_v3 = vmul.f32 1.442695, %v2513_v26 }
0x1afb   :  { %3251 = vpow2.f32 %v2523_v15 }
0x1afc   :  { %3253 = vpow2.f32 %v2521_v47 }
0x1afd   :  { %3255 = vpow2.f32 %v2519_v0 }
0x1afe   :  { %3257 = vpow2.f32 %v2517_v3 }
0x1b08   :  { %v3252_v17 = vpop.eup %3251 }
0x1b09   :  { %3115 = vmatpush3.msra.mxu0 %v3252_v17  ;;  %v3254_v8 = vpop.eup %3253 }
0x1b0a   :  { %3116 = vmatprep.subr.mxu0 %v3407_v1  ;;  %v3256_v58 = vpop.eup %3255 }
0x1b0b   :  { %3117 = vmatpush3.msra.mxu0 %v3254_v8  ;;  %v3258_v16 = vpop.eup %3257 }
0x1b0c   :  { %3118 = vmatprep.subr.mxu0 %v3407_v1 }
0x1b0d   :  { %3119 = vmatpush3.msra.mxu0 %v3256_v58 }
0x1b0e   :  { %3120 = vmatprep.subr.mxu0 %v3407_v1 }
0x1b0f   :  { %3121 = vmatpush3.msra.mxu0 %v3258_v16 }
0x1b10   :  { %3123 = vmatmul.mubr.msk.f32.vlgmr.msra.gmra.mxu0 %vm133_vm1, %v2525_v60 }
0x1bd0   :  { %v2595_v28 = vpop.f32.mrf.mxu0 }
0x1bd1   :  { %3259 = vrcp.f32 %v2595_v28 }
0x1bd2   :  { %v3124_v39 = vpop.f32.mrf.mxu0 }
0x1bde   :  { %v3260_v41 = vpop.eup %3259 }
0x1bdf   :  { %v2601_v30 = vrot.slane %v3260_v41, 4 }
0x1be1   :  { %v2603_v25 = vsel %vm2358_vm4, %v3260_v41, %v2601_v30 }
0x1be2   :  { %v2607_v27 = vmul.f32 %v3252_v17, %v2603_v25  ;;  %v2606_v54 = vmul.f32 %v3254_v8, %v2603_v25  ;;  %v2605_v56 = vmul.f32 %v3256_v58, %v2603_v25  ;;  %v2604_v22 = vmul.f32 %v3258_v16, %v2603_v25 }
0x1be4   :  { %2629 = vperm.xlu0 %3153, %v2607_v27   ;;  %2611 = vst.msk [vmem:[%s4265_s16 + $0x18] sm:$0xff] %vm2499_vm5, %v2607_v27  ;;  %2624 = vperm.xlu1 %3154, %v2606_v54   ;;  %2610 = vst.msk [vmem:[%s4265_s16 + $0x10] sm:$0xff] %vm2499_vm5, %v2606_v54 }
0x1be5   :  { %2609 = vst.msk [vmem:[%s4265_s16 + $0x8] sm:$0xff] %vm2499_vm5, %v2605_v56  ;;  %2608 = vst.msk [vmem:[%s4265_s16] sm:$0xff] %vm2499_vm5, %v2604_v22 }
0x1be8   :  { %2619 = vperm.xlu1 %3154, %v2605_v56   ;;  %2614 = vperm.xlu0 %3153, %v2604_v22  }
0x1bec   :  { %2240 = vrot.lane.b32.xlu1 %v4151_v32, %s3409_s20  ;;  %2245 = vrot.lane.b32.xlu0 %v4138_v59, %s3409_s20  ;;  %v2636_v59 = vld [vmem:[%s4262_s13] sm:$0xf] }
0x1c5f   :  { %v2630_v24 = vpop.permute.xlu0 %2629  ;;  %v2625_v9 = vpop.permute.xlu1 %2624 }
0x1c60   :  { %v2635_v57 = vmul.f32 %v2630_v24, %v4175_v48  ;;  %v2634_v46 = vmul.f32 %v2625_v9, %v4168_v40 }
0x1c62   :  { %3126 = vmatpush3.msra.mxu1 %v2635_v57 }
0x1c63   :  { %3127 = vmatprep.subr.mxu1 %v3407_v1  ;;  %v2620_v29 = vpop.permute.xlu1 %2619  ;;  %v2615_v10 = vpop.permute.xlu0 %2614 }
0x1c64   :  { %v2633_v13 = vmul.f32 %v2620_v29, %v4164_v19  ;;  %3128 = vmatpush3.msra.mxu1 %v2634_v46  ;;  %v2632_v32 = vmul.f32 %v2615_v10, %v4162_v20 }
0x1c65   :  { %3129 = vmatprep.subr.mxu1 %v3407_v1 }
0x1c66   :  { %3130 = vmatpush3.msra.mxu1 %v2633_v13 }
0x1c67   :  { %3131 = vmatprep.subr.mxu1 %v3407_v1  ;;  %v2241_v40 = vpop.permute.xlu1 %2240  ;;  %v2246_v48 = vpop.permute.xlu0 %2245 }
0x1c68   :  { %2243 = vst.msk [vmem:[#allocation16] sm:$0xf] %vm531_vm3, %v2241_v40  ;;  %2249 = vst.msk [vmem:[#allocation16 + $0x4] sm:$0xf] %vm531_vm3, %v2246_v48  ;;  %3132 = vmatpush3.msra.mxu1 %v2632_v32 }
0x1c69   :  { %3134 = vmatmul.mubr.msk.f32.vlgmr.msra.gmra.mxu1 %vm133_vm1, %v2636_v59 }
0x1c6a   :  { %3360 = shalt.err (!%p3357_p10)
}
0x1c6b   :  { %s3414_s13 = smov 4   ;;  %s3415_s18 = smov [#allocation15]  }
0x1c6c   :  { %2732 = dma.vmem_to_hbm [thread:$0]  %s2727_s27, 128, %s4264_s15, [#allocation17], %s3409_s20, %s3409_s20, %s3414_s13  }
0x1c6d   :  { %s2717_s19 = sshll.u32 %s3415_s18, 4  ;;  %s2718_s19 = int_to_ptr.vmem [resolvable:$true] %s2717_s19 }
0x1c6e   :  { %s3369_s1 = scalar_lea.vmem %s2718_s19, 64  ;;  %p3374_p12 = scmp.lt.s32.totalorder %s2718_s19, %s2718_s19 }
0x1c6f   :  { %p3370_p11 = scmp.ne.s32.totalorder %s2718_s19, %s3369_s1  ;;  %p3375_p13 = scmp.lt.s32.totalorder %s3369_s1, %s3369_s1 }
0x1c71   :  { %p3376_p0 = por %p3375_p13, %p3374_p12 }
0x1c73   :  { %p3377_p1 = pnand %p3376_p0, %p3370_p11 }
0x1d29   :  { %v2706_v1 = vpop.f32.mrf.mxu1 }
0x1d2a   :  { %2710 = vst.msk [vmem:[#allocation15] sm:$0xf] %vm531_vm3, %v2706_v1 }
0x1d2b   :  { %v3135_v20 = vpop.f32.mrf.mxu1 }
0x1d2c   :  { %3380 = shalt.err (!%p3377_p1)
}
0x1d2d   :  { %2720 = dma.vmem_to_hbm [thread:$0]  %s2718_s19, 64, %s4263_s14, [#allocation9]  }
0x1d2e   :  { %3395 = dma.done.wait [#allocation9], 64  }
0x1d2f   :  { %3396 = vsyncadd [#allocation9], 4294967232 }
0x1d30   :  { %3397 = dma.done.wait [#allocation17], 128  }
0x1d31   :  { %3398 = vsyncadd [#allocation17], 4294967168 }
0x1d32   :  { %2743 = vsyncpa [#allocation8], 1 }
0x1d33   :  { %2744 = vsyncpa [#allocation11], 1 }
0x1d34   :  { %2745 = vsyncpa [#allocation14], 1 }
0x1d35   :  { %2746 = vsyncpa [#allocation9], 1 }
0x1d36   :  { %2747 = vsyncpa [#allocation17], 1 }

</bundles_post_ra>
